<compile_context>
chip_gen: v7x
topology: tpu7x:2x2x1
jax: 0.10.0
libtpu: 0.0.40
codegen_flags: <defaults>
</compile_context>

<pallas_src>
import jax
import jax.numpy as jnp
from jax.experimental import pallas as pl
from jax.experimental.pallas import tpu as pltpu


# --------------------------------------------------------------------------
# Fused kernel: all LSTM layers + all timesteps + fc1 + ReLU
# --------------------------------------------------------------------------
def _lstm1_fused_kernel(x_ref, wih_ref, whh_ref, b_ref, fcw_ref, fcb_ref, out_ref):
    """x_ref:   (B, S, D)      input sequence (batch_first)
       wih_ref: (L, Dp, 4H)    W_ih^T per layer, zero-row-padded to Dp=max(D,H)
       whh_ref: (L, H, 4H)     W_hh^T per layer
       b_ref:   (L, 1, 4H)     combined bias b_ih + b_hh
       fcw_ref: (H, P)         fc1 weight^T
       fcb_ref: (1, P)         fc1 bias
       out_ref: (L*B, P)       relu(fc1(h_out.view(-1, H)))"""
    B, S, D = x_ref.shape
    L = wih_ref.shape[0]
    H = whh_ref.shape[1]

    hp = jax.lax.Precision.HIGHEST

    x = x_ref[...].astype(jnp.float32)                  # (B, S, D), tiny
    seq = [x[:, t, :] for t in range(S)]                # S x (B, D), static slices
    in_width = D

    h_finals = []
    for l in range(L):                                  # static, unrolled
        w_in = wih_ref[l][:in_width, :]                 # (in_width, 4H)
        w_hh = whh_ref[l]                               # (H, 4H)
        b_l = b_ref[l]                                  # (1, 4H)

        # One MXU matmul for the input projection of ALL timesteps (+ bias).
        stacked = jnp.concatenate(seq, axis=0)          # (S*B, in_width), time-major
        xproj = jnp.dot(stacked, w_in, precision=hp,
                        preferred_element_type=jnp.float32) + b_l   # (S*B, 4H)

        h = jnp.zeros((B, H), jnp.float32)
        c = jnp.zeros((B, H), jnp.float32)
        out_seq = []
        for t in range(S):                              # static, unrolled (serial)
            gates = xproj[t * B:(t + 1) * B, :] + jnp.dot(
                h, w_hh, precision=hp, preferred_element_type=jnp.float32)
            sg = jax.nn.sigmoid(gates)                  # one EUP pass, full gates
            tg = jnp.tanh(gates)                        # one EUP pass, full gates
            i_g = sg[:, 0 * H:1 * H]                    # PyTorch gate order
            f_g = sg[:, 1 * H:2 * H]                    # [i, f, g, o]
            g_g = tg[:, 2 * H:3 * H]
            o_g = sg[:, 3 * H:4 * H]
            c = f_g * c + i_g * g_g
            h = o_g * jnp.tanh(c)
            out_seq.append(h)
        seq = out_seq                                   # feed next layer
        in_width = H
        h_finals.append(h)                              # final hidden, layer l

    # h_out.view(-1, H): rows ordered layer-major, then batch.  One matmul.
    h_all = jnp.concatenate(h_finals, axis=0)           # (L*B, H)
    y = jnp.dot(h_all, fcw_ref[...], precision=hp,
                preferred_element_type=jnp.float32) + fcb_ref[...]
    out_ref[...] = jnp.maximum(y, 0.0).astype(out_ref.dtype)


# --------------------------------------------------------------------------
# Wrapper: one pallas_call, everything whole-array in VMEM
# --------------------------------------------------------------------------
@jax.jit
def lstm1_forward(x, params):
    x = x.astype(jnp.float32)                           # (B, S, D)
    B = x.shape[0]
    wih = params["w_ih_stacked"]                        # (L, Dp, 4H)
    whh = params["w_hh_stacked"]                        # (L, H, 4H)
    b = params["b_stacked"]                             # (L, 1, 4H)
    fcw = params["fc_w_t"]                              # (H, P)
    fcb = params["fc_b"]                                # (1, P)
    L = wih.shape[0]
    P = fcw.shape[1]
    vmem = pl.BlockSpec(memory_space=pltpu.MemorySpace.VMEM)
    return pl.pallas_call(
        _lstm1_fused_kernel,
        out_shape=jax.ShapeDtypeStruct((L * B, P), jnp.float32),
        in_specs=[vmem, vmem, vmem, vmem, vmem, vmem],
        out_specs=vmem,
    )(x, wih, whh, b, fcw, fcb)


# --------------------------------------------------------------------------
# Deterministic parameter init (PyTorch-style uniform(-1/sqrt(H), 1/sqrt(H)))
# --------------------------------------------------------------------------
def init_params(key, input_size, hidden_size, pred_len, num_layers):
    H = hidden_size
    Dp = max(input_size, H)                             # padded input-proj rows
    bound = 1.0 / jnp.sqrt(jnp.float32(H))
    w_ihs, w_hhs, bs = [], [], []
    for layer in range(num_layers):
        d_in = input_size if layer == 0 else H
        key, k1, k2, k3, k4 = jax.random.split(key, 5)
        w_ih = jax.random.uniform(k1, (4 * H, d_in), jnp.float32, -bound, bound)
        w_hh = jax.random.uniform(k2, (4 * H, H), jnp.float32, -bound, bound)
        b_ih = jax.random.uniform(k3, (4 * H,), jnp.float32, -bound, bound)
        b_hh = jax.random.uniform(k4, (4 * H,), jnp.float32, -bound, bound)
        w_ih_t = w_ih.T                                 # (d_in, 4H)
        if d_in < Dp:                                   # zero-pad to common shape
            w_ih_t = jnp.concatenate(
                [w_ih_t, jnp.zeros((Dp - d_in, 4 * H), jnp.float32)], axis=0)
        w_ihs.append(w_ih_t)                            # (Dp, 4H)
        w_hhs.append(w_hh.T)                            # (H, 4H)
        bs.append((b_ih + b_hh).reshape(1, 4 * H))      # combined bias
    key, k5, k6 = jax.random.split(key, 3)
    fc_w = jax.random.uniform(k5, (pred_len, H), jnp.float32, -bound, bound)
    fc_b = jax.random.uniform(k6, (pred_len,), jnp.float32, -bound, bound)
    return {
        "w_ih_stacked": jnp.stack(w_ihs, axis=0),       # (L, Dp, 4H)
        "w_hh_stacked": jnp.stack(w_hhs, axis=0),       # (L, H, 4H)
        "b_stacked": jnp.stack(bs, axis=0),             # (L, 1, 4H)
        "fc_w_t": fc_w.T,                               # (H, pred_len)
        "fc_b": fc_b.reshape(1, pred_len),              # (1, pred_len)
    }


if __name__ == "__main__":
    # Small shapes consistent with the module's forward:
    #   x: (batch, hist_len, input_size)
    batch = 2
    hist_len = 8
    input_size = 4
    hidden_size = 32
    pred_len = 4
    num_layers = 2

    key = jax.random.PRNGKey(0)
    key, kx = jax.random.split(key)
    x = jax.random.normal(kx, (batch, hist_len, input_size), jnp.float32)

    params = init_params(key, input_size, hidden_size, pred_len, num_layers)

    out = lstm1_forward(x, params)
    jax.block_until_ready(out)
    assert out.shape == (num_layers * batch, pred_len), out.shape
    assert bool(jnp.all(out >= 0.0))                    # ReLU output
    print("KERNEL_OK")
</pallas_src>

<mosaic_0001>
module attributes {stable_mosaic.version = 11 : i64} {
  func.func @_lstm1_fused_kernel(%arg0: memref<2x8x4xf32, #tpu.memory_space<vmem>>, %arg1: memref<2x32x128xf32, #tpu.memory_space<vmem>>, %arg2: memref<2x32x128xf32, #tpu.memory_space<vmem>>, %arg3: memref<2x1x128xf32, #tpu.memory_space<vmem>>, %arg4: memref<32x4xf32, #tpu.memory_space<vmem>>, %arg5: memref<1x4xf32, #tpu.memory_space<vmem>>, %arg6: memref<4x4xf32, #tpu.memory_space<vmem>>) attributes {dimension_semantics = [], scalar_prefetch = 0 : i64, scratch_operands = 0 : i64, tpu.core_type = #tpu.core_type<tc>} {
    %c0 = arith.constant 0 : index
    %c0_0 = arith.constant 0 : index
    %c0_1 = arith.constant 0 : index
    %0 = vector.load %arg0[%c0, %c0_0, %c0_1] : memref<2x8x4xf32, #tpu.memory_space<vmem>>, vector<2x8x4xf32>
    %1 = vector.extract_strided_slice %0 {offsets = [0, 0, 0], sizes = [2, 1, 4], strides = [1, 1, 1]} : vector<2x8x4xf32> to vector<2x1x4xf32>
    %2 = vector.shape_cast %1 : vector<2x1x4xf32> to vector<2x4xf32>
    %3 = vector.extract_strided_slice %0 {offsets = [0, 1, 0], sizes = [2, 1, 4], strides = [1, 1, 1]} : vector<2x8x4xf32> to vector<2x1x4xf32>
    %4 = vector.shape_cast %3 : vector<2x1x4xf32> to vector<2x4xf32>
    %5 = vector.extract_strided_slice %0 {offsets = [0, 2, 0], sizes = [2, 1, 4], strides = [1, 1, 1]} : vector<2x8x4xf32> to vector<2x1x4xf32>
    %6 = vector.shape_cast %5 : vector<2x1x4xf32> to vector<2x4xf32>
    %7 = vector.extract_strided_slice %0 {offsets = [0, 3, 0], sizes = [2, 1, 4], strides = [1, 1, 1]} : vector<2x8x4xf32> to vector<2x1x4xf32>
    %8 = vector.shape_cast %7 : vector<2x1x4xf32> to vector<2x4xf32>
    %9 = vector.extract_strided_slice %0 {offsets = [0, 4, 0], sizes = [2, 1, 4], strides = [1, 1, 1]} : vector<2x8x4xf32> to vector<2x1x4xf32>
    %10 = vector.shape_cast %9 : vector<2x1x4xf32> to vector<2x4xf32>
    %11 = vector.extract_strided_slice %0 {offsets = [0, 5, 0], sizes = [2, 1, 4], strides = [1, 1, 1]} : vector<2x8x4xf32> to vector<2x1x4xf32>
    %12 = vector.shape_cast %11 : vector<2x1x4xf32> to vector<2x4xf32>
    %13 = vector.extract_strided_slice %0 {offsets = [0, 6, 0], sizes = [2, 1, 4], strides = [1, 1, 1]} : vector<2x8x4xf32> to vector<2x1x4xf32>
    %14 = vector.shape_cast %13 : vector<2x1x4xf32> to vector<2x4xf32>
    %15 = vector.extract_strided_slice %0 {offsets = [0, 7, 0], sizes = [2, 1, 4], strides = [1, 1, 1]} : vector<2x8x4xf32> to vector<2x1x4xf32>
    %16 = vector.shape_cast %15 : vector<2x1x4xf32> to vector<2x4xf32>
    %c0_2 = arith.constant 0 : index
    %c0_3 = arith.constant 0 : index
    %c0_4 = arith.constant 0 : index
    %17 = vector.load %arg1[%c0_2, %c0_3, %c0_4] : memref<2x32x128xf32, #tpu.memory_space<vmem>>, vector<1x32x128xf32>
    %18 = vector.shape_cast %17 : vector<1x32x128xf32> to vector<32x128xf32>
    %19 = vector.extract_strided_slice %18 {offsets = [0, 0], sizes = [4, 128], strides = [1, 1]} : vector<32x128xf32> to vector<4x128xf32>
    %c0_5 = arith.constant 0 : index
    %c0_6 = arith.constant 0 : index
    %c0_7 = arith.constant 0 : index
    %20 = vector.load %arg2[%c0_5, %c0_6, %c0_7] : memref<2x32x128xf32, #tpu.memory_space<vmem>>, vector<1x32x128xf32>
    %21 = vector.shape_cast %20 : vector<1x32x128xf32> to vector<32x128xf32>
    %c0_8 = arith.constant 0 : index
    %c0_9 = arith.constant 0 : index
    %c0_10 = arith.constant 0 : index
    %22 = vector.load %arg3[%c0_8, %c0_9, %c0_10] : memref<2x1x128xf32, #tpu.memory_space<vmem>>, vector<1x1x128xf32>
    %23 = vector.shape_cast %22 : vector<1x1x128xf32> to vector<1x128xf32>
    %24 = tpu.concatenate %2, %4, %6, %8, %10, %12, %14, %16 in 0 : vector<2x4xf32>, vector<2x4xf32>, vector<2x4xf32>, vector<2x4xf32>, vector<2x4xf32>, vector<2x4xf32>, vector<2x4xf32>, vector<2x4xf32> -> vector<16x4xf32>
    %cst = arith.constant dense<0.000000e+00> : vector<16x128xf32>
    %25 = tpu.matmul %24, %19, %cst {dimension_numbers = #tpu.dot_dimension_numbers<[1], [0], [0], [1], [0, 0, 1, 1], [], []>, precision = #tpu.contract_precision<fp32>} : vector<16x4xf32>, vector<4x128xf32>, vector<16x128xf32> -> vector<16x128xf32>
    %26 = vector.broadcast %23 : vector<1x128xf32> to vector<16x128xf32>
    %27 = arith.addf %25, %26 : vector<16x128xf32>
    %cst_11 = arith.constant 0.000000e+00 : f32
    %28 = vector.broadcast %cst_11 : f32 to vector<2x32xf32>
    %cst_12 = arith.constant 0.000000e+00 : f32
    %29 = vector.broadcast %cst_12 : f32 to vector<2x32xf32>
    %30 = vector.extract_strided_slice %27 {offsets = [0, 0], sizes = [2, 128], strides = [1, 1]} : vector<16x128xf32> to vector<2x128xf32>
    %cst_13 = arith.constant dense<0.000000e+00> : vector<2x128xf32>
    %31 = tpu.matmul %28, %21, %cst_13 {dimension_numbers = #tpu.dot_dimension_numbers<[1], [0], [0], [1], [0, 0, 1, 1], [], []>, precision = #tpu.contract_precision<fp32>} : vector<2x32xf32>, vector<32x128xf32>, vector<2x128xf32> -> vector<2x128xf32>
    %32 = arith.addf %30, %31 : vector<2x128xf32>
    %33 = arith.negf %32 : vector<2x128xf32>
    %34 = math.exp %33 : vector<2x128xf32>
    %cst_14 = arith.constant 1.000000e+00 : f32
    %35 = vector.broadcast %cst_14 : f32 to vector<2x128xf32>
    %36 = arith.addf %35, %34 : vector<2x128xf32>
    %37 = arith.divf %35, %36 : vector<2x128xf32>
    %38 = math.tanh %32 : vector<2x128xf32>
    %39 = vector.extract_strided_slice %37 {offsets = [0, 0], sizes = [2, 32], strides = [1, 1]} : vector<2x128xf32> to vector<2x32xf32>
    %40 = vector.extract_strided_slice %37 {offsets = [0, 32], sizes = [2, 32], strides = [1, 1]} : vector<2x128xf32> to vector<2x32xf32>
    %41 = vector.extract_strided_slice %38 {offsets = [0, 64], sizes = [2, 32], strides = [1, 1]} : vector<2x128xf32> to vector<2x32xf32>
    %42 = vector.extract_strided_slice %37 {offsets = [0, 96], sizes = [2, 32], strides = [1, 1]} : vector<2x128xf32> to vector<2x32xf32>
    %43 = arith.mulf %40, %29 : vector<2x32xf32>
    %44 = arith.mulf %39, %41 : vector<2x32xf32>
    %45 = arith.addf %43, %44 : vector<2x32xf32>
    %46 = math.tanh %45 : vector<2x32xf32>
    %47 = arith.mulf %42, %46 : vector<2x32xf32>
    %48 = vector.extract_strided_slice %27 {offsets = [2, 0], sizes = [2, 128], strides = [1, 1]} : vector<16x128xf32> to vector<2x128xf32>
    %cst_15 = arith.constant dense<0.000000e+00> : vector<2x128xf32>
    %49 = tpu.matmul %47, %21, %cst_15 {dimension_numbers = #tpu.dot_dimension_numbers<[1], [0], [0], [1], [0, 0, 1, 1], [], []>, precision = #tpu.contract_precision<fp32>} : vector<2x32xf32>, vector<32x128xf32>, vector<2x128xf32> -> vector<2x128xf32>
    %50 = arith.addf %48, %49 : vector<2x128xf32>
    %51 = arith.negf %50 : vector<2x128xf32>
    %52 = math.exp %51 : vector<2x128xf32>
    %cst_16 = arith.constant 1.000000e+00 : f32
    %53 = vector.broadcast %cst_16 : f32 to vector<2x128xf32>
    %54 = arith.addf %53, %52 : vector<2x128xf32>
    %55 = arith.divf %53, %54 : vector<2x128xf32>
    %56 = math.tanh %50 : vector<2x128xf32>
    %57 = vector.extract_strided_slice %55 {offsets = [0, 0], sizes = [2, 32], strides = [1, 1]} : vector<2x128xf32> to vector<2x32xf32>
    %58 = vector.extract_strided_slice %55 {offsets = [0, 32], sizes = [2, 32], strides = [1, 1]} : vector<2x128xf32> to vector<2x32xf32>
    %59 = vector.extract_strided_slice %56 {offsets = [0, 64], sizes = [2, 32], strides = [1, 1]} : vector<2x128xf32> to vector<2x32xf32>
    %60 = vector.extract_strided_slice %55 {offsets = [0, 96], sizes = [2, 32], strides = [1, 1]} : vector<2x128xf32> to vector<2x32xf32>
    %61 = arith.mulf %58, %45 : vector<2x32xf32>
    %62 = arith.mulf %57, %59 : vector<2x32xf32>
    %63 = arith.addf %61, %62 : vector<2x32xf32>
    %64 = math.tanh %63 : vector<2x32xf32>
    %65 = arith.mulf %60, %64 : vector<2x32xf32>
    %66 = vector.extract_strided_slice %27 {offsets = [4, 0], sizes = [2, 128], strides = [1, 1]} : vector<16x128xf32> to vector<2x128xf32>
    %cst_17 = arith.constant dense<0.000000e+00> : vector<2x128xf32>
    %67 = tpu.matmul %65, %21, %cst_17 {dimension_numbers = #tpu.dot_dimension_numbers<[1], [0], [0], [1], [0, 0, 1, 1], [], []>, precision = #tpu.contract_precision<fp32>} : vector<2x32xf32>, vector<32x128xf32>, vector<2x128xf32> -> vector<2x128xf32>
    %68 = arith.addf %66, %67 : vector<2x128xf32>
    %69 = arith.negf %68 : vector<2x128xf32>
    %70 = math.exp %69 : vector<2x128xf32>
    %cst_18 = arith.constant 1.000000e+00 : f32
    %71 = vector.broadcast %cst_18 : f32 to vector<2x128xf32>
    %72 = arith.addf %71, %70 : vector<2x128xf32>
    %73 = arith.divf %71, %72 : vector<2x128xf32>
    %74 = math.tanh %68 : vector<2x128xf32>
    %75 = vector.extract_strided_slice %73 {offsets = [0, 0], sizes = [2, 32], strides = [1, 1]} : vector<2x128xf32> to vector<2x32xf32>
    %76 = vector.extract_strided_slice %73 {offsets = [0, 32], sizes = [2, 32], strides = [1, 1]} : vector<2x128xf32> to vector<2x32xf32>
    %77 = vector.extract_strided_slice %74 {offsets = [0, 64], sizes = [2, 32], strides = [1, 1]} : vector<2x128xf32> to vector<2x32xf32>
    %78 = vector.extract_strided_slice %73 {offsets = [0, 96], sizes = [2, 32], strides = [1, 1]} : vector<2x128xf32> to vector<2x32xf32>
    %79 = arith.mulf %76, %63 : vector<2x32xf32>
    %80 = arith.mulf %75, %77 : vector<2x32xf32>
    %81 = arith.addf %79, %80 : vector<2x32xf32>
    %82 = math.tanh %81 : vector<2x32xf32>
    %83 = arith.mulf %78, %82 : vector<2x32xf32>
    %84 = vector.extract_strided_slice %27 {offsets = [6, 0], sizes = [2, 128], strides = [1, 1]} : vector<16x128xf32> to vector<2x128xf32>
    %cst_19 = arith.constant dense<0.000000e+00> : vector<2x128xf32>
    %85 = tpu.matmul %83, %21, %cst_19 {dimension_numbers = #tpu.dot_dimension_numbers<[1], [0], [0], [1], [0, 0, 1, 1], [], []>, precision = #tpu.contract_precision<fp32>} : vector<2x32xf32>, vector<32x128xf32>, vector<2x128xf32> -> vector<2x128xf32>
    %86 = arith.addf %84, %85 : vector<2x128xf32>
    %87 = arith.negf %86 : vector<2x128xf32>
    %88 = math.exp %87 : vector<2x128xf32>
    %cst_20 = arith.constant 1.000000e+00 : f32
    %89 = vector.broadcast %cst_20 : f32 to vector<2x128xf32>
    %90 = arith.addf %89, %88 : vector<2x128xf32>
    %91 = arith.divf %89, %90 : vector<2x128xf32>
    %92 = math.tanh %86 : vector<2x128xf32>
    %93 = vector.extract_strided_slice %91 {offsets = [0, 0], sizes = [2, 32], strides = [1, 1]} : vector<2x128xf32> to vector<2x32xf32>
    %94 = vector.extract_strided_slice %91 {offsets = [0, 32], sizes = [2, 32], strides = [1, 1]} : vector<2x128xf32> to vector<2x32xf32>
    %95 = vector.extract_strided_slice %92 {offsets = [0, 64], sizes = [2, 32], strides = [1, 1]} : vector<2x128xf32> to vector<2x32xf32>
    %96 = vector.extract_strided_slice %91 {offsets = [0, 96], sizes = [2, 32], strides = [1, 1]} : vector<2x128xf32> to vector<2x32xf32>
    %97 = arith.mulf %94, %81 : vector<2x32xf32>
    %98 = arith.mulf %93, %95 : vector<2x32xf32>
    %99 = arith.addf %97, %98 : vector<2x32xf32>
    %100 = math.tanh %99 : vector<2x32xf32>
    %101 = arith.mulf %96, %100 : vector<2x32xf32>
    %102 = vector.extract_strided_slice %27 {offsets = [8, 0], sizes = [2, 128], strides = [1, 1]} : vector<16x128xf32> to vector<2x128xf32>
    %cst_21 = arith.constant dense<0.000000e+00> : vector<2x128xf32>
    %103 = tpu.matmul %101, %21, %cst_21 {dimension_numbers = #tpu.dot_dimension_numbers<[1], [0], [0], [1], [0, 0, 1, 1], [], []>, precision = #tpu.contract_precision<fp32>} : vector<2x32xf32>, vector<32x128xf32>, vector<2x128xf32> -> vector<2x128xf32>
    %104 = arith.addf %102, %103 : vector<2x128xf32>
    %105 = arith.negf %104 : vector<2x128xf32>
    %106 = math.exp %105 : vector<2x128xf32>
    %cst_22 = arith.constant 1.000000e+00 : f32
    %107 = vector.broadcast %cst_22 : f32 to vector<2x128xf32>
    %108 = arith.addf %107, %106 : vector<2x128xf32>
    %109 = arith.divf %107, %108 : vector<2x128xf32>
    %110 = math.tanh %104 : vector<2x128xf32>
    %111 = vector.extract_strided_slice %109 {offsets = [0, 0], sizes = [2, 32], strides = [1, 1]} : vector<2x128xf32> to vector<2x32xf32>
    %112 = vector.extract_strided_slice %109 {offsets = [0, 32], sizes = [2, 32], strides = [1, 1]} : vector<2x128xf32> to vector<2x32xf32>
    %113 = vector.extract_strided_slice %110 {offsets = [0, 64], sizes = [2, 32], strides = [1, 1]} : vector<2x128xf32> to vector<2x32xf32>
    %114 = vector.extract_strided_slice %109 {offsets = [0, 96], sizes = [2, 32], strides = [1, 1]} : vector<2x128xf32> to vector<2x32xf32>
    %115 = arith.mulf %112, %99 : vector<2x32xf32>
    %116 = arith.mulf %111, %113 : vector<2x32xf32>
    %117 = arith.addf %115, %116 : vector<2x32xf32>
    %118 = math.tanh %117 : vector<2x32xf32>
    %119 = arith.mulf %114, %118 : vector<2x32xf32>
    %120 = vector.extract_strided_slice %27 {offsets = [10, 0], sizes = [2, 128], strides = [1, 1]} : vector<16x128xf32> to vector<2x128xf32>
    %cst_23 = arith.constant dense<0.000000e+00> : vector<2x128xf32>
    %121 = tpu.matmul %119, %21, %cst_23 {dimension_numbers = #tpu.dot_dimension_numbers<[1], [0], [0], [1], [0, 0, 1, 1], [], []>, precision = #tpu.contract_precision<fp32>} : vector<2x32xf32>, vector<32x128xf32>, vector<2x128xf32> -> vector<2x128xf32>
    %122 = arith.addf %120, %121 : vector<2x128xf32>
    %123 = arith.negf %122 : vector<2x128xf32>
    %124 = math.exp %123 : vector<2x128xf32>
    %cst_24 = arith.constant 1.000000e+00 : f32
    %125 = vector.broadcast %cst_24 : f32 to vector<2x128xf32>
    %126 = arith.addf %125, %124 : vector<2x128xf32>
    %127 = arith.divf %125, %126 : vector<2x128xf32>
    %128 = math.tanh %122 : vector<2x128xf32>
    %129 = vector.extract_strided_slice %127 {offsets = [0, 0], sizes = [2, 32], strides = [1, 1]} : vector<2x128xf32> to vector<2x32xf32>
    %130 = vector.extract_strided_slice %127 {offsets = [0, 32], sizes = [2, 32], strides = [1, 1]} : vector<2x128xf32> to vector<2x32xf32>
    %131 = vector.extract_strided_slice %128 {offsets = [0, 64], sizes = [2, 32], strides = [1, 1]} : vector<2x128xf32> to vector<2x32xf32>
    %132 = vector.extract_strided_slice %127 {offsets = [0, 96], sizes = [2, 32], strides = [1, 1]} : vector<2x128xf32> to vector<2x32xf32>
    %133 = arith.mulf %130, %117 : vector<2x32xf32>
    %134 = arith.mulf %129, %131 : vector<2x32xf32>
    %135 = arith.addf %133, %134 : vector<2x32xf32>
    %136 = math.tanh %135 : vector<2x32xf32>
    %137 = arith.mulf %132, %136 : vector<2x32xf32>
    %138 = vector.extract_strided_slice %27 {offsets = [12, 0], sizes = [2, 128], strides = [1, 1]} : vector<16x128xf32> to vector<2x128xf32>
    %cst_25 = arith.constant dense<0.000000e+00> : vector<2x128xf32>
    %139 = tpu.matmul %137, %21, %cst_25 {dimension_numbers = #tpu.dot_dimension_numbers<[1], [0], [0], [1], [0, 0, 1, 1], [], []>, precision = #tpu.contract_precision<fp32>} : vector<2x32xf32>, vector<32x128xf32>, vector<2x128xf32> -> vector<2x128xf32>
    %140 = arith.addf %138, %139 : vector<2x128xf32>
    %141 = arith.negf %140 : vector<2x128xf32>
    %142 = math.exp %141 : vector<2x128xf32>
    %cst_26 = arith.constant 1.000000e+00 : f32
    %143 = vector.broadcast %cst_26 : f32 to vector<2x128xf32>
    %144 = arith.addf %143, %142 : vector<2x128xf32>
    %145 = arith.divf %143, %144 : vector<2x128xf32>
    %146 = math.tanh %140 : vector<2x128xf32>
    %147 = vector.extract_strided_slice %145 {offsets = [0, 0], sizes = [2, 32], strides = [1, 1]} : vector<2x128xf32> to vector<2x32xf32>
    %148 = vector.extract_strided_slice %145 {offsets = [0, 32], sizes = [2, 32], strides = [1, 1]} : vector<2x128xf32> to vector<2x32xf32>
    %149 = vector.extract_strided_slice %146 {offsets = [0, 64], sizes = [2, 32], strides = [1, 1]} : vector<2x128xf32> to vector<2x32xf32>
    %150 = vector.extract_strided_slice %145 {offsets = [0, 96], sizes = [2, 32], strides = [1, 1]} : vector<2x128xf32> to vector<2x32xf32>
    %151 = arith.mulf %148, %135 : vector<2x32xf32>
    %152 = arith.mulf %147, %149 : vector<2x32xf32>
    %153 = arith.addf %151, %152 : vector<2x32xf32>
    %154 = math.tanh %153 : vector<2x32xf32>
    %155 = arith.mulf %150, %154 : vector<2x32xf32>
    %156 = vector.extract_strided_slice %27 {offsets = [14, 0], sizes = [2, 128], strides = [1, 1]} : vector<16x128xf32> to vector<2x128xf32>
    %cst_27 = arith.constant dense<0.000000e+00> : vector<2x128xf32>
    %157 = tpu.matmul %155, %21, %cst_27 {dimension_numbers = #tpu.dot_dimension_numbers<[1], [0], [0], [1], [0, 0, 1, 1], [], []>, precision = #tpu.contract_precision<fp32>} : vector<2x32xf32>, vector<32x128xf32>, vector<2x128xf32> -> vector<2x128xf32>
    %158 = arith.addf %156, %157 : vector<2x128xf32>
    %159 = arith.negf %158 : vector<2x128xf32>
    %160 = math.exp %159 : vector<2x128xf32>
    %cst_28 = arith.constant 1.000000e+00 : f32
    %161 = vector.broadcast %cst_28 : f32 to vector<2x128xf32>
    %162 = arith.addf %161, %160 : vector<2x128xf32>
    %163 = arith.divf %161, %162 : vector<2x128xf32>
    %164 = math.tanh %158 : vector<2x128xf32>
    %165 = vector.extract_strided_slice %163 {offsets = [0, 0], sizes = [2, 32], strides = [1, 1]} : vector<2x128xf32> to vector<2x32xf32>
    %166 = vector.extract_strided_slice %163 {offsets = [0, 32], sizes = [2, 32], strides = [1, 1]} : vector<2x128xf32> to vector<2x32xf32>
    %167 = vector.extract_strided_slice %164 {offsets = [0, 64], sizes = [2, 32], strides = [1, 1]} : vector<2x128xf32> to vector<2x32xf32>
    %168 = vector.extract_strided_slice %163 {offsets = [0, 96], sizes = [2, 32], strides = [1, 1]} : vector<2x128xf32> to vector<2x32xf32>
    %169 = arith.mulf %166, %153 : vector<2x32xf32>
    %170 = arith.mulf %165, %167 : vector<2x32xf32>
    %171 = arith.addf %169, %170 : vector<2x32xf32>
    %172 = math.tanh %171 : vector<2x32xf32>
    %173 = arith.mulf %168, %172 : vector<2x32xf32>
    %c1 = arith.constant 1 : index
    %c0_29 = arith.constant 0 : index
    %c0_30 = arith.constant 0 : index
    %174 = vector.load %arg1[%c1, %c0_29, %c0_30] : memref<2x32x128xf32, #tpu.memory_space<vmem>>, vector<1x32x128xf32>
    %175 = vector.shape_cast %174 : vector<1x32x128xf32> to vector<32x128xf32>
    %c1_31 = arith.constant 1 : index
    %c0_32 = arith.constant 0 : index
    %c0_33 = arith.constant 0 : index
    %176 = vector.load %arg2[%c1_31, %c0_32, %c0_33] : memref<2x32x128xf32, #tpu.memory_space<vmem>>, vector<1x32x128xf32>
    %177 = vector.shape_cast %176 : vector<1x32x128xf32> to vector<32x128xf32>
    %c1_34 = arith.constant 1 : index
    %c0_35 = arith.constant 0 : index
    %c0_36 = arith.constant 0 : index
    %178 = vector.load %arg3[%c1_34, %c0_35, %c0_36] : memref<2x1x128xf32, #tpu.memory_space<vmem>>, vector<1x1x128xf32>
    %179 = vector.shape_cast %178 : vector<1x1x128xf32> to vector<1x128xf32>
    %180 = tpu.concatenate %47, %65, %83, %101, %119, %137, %155, %173 in 0 : vector<2x32xf32>, vector<2x32xf32>, vector<2x32xf32>, vector<2x32xf32>, vector<2x32xf32>, vector<2x32xf32>, vector<2x32xf32>, vector<2x32xf32> -> vector<16x32xf32>
    %cst_37 = arith.constant dense<0.000000e+00> : vector<16x128xf32>
    %181 = tpu.matmul %180, %175, %cst_37 {dimension_numbers = #tpu.dot_dimension_numbers<[1], [0], [0], [1], [0, 0, 1, 1], [], []>, precision = #tpu.contract_precision<fp32>} : vector<16x32xf32>, vector<32x128xf32>, vector<16x128xf32> -> vector<16x128xf32>
    %182 = vector.broadcast %179 : vector<1x128xf32> to vector<16x128xf32>
    %183 = arith.addf %181, %182 : vector<16x128xf32>
    %cst_38 = arith.constant 0.000000e+00 : f32
    %184 = vector.broadcast %cst_38 : f32 to vector<2x32xf32>
    %cst_39 = arith.constant 0.000000e+00 : f32
    %185 = vector.broadcast %cst_39 : f32 to vector<2x32xf32>
    %186 = vector.extract_strided_slice %183 {offsets = [0, 0], sizes = [2, 128], strides = [1, 1]} : vector<16x128xf32> to vector<2x128xf32>
    %cst_40 = arith.constant dense<0.000000e+00> : vector<2x128xf32>
    %187 = tpu.matmul %184, %177, %cst_40 {dimension_numbers = #tpu.dot_dimension_numbers<[1], [0], [0], [1], [0, 0, 1, 1], [], []>, precision = #tpu.contract_precision<fp32>} : vector<2x32xf32>, vector<32x128xf32>, vector<2x128xf32> -> vector<2x128xf32>
    %188 = arith.addf %186, %187 : vector<2x128xf32>
    %189 = arith.negf %188 : vector<2x128xf32>
    %190 = math.exp %189 : vector<2x128xf32>
    %cst_41 = arith.constant 1.000000e+00 : f32
    %191 = vector.broadcast %cst_41 : f32 to vector<2x128xf32>
    %192 = arith.addf %191, %190 : vector<2x128xf32>
    %193 = arith.divf %191, %192 : vector<2x128xf32>
    %194 = math.tanh %188 : vector<2x128xf32>
    %195 = vector.extract_strided_slice %193 {offsets = [0, 0], sizes = [2, 32], strides = [1, 1]} : vector<2x128xf32> to vector<2x32xf32>
    %196 = vector.extract_strided_slice %193 {offsets = [0, 32], sizes = [2, 32], strides = [1, 1]} : vector<2x128xf32> to vector<2x32xf32>
    %197 = vector.extract_strided_slice %194 {offsets = [0, 64], sizes = [2, 32], strides = [1, 1]} : vector<2x128xf32> to vector<2x32xf32>
    %198 = vector.extract_strided_slice %193 {offsets = [0, 96], sizes = [2, 32], strides = [1, 1]} : vector<2x128xf32> to vector<2x32xf32>
    %199 = arith.mulf %196, %185 : vector<2x32xf32>
    %200 = arith.mulf %195, %197 : vector<2x32xf32>
    %201 = arith.addf %199, %200 : vector<2x32xf32>
    %202 = math.tanh %201 : vector<2x32xf32>
    %203 = arith.mulf %198, %202 : vector<2x32xf32>
    %204 = vector.extract_strided_slice %183 {offsets = [2, 0], sizes = [2, 128], strides = [1, 1]} : vector<16x128xf32> to vector<2x128xf32>
    %cst_42 = arith.constant dense<0.000000e+00> : vector<2x128xf32>
    %205 = tpu.matmul %203, %177, %cst_42 {dimension_numbers = #tpu.dot_dimension_numbers<[1], [0], [0], [1], [0, 0, 1, 1], [], []>, precision = #tpu.contract_precision<fp32>} : vector<2x32xf32>, vector<32x128xf32>, vector<2x128xf32> -> vector<2x128xf32>
    %206 = arith.addf %204, %205 : vector<2x128xf32>
    %207 = arith.negf %206 : vector<2x128xf32>
    %208 = math.exp %207 : vector<2x128xf32>
    %cst_43 = arith.constant 1.000000e+00 : f32
    %209 = vector.broadcast %cst_43 : f32 to vector<2x128xf32>
    %210 = arith.addf %209, %208 : vector<2x128xf32>
    %211 = arith.divf %209, %210 : vector<2x128xf32>
    %212 = math.tanh %206 : vector<2x128xf32>
    %213 = vector.extract_strided_slice %211 {offsets = [0, 0], sizes = [2, 32], strides = [1, 1]} : vector<2x128xf32> to vector<2x32xf32>
    %214 = vector.extract_strided_slice %211 {offsets = [0, 32], sizes = [2, 32], strides = [1, 1]} : vector<2x128xf32> to vector<2x32xf32>
    %215 = vector.extract_strided_slice %212 {offsets = [0, 64], sizes = [2, 32], strides = [1, 1]} : vector<2x128xf32> to vector<2x32xf32>
    %216 = vector.extract_strided_slice %211 {offsets = [0, 96], sizes = [2, 32], strides = [1, 1]} : vector<2x128xf32> to vector<2x32xf32>
    %217 = arith.mulf %214, %201 : vector<2x32xf32>
    %218 = arith.mulf %213, %215 : vector<2x32xf32>
    %219 = arith.addf %217, %218 : vector<2x32xf32>
    %220 = math.tanh %219 : vector<2x32xf32>
    %221 = arith.mulf %216, %220 : vector<2x32xf32>
    %222 = vector.extract_strided_slice %183 {offsets = [4, 0], sizes = [2, 128], strides = [1, 1]} : vector<16x128xf32> to vector<2x128xf32>
    %cst_44 = arith.constant dense<0.000000e+00> : vector<2x128xf32>
    %223 = tpu.matmul %221, %177, %cst_44 {dimension_numbers = #tpu.dot_dimension_numbers<[1], [0], [0], [1], [0, 0, 1, 1], [], []>, precision = #tpu.contract_precision<fp32>} : vector<2x32xf32>, vector<32x128xf32>, vector<2x128xf32> -> vector<2x128xf32>
    %224 = arith.addf %222, %223 : vector<2x128xf32>
    %225 = arith.negf %224 : vector<2x128xf32>
    %226 = math.exp %225 : vector<2x128xf32>
    %cst_45 = arith.constant 1.000000e+00 : f32
    %227 = vector.broadcast %cst_45 : f32 to vector<2x128xf32>
    %228 = arith.addf %227, %226 : vector<2x128xf32>
    %229 = arith.divf %227, %228 : vector<2x128xf32>
    %230 = math.tanh %224 : vector<2x128xf32>
    %231 = vector.extract_strided_slice %229 {offsets = [0, 0], sizes = [2, 32], strides = [1, 1]} : vector<2x128xf32> to vector<2x32xf32>
    %232 = vector.extract_strided_slice %229 {offsets = [0, 32], sizes = [2, 32], strides = [1, 1]} : vector<2x128xf32> to vector<2x32xf32>
    %233 = vector.extract_strided_slice %230 {offsets = [0, 64], sizes = [2, 32], strides = [1, 1]} : vector<2x128xf32> to vector<2x32xf32>
    %234 = vector.extract_strided_slice %229 {offsets = [0, 96], sizes = [2, 32], strides = [1, 1]} : vector<2x128xf32> to vector<2x32xf32>
    %235 = arith.mulf %232, %219 : vector<2x32xf32>
    %236 = arith.mulf %231, %233 : vector<2x32xf32>
    %237 = arith.addf %235, %236 : vector<2x32xf32>
    %238 = math.tanh %237 : vector<2x32xf32>
    %239 = arith.mulf %234, %238 : vector<2x32xf32>
    %240 = vector.extract_strided_slice %183 {offsets = [6, 0], sizes = [2, 128], strides = [1, 1]} : vector<16x128xf32> to vector<2x128xf32>
    %cst_46 = arith.constant dense<0.000000e+00> : vector<2x128xf32>
    %241 = tpu.matmul %239, %177, %cst_46 {dimension_numbers = #tpu.dot_dimension_numbers<[1], [0], [0], [1], [0, 0, 1, 1], [], []>, precision = #tpu.contract_precision<fp32>} : vector<2x32xf32>, vector<32x128xf32>, vector<2x128xf32> -> vector<2x128xf32>
    %242 = arith.addf %240, %241 : vector<2x128xf32>
    %243 = arith.negf %242 : vector<2x128xf32>
    %244 = math.exp %243 : vector<2x128xf32>
    %cst_47 = arith.constant 1.000000e+00 : f32
    %245 = vector.broadcast %cst_47 : f32 to vector<2x128xf32>
    %246 = arith.addf %245, %244 : vector<2x128xf32>
    %247 = arith.divf %245, %246 : vector<2x128xf32>
    %248 = math.tanh %242 : vector<2x128xf32>
    %249 = vector.extract_strided_slice %247 {offsets = [0, 0], sizes = [2, 32], strides = [1, 1]} : vector<2x128xf32> to vector<2x32xf32>
    %250 = vector.extract_strided_slice %247 {offsets = [0, 32], sizes = [2, 32], strides = [1, 1]} : vector<2x128xf32> to vector<2x32xf32>
    %251 = vector.extract_strided_slice %248 {offsets = [0, 64], sizes = [2, 32], strides = [1, 1]} : vector<2x128xf32> to vector<2x32xf32>
    %252 = vector.extract_strided_slice %247 {offsets = [0, 96], sizes = [2, 32], strides = [1, 1]} : vector<2x128xf32> to vector<2x32xf32>
    %253 = arith.mulf %250, %237 : vector<2x32xf32>
    %254 = arith.mulf %249, %251 : vector<2x32xf32>
    %255 = arith.addf %253, %254 : vector<2x32xf32>
    %256 = math.tanh %255 : vector<2x32xf32>
    %257 = arith.mulf %252, %256 : vector<2x32xf32>
    %258 = vector.extract_strided_slice %183 {offsets = [8, 0], sizes = [2, 128], strides = [1, 1]} : vector<16x128xf32> to vector<2x128xf32>
    %cst_48 = arith.constant dense<0.000000e+00> : vector<2x128xf32>
    %259 = tpu.matmul %257, %177, %cst_48 {dimension_numbers = #tpu.dot_dimension_numbers<[1], [0], [0], [1], [0, 0, 1, 1], [], []>, precision = #tpu.contract_precision<fp32>} : vector<2x32xf32>, vector<32x128xf32>, vector<2x128xf32> -> vector<2x128xf32>
    %260 = arith.addf %258, %259 : vector<2x128xf32>
    %261 = arith.negf %260 : vector<2x128xf32>
    %262 = math.exp %261 : vector<2x128xf32>
    %cst_49 = arith.constant 1.000000e+00 : f32
    %263 = vector.broadcast %cst_49 : f32 to vector<2x128xf32>
    %264 = arith.addf %263, %262 : vector<2x128xf32>
    %265 = arith.divf %263, %264 : vector<2x128xf32>
    %266 = math.tanh %260 : vector<2x128xf32>
    %267 = vector.extract_strided_slice %265 {offsets = [0, 0], sizes = [2, 32], strides = [1, 1]} : vector<2x128xf32> to vector<2x32xf32>
    %268 = vector.extract_strided_slice %265 {offsets = [0, 32], sizes = [2, 32], strides = [1, 1]} : vector<2x128xf32> to vector<2x32xf32>
    %269 = vector.extract_strided_slice %266 {offsets = [0, 64], sizes = [2, 32], strides = [1, 1]} : vector<2x128xf32> to vector<2x32xf32>
    %270 = vector.extract_strided_slice %265 {offsets = [0, 96], sizes = [2, 32], strides = [1, 1]} : vector<2x128xf32> to vector<2x32xf32>
    %271 = arith.mulf %268, %255 : vector<2x32xf32>
    %272 = arith.mulf %267, %269 : vector<2x32xf32>
    %273 = arith.addf %271, %272 : vector<2x32xf32>
    %274 = math.tanh %273 : vector<2x32xf32>
    %275 = arith.mulf %270, %274 : vector<2x32xf32>
    %276 = vector.extract_strided_slice %183 {offsets = [10, 0], sizes = [2, 128], strides = [1, 1]} : vector<16x128xf32> to vector<2x128xf32>
    %cst_50 = arith.constant dense<0.000000e+00> : vector<2x128xf32>
    %277 = tpu.matmul %275, %177, %cst_50 {dimension_numbers = #tpu.dot_dimension_numbers<[1], [0], [0], [1], [0, 0, 1, 1], [], []>, precision = #tpu.contract_precision<fp32>} : vector<2x32xf32>, vector<32x128xf32>, vector<2x128xf32> -> vector<2x128xf32>
    %278 = arith.addf %276, %277 : vector<2x128xf32>
    %279 = arith.negf %278 : vector<2x128xf32>
    %280 = math.exp %279 : vector<2x128xf32>
    %cst_51 = arith.constant 1.000000e+00 : f32
    %281 = vector.broadcast %cst_51 : f32 to vector<2x128xf32>
    %282 = arith.addf %281, %280 : vector<2x128xf32>
    %283 = arith.divf %281, %282 : vector<2x128xf32>
    %284 = math.tanh %278 : vector<2x128xf32>
    %285 = vector.extract_strided_slice %283 {offsets = [0, 0], sizes = [2, 32], strides = [1, 1]} : vector<2x128xf32> to vector<2x32xf32>
    %286 = vector.extract_strided_slice %283 {offsets = [0, 32], sizes = [2, 32], strides = [1, 1]} : vector<2x128xf32> to vector<2x32xf32>
    %287 = vector.extract_strided_slice %284 {offsets = [0, 64], sizes = [2, 32], strides = [1, 1]} : vector<2x128xf32> to vector<2x32xf32>
    %288 = vector.extract_strided_slice %283 {offsets = [0, 96], sizes = [2, 32], strides = [1, 1]} : vector<2x128xf32> to vector<2x32xf32>
    %289 = arith.mulf %286, %273 : vector<2x32xf32>
    %290 = arith.mulf %285, %287 : vector<2x32xf32>
    %291 = arith.addf %289, %290 : vector<2x32xf32>
    %292 = math.tanh %291 : vector<2x32xf32>
    %293 = arith.mulf %288, %292 : vector<2x32xf32>
    %294 = vector.extract_strided_slice %183 {offsets = [12, 0], sizes = [2, 128], strides = [1, 1]} : vector<16x128xf32> to vector<2x128xf32>
    %cst_52 = arith.constant dense<0.000000e+00> : vector<2x128xf32>
    %295 = tpu.matmul %293, %177, %cst_52 {dimension_numbers = #tpu.dot_dimension_numbers<[1], [0], [0], [1], [0, 0, 1, 1], [], []>, precision = #tpu.contract_precision<fp32>} : vector<2x32xf32>, vector<32x128xf32>, vector<2x128xf32> -> vector<2x128xf32>
    %296 = arith.addf %294, %295 : vector<2x128xf32>
    %297 = arith.negf %296 : vector<2x128xf32>
    %298 = math.exp %297 : vector<2x128xf32>
    %cst_53 = arith.constant 1.000000e+00 : f32
    %299 = vector.broadcast %cst_53 : f32 to vector<2x128xf32>
    %300 = arith.addf %299, %298 : vector<2x128xf32>
    %301 = arith.divf %299, %300 : vector<2x128xf32>
    %302 = math.tanh %296 : vector<2x128xf32>
    %303 = vector.extract_strided_slice %301 {offsets = [0, 0], sizes = [2, 32], strides = [1, 1]} : vector<2x128xf32> to vector<2x32xf32>
    %304 = vector.extract_strided_slice %301 {offsets = [0, 32], sizes = [2, 32], strides = [1, 1]} : vector<2x128xf32> to vector<2x32xf32>
    %305 = vector.extract_strided_slice %302 {offsets = [0, 64], sizes = [2, 32], strides = [1, 1]} : vector<2x128xf32> to vector<2x32xf32>
    %306 = vector.extract_strided_slice %301 {offsets = [0, 96], sizes = [2, 32], strides = [1, 1]} : vector<2x128xf32> to vector<2x32xf32>
    %307 = arith.mulf %304, %291 : vector<2x32xf32>
    %308 = arith.mulf %303, %305 : vector<2x32xf32>
    %309 = arith.addf %307, %308 : vector<2x32xf32>
    %310 = math.tanh %309 : vector<2x32xf32>
    %311 = arith.mulf %306, %310 : vector<2x32xf32>
    %312 = vector.extract_strided_slice %183 {offsets = [14, 0], sizes = [2, 128], strides = [1, 1]} : vector<16x128xf32> to vector<2x128xf32>
    %cst_54 = arith.constant dense<0.000000e+00> : vector<2x128xf32>
    %313 = tpu.matmul %311, %177, %cst_54 {dimension_numbers = #tpu.dot_dimension_numbers<[1], [0], [0], [1], [0, 0, 1, 1], [], []>, precision = #tpu.contract_precision<fp32>} : vector<2x32xf32>, vector<32x128xf32>, vector<2x128xf32> -> vector<2x128xf32>
    %314 = arith.addf %312, %313 : vector<2x128xf32>
    %315 = arith.negf %314 : vector<2x128xf32>
    %316 = math.exp %315 : vector<2x128xf32>
    %cst_55 = arith.constant 1.000000e+00 : f32
    %317 = vector.broadcast %cst_55 : f32 to vector<2x128xf32>
    %318 = arith.addf %317, %316 : vector<2x128xf32>
    %319 = arith.divf %317, %318 : vector<2x128xf32>
    %320 = math.tanh %314 : vector<2x128xf32>
    %321 = vector.extract_strided_slice %319 {offsets = [0, 0], sizes = [2, 32], strides = [1, 1]} : vector<2x128xf32> to vector<2x32xf32>
    %322 = vector.extract_strided_slice %319 {offsets = [0, 32], sizes = [2, 32], strides = [1, 1]} : vector<2x128xf32> to vector<2x32xf32>
    %323 = vector.extract_strided_slice %320 {offsets = [0, 64], sizes = [2, 32], strides = [1, 1]} : vector<2x128xf32> to vector<2x32xf32>
    %324 = vector.extract_strided_slice %319 {offsets = [0, 96], sizes = [2, 32], strides = [1, 1]} : vector<2x128xf32> to vector<2x32xf32>
    %325 = arith.mulf %322, %309 : vector<2x32xf32>
    %326 = arith.mulf %321, %323 : vector<2x32xf32>
    %327 = arith.addf %325, %326 : vector<2x32xf32>
    %328 = math.tanh %327 : vector<2x32xf32>
    %329 = arith.mulf %324, %328 : vector<2x32xf32>
    %330 = tpu.concatenate %173, %329 in 0 : vector<2x32xf32>, vector<2x32xf32> -> vector<4x32xf32>
    %c0_56 = arith.constant 0 : index
    %c0_57 = arith.constant 0 : index
    %331 = vector.load %arg4[%c0_56, %c0_57] : memref<32x4xf32, #tpu.memory_space<vmem>>, vector<32x4xf32>
    %cst_58 = arith.constant dense<0.000000e+00> : vector<4x4xf32>
    %332 = tpu.matmul %330, %331, %cst_58 {dimension_numbers = #tpu.dot_dimension_numbers<[1], [0], [0], [1], [0, 0, 1, 1], [], []>, precision = #tpu.contract_precision<fp32>} : vector<4x32xf32>, vector<32x4xf32>, vector<4x4xf32> -> vector<4x4xf32>
    %c0_59 = arith.constant 0 : index
    %c0_60 = arith.constant 0 : index
    %333 = vector.load %arg5[%c0_59, %c0_60] : memref<1x4xf32, #tpu.memory_space<vmem>>, vector<1x4xf32>
    %334 = vector.broadcast %333 : vector<1x4xf32> to vector<4x4xf32>
    %335 = arith.addf %332, %334 : vector<4x4xf32>
    %cst_61 = arith.constant 0.000000e+00 : f32
    %336 = vector.broadcast %cst_61 : f32 to vector<4x4xf32>
    %337 = arith.maximumf %335, %336 : vector<4x4xf32>
    %c0_62 = arith.constant 0 : index
    %c0_63 = arith.constant 0 : index
    %338 = vector.load %arg6[%c0_62, %c0_63] : memref<4x4xf32, #tpu.memory_space<vmem>>, vector<4x4xf32>
    tpu.vector_store %arg6[%c0_62, %c0_63], %337 {strides = array<i32>} : memref<4x4xf32, #tpu.memory_space<vmem>>, vector<4x4xf32>,
    return
  }
}

</mosaic_0001>

<bundles_post_ra>
// kernel: lstm1_forward.1
= control target key start
LH: loop header
LB: loop body
LE: loop exit
PB: predicated region body
PF: predicated region fallthrough
CT: control target
= control target key end

     0   :  { %11 = vsyncpa [#allocation3], 0  ;;  %s13882_s0 = inlined_call_operand.vmem [shape: f32[2,8,4], index: 0, kind: input, shape index: {}]   ;;  %s13883_s1 = inlined_call_operand.vmem [shape: f32[2,32,128], index: 1, kind: input, shape index: {}]   ;;  %s13884_s2 = inlined_call_operand.hbm [shape: f32[2,32,128], index: 2, kind: input, shape index: {}]   ;;  %s13885_s3 = inlined_call_operand.vmem [shape: f32[2,1,128], index: 3, kind: input, shape index: {}]   ;;  %s13886_s4 = inlined_call_operand.vmem [shape: f32[32,4], index: 4, kind: input, shape index: {}]   ;;  %s13887_s5 = inlined_call_operand.vmem [shape: f32[1,4], index: 5, kind: input, shape index: {}]   ;;  %s13888_s6 = inlined_call_operand.hbm [shape: f32[4,4], index: 6, kind: output, shape index: {}]  }
   0x1   :  { %12 = vsyncpa [#allocation4], 0  ;;  %s12812_s21 = smov [#allocation2]   ;;  %s12764_s25 = scalar_lea.hbm %s13884_s2, 1024 }
   0x2   :  { %s22_s22 = sshll.u32 %s12812_s21, 4  ;;  %p12765_p0 = scmp.ne.s32.totalorder %s13884_s2, %s12764_s25  ;;  %s23_s22 = int_to_ptr.vmem [resolvable:$true] %s22_s22 }
   0x3   :  { %p12768_p1 = scmp.lt.u32.totalorder %s12764_s25, %s13884_s2 }
   0x5   :  { %p12770_p2 = pnand %p12768_p1, %p12765_p0 }
   0x7   :  { %12773 = shalt.err (!%p12770_p2)
}
   0x8   :  { %s12774_s30 = scalar_lea.vmem %s23_s22, 1024  ;;  %p12779_p4 = scmp.lt.s32.totalorder %s23_s22, %s23_s22 }
   0x9   :  { %p12775_p3 = scmp.ne.s32.totalorder %s23_s22, %s12774_s30  ;;  %p12780_p5 = scmp.lt.s32.totalorder %s12774_s30, %s12774_s30 }
   0xb   :  { %p12781_p6 = por %p12780_p5, %p12779_p4 }
   0xd   :  { %p12782_p7 = pnand %p12781_p6, %p12775_p3 }
   0xf   :  { %12785 = shalt.err (!%p12782_p7)
}
  0x10   :  { %s12813_s7 = smov 128   ;;  %s12814_s8 = smov 8  }
  0x11   :  { %28 = dma.hbm_to_vmem [thread:$0]  %s13884_s2, 1024, %s23_s22, [#allocation3], %s12813_s7, %s12813_s7, %s12814_s8  }
  0x12   :  { %12808 = dma.done.wait [#allocation3], 1024  }
  0x13   :  { %12809 = vsyncadd [#allocation3], 4294966272  ;;  %vm84_vm0 = vcmask 1043456   ;;  %vm49_vm1 = vcmask 1041409   ;;  %vm54_vm2 = vcmask 1043459   ;;  %vm59_vm3 = vcmask 1045509  }
  0x14   :  { %vm64_vm4 = vcmask 1047559   ;;  %vm82_vm5 = vcmask 1041408   ;;  %v40_v0 = vld [vmem:[%s13883_s1] sm:$0xff]  ;;  %v39_v2 = vld [vmem:[%s13882_s0 + $0x8] sm:$0xff]  ;;  %vm86_vm6 = vcmask 1045504   ;;  %vm97_vm7 = vcmask 31744  }
  0x15   :  { %v38_v1 = vld [vmem:[%s13882_s0] sm:$0xff]  ;;  %v105_v3 = vsel %vm84_vm0, %v40_v0, 0  ;;  %v48_v4 = vrot.slane %v39_v2, 7  ;;  %v53_v6 = vrot.slane %v39_v2, 6  ;;  %v58_v9 = vrot.slane %v39_v2, 5  ;;  %v41_v23 = vld [vmem:[#allocation2] sm:$0xff] }
  0x16   :  { %v52_v5 = vrot.slane %v38_v1, 7  ;;  %v12878_v7 = vand.u32 4294901760, %v105_v3  ;;  %v57_v8 = vrot.slane %v38_v1, 6  ;;  %v62_v10 = vrot.slane %v38_v1, 5  ;;  %v42_v29 = vld [vmem:[#allocation2 + $0x8] sm:$0xff]  ;;  %v43_v38 = vld [vmem:[#allocation2 + $0x10] sm:$0xff] }
  0x17   :  { %v50_v11 = vsel %vm49_vm1, %v48_v4, %v38_v1  ;;  %v63_v13 = vrot.slane %v39_v2, 4  ;;  %v67_v14 = vrot.slane %v38_v1, 4  ;;  %v68_v18 = vrot.slane %v39_v2, 3  ;;  %v44_v39 = vld [vmem:[#allocation2 + $0x18] sm:$0xff]  ;;  %s12818_s17 = smov 64   ;;  %s12819_s18 = smov 32  }
  0x18   :  { %v55_v12 = vsel %vm54_vm2, %v53_v6, %v52_v5  ;;  %v195_v15 = vsub.f32 %v105_v3, %v12878_v7  ;;  %v60_v16 = vsel %vm59_vm3, %v58_v9, %v57_v8  ;;  %10594 = vmatprep.subr.mxu1 %v12878_v7  ;;  %v71_v21 = vrot.slane %v38_v1, 3  ;;  %s12820_s12 = smov [#allocation5]  }
  0x19   :  { %v83_v17 = vsel %vm82_vm5, %v50_v11, %v55_v12  ;;  %v65_v19 = vsel %vm64_vm4, %v63_v13, %v62_v10  ;;  %v72_v22 = vrot.slane %v39_v2, 2  ;;  %10595 = vmatpush3.msra.mxu1 %v12878_v7  ;;  %v69_v26 = vsel %vm49_vm1, %v68_v18, %v67_v14  ;;  %s9997_s13 = sshll.u32 %s12820_s12, 4  ;;  %s9998_s13 = int_to_ptr.vmem [resolvable:$true] %s9997_s13 }
  0x1a   :  { %v85_v20 = vsel %vm84_vm0, %v83_v17, %v60_v16  ;;  %v12889_v24 = vand.u32 4294901760, %v195_v15  ;;  %v75_v27 = vrot.slane %v38_v1, 2  ;;  %v12815_v28 = vmov 0.0|0.0   ;;  %s12786_s14 = scalar_lea.vmem %s9998_s13, 64  ;;  %p12791_p9 = scmp.lt.s32.totalorder %s9998_s13, %s9998_s13 }
  0x1b   :  { %v87_v25 = vsel %vm86_vm6, %v85_v20, %v65_v19  ;;  %11812 = vmatprep.subr.bf16.mxu1 %v12815_v28  ;;  %v73_v31 = vsel %vm54_vm2, %v72_v22, %v71_v21  ;;  %v76_v32 = vrot.slane %v39_v2, 1  ;;  %v79_v33 = vrot.slane %v38_v1, 1  ;;  %v10006_v19 = vld [vmem:[%s13885_s3] ss:$0 sm:$0xff]  ;;  %p12787_p8 = scmp.ne.s32.totalorder %s9998_s13, %s12786_s14  ;;  %p12792_p10 = scmp.lt.s32.totalorder %s12786_s14, %s12786_s14 }
  0x1c   :  { %v99_v30 = vsel %vm97_vm7, %v87_v25, 0  ;;  %v197_v34 = vsub.f32 %v195_v15, %v12889_v24  ;;  %v88_v36 = vsel %vm82_vm5, %v69_v26, %v73_v31  ;;  %v601_v37 = vand.u32 4294901760, %v41_v23 }
  0x1d   :  { %v12897_v35 = vand.u32 4294901760, %v99_v30  ;;  %v77_v40 = vsel %vm59_vm3, %v76_v32, %v75_v27  ;;  %v80_v41 = vsel %vm64_vm4, %v39_v2, %v79_v33  ;;  %v604_v42 = vand.u32 4294901760, %v42_v29  ;;  %p12793_p11 = por %p12792_p10, %p12791_p9 }
  0x1e   :  { %v198_v43 = vand.u32 4294901760, %v197_v34  ;;  %v89_v44 = vsel %vm84_vm0, %v88_v36, %v77_v40  ;;  %v607_v47 = vand.u32 4294901760, %v43_v38  ;;  %v610_v48 = vand.u32 4294901760, %v44_v39 }
  0x1f   :  { %10601 = vmatprep.mubr.f32.mxu0 %v12897_v35  ;;  %v174_v45 = vsub.f32 %v99_v30, %v12897_v35  ;;  %v90_v46 = vsel %vm86_vm6, %v89_v44, %v80_v41  ;;  %v12907_v51 = vsub.f32 %v41_v23, %v601_v37  ;;  %v12909_v52 = vsub.f32 %v42_v29, %v604_v42  ;;  %p12794_p12 = pnand %p12793_p11, %p12787_p8 }
  0x20   :  { %10599 = vmatprep.subr.mxu0 %v198_v43  ;;  %v102_v49 = vsel %vm97_vm7, %v90_v46, 0  ;;  %v12915_v56 = vsub.f32 %v43_v38, %v607_v47  ;;  %v702_v60 = vsub.f32 %v44_v39, %v610_v48  ;;  %v12920_v63 = vpack.c.bf16 %v604_v42, %v601_v37 }
  0x21   :  { %v175_v50 = vand.u32 4294901760, %v174_v45  ;;  %10600 = vmatpush3.msra.mxu0 %v198_v43  ;;  %v12911_v53 = vand.u32 4294901760, %v102_v49  ;;  %v682_v58 = vand.u32 4294901760, %v12907_v51  ;;  %v689_v59 = vand.u32 4294901760, %v12909_v52 }
  0x22   :  { %10604 = vmatprep.subr.mxu0 %v195_v15  ;;  %v696_v2 = vand.u32 4294901760, %v12915_v56  ;;  %v703_v3 = vand.u32 4294901760, %v702_v60  ;;  %v12925_v5 = vpack.c.bf16 %v610_v48, %v607_v47  ;;  %vm12816_vm8 = vmmov 0  }
  0x23   :  { %v176_v54 = vsub.f32 %v174_v45, %v175_v50  ;;  %10602 = vmatmul.mubr.f32.vlgmr.msra.gmra.mrb[0].mxu0 %v12911_v53  ;;  %v184_v55 = vsub.f32 %v102_v49, %v12911_v53  ;;  %v683_v0 = vsub.f32 %v12907_v51, %v682_v58  ;;  %v690_v1 = vsub.f32 %v12909_v52, %v689_v59 }
  0x24   :  { %10605 = vmatpush3.msra.mxu0 %v195_v15  ;;  %10606 = vmatprep.mubr.f32.mxu0 %v174_v45  ;;  %v697_v9 = vsub.f32 %v12915_v56, %v696_v2  ;;  %v704_v10 = vsub.f32 %v702_v60, %v703_v3  ;;  %v12817_v11 = vmov 0.0   ;;  %v12951_v16 = vpack.c.bf16 %v12909_v52, %v12907_v51 }
  0x25   :  { %v177_v57 = vand.u32 4294901760, %v176_v54  ;;  %v185_v61 = vand.u32 4294901760, %v184_v55  ;;  %10609 = vmatprep.subr.mxu0 %v12878_v7  ;;  %v684_v6 = vand.u32 4294901760, %v683_v0  ;;  %v691_v8 = vand.u32 4294901760, %v690_v1 }
  0x26   :  { %v698_v13 = vand.u32 4294901760, %v697_v9  ;;  %v705_v14 = vand.u32 4294901760, %v704_v10  ;;  %v12959_v17 = vpack.c.bf16 %v702_v60, %v12915_v56  ;;  %v12967_v18 = vpack.c.bf16 %v689_v59, %v682_v58 }
  0x27   :  { %10596 = vmatprep.mubr.f32.mxu1 %v177_v57  ;;  %v186_v62 = vsub.f32 %v184_v55, %v185_v61  ;;  %v12935_v12 = vpack.c.bf16 %v691_v8, %v684_v6  ;;  %vm596_vm9 = vcmask 261120   ;;  %vm9989_vm10 = vcmask 27648  }
  0x28   :  { %v12941_v15 = vpack.c.bf16 %v705_v14, %v698_v13 }
  0x29   :  { %v187_v4 = vand.u32 4294901760, %v186_v62 }
  0x2b   :  { %10597 = vmatmul.mubr.f32.vlgmr.msra.gmra.mrb[0].mxu1 %v187_v4  ;;  %10607 = vmatmul.mubr.f32.vlgmr.msra.gmra.mrb[0].mxu0 %v184_v55 }
  0x2c   :  { %11814 = vmatpush3.bf16.msra.mxu1 %v12920_v63  ;;  %10610 = vmatpush3.msra.mxu0 %v12878_v7 }
  0x2d   :  { %11815 = vmatprep.subr.bf16.mxu1 %v12815_v28  ;;  %10632 = vmatprep.mubr.msk.f32.mxu1 %vm12816_vm8, %v12817_v11 }
  0x2e   :  { %10611 = vmatprep.mubr.f32.mxu0 %v175_v50  ;;  %10614 = vmatprep.subr.mxu0 %v12889_v24 }
  0x30   :  { %11817 = vmatpush3.bf16.msra.mxu1 %v12925_v5 }
  0x31   :  { %11818 = vmatprep.subr.bf16.mxu1 %v12815_v28 }
  0x33   :  { %10633 = vmatmul.mubr.f32.vlgmr.msra.gmra.mrb[2].mxu1 %v12817_v11  ;;  %10612 = vmatmul.mubr.f32.vlgmr.msra.gmra.mrb[0].mxu0 %v185_v61 }
  0x34   :  { %11820 = vmatpush3.bf16.msra.mxu1 %v12935_v12  ;;  %10615 = vmatpush3.msra.mxu0 %v12889_v24 }
  0x35   :  { %11821 = vmatprep.subr.bf16.mxu1 %v12815_v28  ;;  %10643 = vmatprep.mubr.msk.f32.mxu1 %vm12816_vm8, %v12817_v11 }
  0x36   :  { %10616 = vmatprep.mubr.f32.mxu0 %v12897_v35  ;;  %10619 = vmatprep.subr.mxu0 %v12878_v7 }
  0x38   :  { %11823 = vmatpush3.bf16.msra.mxu1 %v12941_v15 }
  0x39   :  { %11824 = vmatprep.subr.bf16.mxu1 %v12815_v28 }
  0x3b   :  { %10644 = vmatmul.mubr.f32.vlgmr.msra.gmra.mrb[4].mxu1 %v12817_v11  ;;  %10617 = vmatmul.mubr.f32.vlgmr.msra.gmra.mrb[0].mxu0 %v12911_v53 }
  0x3c   :  { %11826 = vmatpush3.bf16.msra.mxu1 %v12951_v16  ;;  %10620 = vmatpush3.msra.mxu0 %v12878_v7  ;;  %v12974_v7 = vpack.c.bf16 %v703_v3, %v696_v2 }
  0x3d   :  { %11827 = vmatprep.subr.bf16.mxu1 %v12815_v28  ;;  %10654 = vmatprep.mubr.msk.f32.mxu1 %vm12816_vm8, %v12817_v11 }
  0x3e   :  { %10621 = vmatprep.mubr.f32.mxu0 %v12897_v35  ;;  %11830 = vmatprep.subr.bf16.mxu0 %v12815_v28 }
  0x40   :  { %11829 = vmatpush3.bf16.msra.mxu1 %v12959_v17 }
  0x41   :  { %11836 = vmatprep.subr.bf16.mxu1 %v12815_v28 }
  0x43   :  { %10655 = vmatmul.mubr.f32.vlgmr.msra.gmra.mrb[6].mxu1 %v12817_v11  ;;  %10622 = vmatmul.mubr.f32.vlgmr.msra.gmra.mrb[0].mxu0 %v12911_v53 }
  0x44   :  { %11832 = vmatpush3.bf16.msra.mxu0 %v12920_v63  ;;  %11838 = vmatpush3.bf16.msra.mxu1 %v12967_v18 }
  0x45   :  { %11833 = vmatprep.subr.bf16.mxu0 %v12815_v28  ;;  %11839 = vmatprep.subr.bf16.mxu1 %v12815_v28 }
  0x46   :  { %10665 = vmatprep.mubr.msk.f32.mxu0 %vm12816_vm8, %v12817_v11  ;;  %10676 = vmatprep.mubr.msk.f32.mxu1 %vm12816_vm8, %v12817_v11 }
  0x48   :  { %11835 = vmatpush3.bf16.msra.mxu0 %v12925_v5  ;;  %11841 = vmatpush3.bf16.msra.mxu1 %v12974_v7 }
  0x49   :  { %11842 = vmatprep.subr.bf16.mxu0 %v12815_v28  ;;  %11848 = vmatprep.subr.bf16.mxu1 %v12815_v28 }
  0x4b   :  { %10666 = vmatmul.mubr.f32.vlgmr.msra.gmra.mrb[2].mxu0 %v12817_v11  ;;  %10677 = vmatmul.mubr.f32.vlgmr.msra.gmra.mrb[8].mxu1 %v12817_v11 }
  0x4c   :  { %11844 = vmatpush3.bf16.msra.mxu0 %v12920_v63  ;;  %10687 = vmatprep.mubr.msk.f32.mxu0 %vm12816_vm8, %v12817_v11 }
  0x4d   :  { %11845 = vmatprep.subr.bf16.mxu0 %v12815_v28  ;;  %11850 = vmatpush3.bf16.msra.mxu1 %v12920_v63 }
  0x4e   :  { %11851 = vmatprep.subr.bf16.mxu1 %v12815_v28  ;;  %10698 = vmatprep.mubr.msk.f32.mxu1 %vm12816_vm8, %v12817_v11 }
  0x50   :  { %11847 = vmatpush3.bf16.msra.mxu0 %v12925_v5 }
  0x51   :  { %11853 = vmatpush3.bf16.msra.mxu1 %v12925_v5  ;;  %11884 = vmatprep.subr.bf16.mxu0 %v12815_v28 }
  0x52   :  { %11854 = vmatprep.subr.bf16.mxu1 %v12815_v28 }
  0x53   :  { %10688 = vmatmul.mubr.f32.vlgmr.msra.gmra.mrb[4].mxu0 %v12817_v11 }
  0x54   :  { %11886 = vmatpush3.bf16.msra.mxu0 %v12920_v63  ;;  %10764 = vmatprep.mubr.msk.f32.mxu0 %vm12816_vm8, %v12817_v11 }
  0x55   :  { %11887 = vmatprep.subr.bf16.mxu0 %v12815_v28 }
  0x58   :  { %11889 = vmatpush3.bf16.msra.mxu0 %v12925_v5 }
  0x59   :  { %11890 = vmatprep.subr.bf16.mxu0 %v12815_v28 }
  0xfe   :  { %v10598_v20 = vpop.f32.mrb[0].mxu1 }
  0xff   :  { %v190_v21 = vadd.f32 %v10598_v20, %v10006_v19  ;;  %v179_v22 = vpop.f32.mrb[1].mxu1 }
 0x100   :  { %v180_v29 = vadd.f32 %v10006_v19, %v179_v22 }
 0x106   :  { %v675_v23 = vpop.f32.mrb[2].mxu1 }
 0x107   :  { %v10634_v24 = vpop.f32.mrb[3].mxu1 }
 0x10e   :  { %v766_v25 = vpop.f32.mrb[4].mxu1 }
 0x10f   :  { %v767_v26 = vadd.f32 %v766_v25, %v675_v23  ;;  %v10645_v27 = vpop.f32.mrb[5].mxu1 }
 0x116   :  { %v846_v30 = vpop.f32.mrb[6].mxu1  ;;  %v10623_v31 = vpop.f32.mrb[0].mxu0 }
 0x117   :  { %v847_v32 = vadd.f32 %v846_v30, %v767_v26  ;;  %v13010_v33 = vadd.f32 %v10623_v31, %v190_v21  ;;  %v586_v34 = vpop.f32.mrb[1].mxu0  ;;  %v10656_v35 = vpop.f32.mrb[7].mxu1 }
 0x118   :  { %v13012_v36 = vadd.f32 %v586_v34, %v180_v29 }
 0x11e   :  { %v923_v37 = vpop.f32.mrb[2].mxu0  ;;  %v1006_v38 = vpop.f32.mrb[8].mxu1 }
 0x11f   :  { %v924_v39 = vadd.f32 %v923_v37, %v847_v32  ;;  %v10667_v40 = vpop.f32.mrb[3].mxu0  ;;  %v10678_v41 = vpop.f32.mrb[9].mxu1 }
 0x121   :  { %v1007_v42 = vadd.f32 %v1006_v38, %v924_v39 }
 0x126   :  { %v1081_v43 = vpop.f32.mrb[4].mxu0 }
 0x127   :  { %v1082_v44 = vadd.f32 %v1081_v43, %v1007_v42  ;;  %v10689_v45 = vpop.f32.mrb[5].mxu0 }
 0x129   :  { %v1085_v46 = vadd.f32 %v13012_v36, %v1082_v44 }
 0x12b   :  { %12636 = vtanh.f32 %v1085_v46  ;;  %v10007_v48 = vmul.f32 -1.442695, %v1085_v46 }
 0x12d   :  { %12638 = vpow2.f32 %v10007_v48 }
 0x135   :  { %v12637_v47 = vpop.eup %12636 }
 0x136   :  { %1095 = vrot.lane.b32.xlu0 %v12637_v47, %s12818_s17 }
 0x137   :  { %v12639_v49 = vpop.eup %12638 }
 0x138   :  { %v1089_v50 = vadd.f32 1.0, %v12639_v49 }
 0x13a   :  { %12640 = vrcp.f32 %v1089_v50 }
 0x144   :  { %v12641_v51 = vpop.eup %12640 }
 0x145   :  { %v1093_v54 = vmul.f32 0.0, %v12641_v51 }
 0x1a8   :  { %v1096_v52 = vpop.permute.xlu0 %1095 }
 0x1a9   :  { %v1098_v53 = vmul.f32 %v12641_v51, %v1096_v52 }
 0x1ab   :  { %1100 = vrot.lane.b32.xlu0 %v1098_v53, %s12819_s18 }
 0x21d   :  { %v1101_v55 = vpop.permute.xlu0 %1100 }
 0x21e   :  { %v13017_v56 = vadd.f32 %v1101_v55, %v1093_v54 }
 0x220   :  { %12642 = vtanh.f32 %v13017_v56  ;;  %v1612_v23 = vrot.slane %v13017_v56, 6 }
 0x22a   :  { %v12643_v57 = vpop.eup %12642 }
 0x22b   :  { %1106 = vrot.lane.b32.xlu1 %v12643_v57, %s12818_s17 }
 0x29d   :  { %v1107_v58 = vpop.permute.xlu1 %1106 }
 0x29e   :  { %v13021_v59 = vmul.f32 %v12641_v51, %v1107_v58 }
 0x2a0   :  { %1111 = vrot.lane.b32.xlu1 %v13021_v59, %s12819_s18 }
 0x312   :  { %v1112_v60 = vpop.permute.xlu1 %1111 }
 0x313   :  { %v1113_v61 = vsel %vm596_vm9, %v1112_v60, 0 }
 0x314   :  { %v1184_v62 = vand.u32 4294901760, %v1113_v61 }
 0x316   :  { %v1185_v0 = vsub.f32 %v1113_v61, %v1184_v62 }
 0x318   :  { %v1186_v1 = vand.u32 4294901760, %v1185_v0 }
 0x31a   :  { %v1187_v2 = vsub.f32 %v1185_v0, %v1186_v1 }
 0x31c   :  { %v1188_v3 = vand.u32 4294901760, %v1187_v2 }
 0x31e   :  { %10699 = vmatmul.mubr.f32.vlgmr.msra.gmra.mrb[10].mxu1 %v1188_v3 }
 0x31f   :  { %11856 = vmatpush3.bf16.msra.mxu1 %v12935_v12  ;;  %10709 = vmatprep.mubr.msk.f32.mxu1 %vm12816_vm8, %v12817_v11 }
 0x320   :  { %11857 = vmatprep.subr.bf16.mxu1 %v12815_v28 }
 0x323   :  { %11859 = vmatpush3.bf16.msra.mxu1 %v12941_v15 }
 0x324   :  { %11860 = vmatprep.subr.bf16.mxu1 %v12815_v28 }
 0x326   :  { %10710 = vmatmul.mubr.f32.vlgmr.msra.gmra.mrb[10].mxu1 %v1184_v62 }
 0x327   :  { %11862 = vmatpush3.bf16.msra.mxu1 %v12951_v16  ;;  %10720 = vmatprep.mubr.msk.f32.mxu1 %vm12816_vm8, %v12817_v11 }
 0x328   :  { %11863 = vmatprep.subr.bf16.mxu1 %v12815_v28 }
 0x32b   :  { %11865 = vmatpush3.bf16.msra.mxu1 %v12959_v17 }
 0x32c   :  { %11866 = vmatprep.subr.bf16.mxu1 %v12815_v28 }
 0x32e   :  { %10721 = vmatmul.mubr.f32.vlgmr.msra.gmra.mrb[10].mxu1 %v1185_v0 }
 0x32f   :  { %11868 = vmatpush3.bf16.msra.mxu1 %v12920_v63  ;;  %10731 = vmatprep.mubr.msk.f32.mxu1 %vm12816_vm8, %v12817_v11 }
 0x330   :  { %11869 = vmatprep.subr.bf16.mxu1 %v12815_v28 }
 0x333   :  { %11871 = vmatpush3.bf16.msra.mxu1 %v12925_v5 }
 0x334   :  { %11872 = vmatprep.subr.bf16.mxu1 %v12815_v28 }
 0x336   :  { %10732 = vmatmul.mubr.f32.vlgmr.msra.gmra.mrb[10].mxu1 %v1186_v1 }
 0x337   :  { %11874 = vmatpush3.bf16.msra.mxu1 %v12967_v18  ;;  %10742 = vmatprep.mubr.msk.f32.mxu1 %vm12816_vm8, %v12817_v11 }
 0x338   :  { %11875 = vmatprep.subr.bf16.mxu1 %v12815_v28 }
 0x33b   :  { %11877 = vmatpush3.bf16.msra.mxu1 %v12974_v7 }
 0x33c   :  { %11878 = vmatprep.subr.bf16.mxu1 %v12815_v28 }
 0x33e   :  { %10743 = vmatmul.mubr.f32.vlgmr.msra.gmra.mrb[10].mxu1 %v1184_v62 }
 0x33f   :  { %11880 = vmatpush3.bf16.msra.mxu1 %v12920_v63  ;;  %10753 = vmatprep.mubr.msk.f32.mxu1 %vm12816_vm8, %v12817_v11 }
 0x340   :  { %11881 = vmatprep.subr.bf16.mxu1 %v12815_v28 }
 0x343   :  { %11883 = vmatpush3.bf16.msra.mxu1 %v12925_v5 }
 0x344   :  { %11920 = vmatprep.subr.bf16.mxu1 %v12815_v28 }
 0x346   :  { %10754 = vmatmul.mubr.f32.vlgmr.msra.gmra.mrb[10].mxu1 %v1184_v62 }
 0x347   :  { %11922 = vmatpush3.bf16.msra.mxu1 %v12920_v63  ;;  %10830 = vmatprep.mubr.msk.f32.mxu1 %vm12816_vm8, %v12817_v11 }
 0x348   :  { %11923 = vmatprep.subr.bf16.mxu1 %v12815_v28 }
 0x34b   :  { %11925 = vmatpush3.bf16.msra.mxu1 %v12925_v5 }
 0x34c   :  { %11926 = vmatprep.subr.bf16.mxu1 %v12815_v28 }
 0x419   :  { %v1596_v4 = vpop.f32.mrb[10].mxu1 }
 0x41a   :  { %v1601_v6 = vrot.slane %v1596_v4, 6  ;;  %v10755_v8 = vpop.f32.mrb[11].mxu1 }
 0x41c   :  { %v1603_v9 = vadd.f32 %v13012_v36, %v1601_v6 }
 0x41e   :  { %12644 = vtanh.f32 %v1603_v9  ;;  %v10008_v13 = vmul.f32 -1.442695, %v1603_v9 }
 0x420   :  { %12646 = vpow2.f32 %v10008_v13 }
 0x428   :  { %v12645_v10 = vpop.eup %12644 }
 0x429   :  { %1616 = vrot.lane.b32.xlu0 %v12645_v10, %s12818_s17 }
 0x42a   :  { %v12647_v14 = vpop.eup %12646 }
 0x42b   :  { %v1607_v19 = vadd.f32 1.0, %v12647_v14 }
 0x42d   :  { %12648 = vrcp.f32 %v1607_v19 }
 0x437   :  { %v12649_v20 = vpop.eup %12648 }
 0x438   :  { %v1614_v24 = vmul.f32 %v12649_v20, %v1612_v23 }
 0x49b   :  { %v1617_v21 = vpop.permute.xlu0 %1616 }
 0x49c   :  { %v1619_v22 = vmul.f32 %v12649_v20, %v1617_v21 }
 0x49e   :  { %1621 = vrot.lane.b32.xlu1 %v1619_v22, %s12819_s18 }
 0x510   :  { %v1622_v25 = vpop.permute.xlu1 %1621 }
 0x511   :  { %v13066_v26 = vadd.f32 %v1622_v25, %v1614_v24 }
 0x513   :  { %12650 = vtanh.f32 %v13066_v26  ;;  %v2134_v52 = vrot.slane %v13066_v26, 6 }
 0x51d   :  { %v12651_v27 = vpop.eup %12650 }
 0x51e   :  { %1627 = vrot.lane.b32.xlu0 %v12651_v27, %s12818_s17 }
 0x590   :  { %v1628_v29 = vpop.permute.xlu0 %1627 }
 0x591   :  { %v13070_v30 = vmul.f32 %v12649_v20, %v1628_v29 }
 0x593   :  { %v1632_v31 = vrot.slane %v13070_v30, 2  ;;  %v4771_v60 = vsel %vm82_vm5, %v13021_v59, %v13070_v30 }
 0x595   :  { %1633 = vrot.lane.b32.xlu1 %v1632_v31, %s12819_s18 }
 0x607   :  { %v1634_v32 = vpop.permute.xlu1 %1633 }
 0x608   :  { %v1635_v34 = vsel %vm596_vm9, %v1634_v32, 0 }
 0x609   :  { %v1706_v35 = vand.u32 4294901760, %v1635_v34 }
 0x60b   :  { %v1707_v37 = vsub.f32 %v1635_v34, %v1706_v35 }
 0x60d   :  { %v1708_v38 = vand.u32 4294901760, %v1707_v37 }
 0x60f   :  { %v1709_v39 = vsub.f32 %v1707_v37, %v1708_v38 }
 0x611   :  { %v1710_v40 = vand.u32 4294901760, %v1709_v39 }
 0x613   :  { %10765 = vmatmul.mubr.f32.vlgmr.msra.gmra.mrb[6].mxu0 %v1710_v40 }
 0x614   :  { %11892 = vmatpush3.bf16.msra.mxu0 %v12935_v12  ;;  %10775 = vmatprep.mubr.msk.f32.mxu0 %vm12816_vm8, %v12817_v11 }
 0x615   :  { %11893 = vmatprep.subr.bf16.mxu0 %v12815_v28 }
 0x618   :  { %11895 = vmatpush3.bf16.msra.mxu0 %v12941_v15 }
 0x619   :  { %11896 = vmatprep.subr.bf16.mxu0 %v12815_v28 }
 0x61b   :  { %10776 = vmatmul.mubr.f32.vlgmr.msra.gmra.mrb[6].mxu0 %v1706_v35 }
 0x61c   :  { %11898 = vmatpush3.bf16.msra.mxu0 %v12951_v16  ;;  %10786 = vmatprep.mubr.msk.f32.mxu0 %vm12816_vm8, %v12817_v11 }
 0x61d   :  { %11899 = vmatprep.subr.bf16.mxu0 %v12815_v28 }
 0x620   :  { %11901 = vmatpush3.bf16.msra.mxu0 %v12959_v17 }
 0x621   :  { %11902 = vmatprep.subr.bf16.mxu0 %v12815_v28 }
 0x623   :  { %10787 = vmatmul.mubr.f32.vlgmr.msra.gmra.mrb[6].mxu0 %v1707_v37 }
 0x624   :  { %11904 = vmatpush3.bf16.msra.mxu0 %v12920_v63  ;;  %10797 = vmatprep.mubr.msk.f32.mxu0 %vm12816_vm8, %v12817_v11 }
 0x625   :  { %11905 = vmatprep.subr.bf16.mxu0 %v12815_v28 }
 0x628   :  { %11907 = vmatpush3.bf16.msra.mxu0 %v12925_v5 }
 0x629   :  { %11908 = vmatprep.subr.bf16.mxu0 %v12815_v28 }
 0x62b   :  { %10798 = vmatmul.mubr.f32.vlgmr.msra.gmra.mrb[6].mxu0 %v1708_v38 }
 0x62c   :  { %11910 = vmatpush3.bf16.msra.mxu0 %v12967_v18  ;;  %10808 = vmatprep.mubr.msk.f32.mxu0 %vm12816_vm8, %v12817_v11 }
 0x62d   :  { %11911 = vmatprep.subr.bf16.mxu0 %v12815_v28 }
 0x630   :  { %11913 = vmatpush3.bf16.msra.mxu0 %v12974_v7 }
 0x631   :  { %11914 = vmatprep.subr.bf16.mxu0 %v12815_v28 }
 0x633   :  { %10809 = vmatmul.mubr.f32.vlgmr.msra.gmra.mrb[6].mxu0 %v1706_v35 }
 0x634   :  { %11916 = vmatpush3.bf16.msra.mxu0 %v12920_v63  ;;  %10819 = vmatprep.mubr.msk.f32.mxu0 %vm12816_vm8, %v12817_v11 }
 0x635   :  { %11917 = vmatprep.subr.bf16.mxu0 %v12815_v28 }
 0x638   :  { %11919 = vmatpush3.bf16.msra.mxu0 %v12925_v5 }
 0x639   :  { %11956 = vmatprep.subr.bf16.mxu0 %v12815_v28 }
 0x63b   :  { %10820 = vmatmul.mubr.f32.vlgmr.msra.gmra.mrb[6].mxu0 %v1706_v35 }
 0x63c   :  { %11958 = vmatpush3.bf16.msra.mxu0 %v12920_v63  ;;  %10896 = vmatprep.mubr.msk.f32.mxu0 %vm12816_vm8, %v12817_v11 }
 0x63d   :  { %11959 = vmatprep.subr.bf16.mxu0 %v12815_v28 }
 0x640   :  { %11961 = vmatpush3.bf16.msra.mxu0 %v12925_v5 }
 0x641   :  { %11962 = vmatprep.subr.bf16.mxu0 %v12815_v28 }
 0x70e   :  { %v2118_v41 = vpop.f32.mrb[6].mxu0 }
 0x70f   :  { %v2123_v42 = vrot.slane %v2118_v41, 4  ;;  %v10821_v43 = vpop.f32.mrb[7].mxu0 }
 0x711   :  { %v2125_v44 = vadd.f32 %v13012_v36, %v2123_v42 }
 0x713   :  { %12652 = vtanh.f32 %v2125_v44  ;;  %v10009_v46 = vmul.f32 -1.442695, %v2125_v44 }
 0x715   :  { %12654 = vpow2.f32 %v10009_v46 }
 0x71d   :  { %v12653_v45 = vpop.eup %12652 }
 0x71e   :  { %2138 = vrot.lane.b32.xlu0 %v12653_v45, %s12818_s17 }
 0x71f   :  { %v12655_v47 = vpop.eup %12654 }
 0x720   :  { %v2129_v48 = vadd.f32 1.0, %v12655_v47 }
 0x722   :  { %12656 = vrcp.f32 %v2129_v48 }
 0x72c   :  { %v12657_v49 = vpop.eup %12656 }
 0x72d   :  { %v2136_v53 = vmul.f32 %v12657_v49, %v2134_v52 }
 0x790   :  { %v2139_v50 = vpop.permute.xlu0 %2138 }
 0x791   :  { %v2141_v51 = vmul.f32 %v12657_v49, %v2139_v50 }
 0x793   :  { %2143 = vrot.lane.b32.xlu1 %v2141_v51, %s12819_s18 }
 0x805   :  { %v2144_v54 = vpop.permute.xlu1 %2143 }
 0x806   :  { %v13115_v55 = vadd.f32 %v2144_v54, %v2136_v53 }
 0x808   :  { %12658 = vtanh.f32 %v13115_v55  ;;  %v2656_v25 = vrot.slane %v13115_v55, 6 }
 0x812   :  { %v12659_v56 = vpop.eup %12658 }
 0x813   :  { %2149 = vrot.lane.b32.xlu0 %v12659_v56, %s12818_s17 }
 0x885   :  { %v2150_v57 = vpop.permute.xlu0 %2149 }
 0x886   :  { %v2152_v58 = vmul.f32 %v12657_v49, %v2150_v57 }
 0x888   :  { %v2154_v61 = vrot.slane %v2152_v58, 4  ;;  %v13123_v62 = vsel %vm84_vm0, %v4771_v60, %v2152_v58 }
 0x88a   :  { %2155 = vrot.lane.b32.xlu1 %v2154_v61, %s12819_s18 }
 0x8fc   :  { %v2156_v0 = vpop.permute.xlu1 %2155 }
 0x8fd   :  { %v2157_v1 = vsel %vm596_vm9, %v2156_v0, 0 }
 0x8fe   :  { %v2228_v2 = vand.u32 4294901760, %v2157_v1 }
 0x900   :  { %v2229_v3 = vsub.f32 %v2157_v1, %v2228_v2 }
 0x902   :  { %v2230_v4 = vand.u32 4294901760, %v2229_v3 }
 0x904   :  { %v2231_v6 = vsub.f32 %v2229_v3, %v2230_v4 }
 0x906   :  { %v2232_v8 = vand.u32 4294901760, %v2231_v6 }
 0x908   :  { %10831 = vmatmul.mubr.f32.vlgmr.msra.gmra.mrb[12].mxu1 %v2232_v8 }
 0x909   :  { %11928 = vmatpush3.bf16.msra.mxu1 %v12935_v12  ;;  %10841 = vmatprep.mubr.msk.f32.mxu1 %vm12816_vm8, %v12817_v11 }
 0x90a   :  { %11929 = vmatprep.subr.bf16.mxu1 %v12815_v28 }
 0x90d   :  { %11931 = vmatpush3.bf16.msra.mxu1 %v12941_v15 }
 0x90e   :  { %11932 = vmatprep.subr.bf16.mxu1 %v12815_v28 }
 0x910   :  { %10842 = vmatmul.mubr.f32.vlgmr.msra.gmra.mrb[12].mxu1 %v2228_v2 }
 0x911   :  { %11934 = vmatpush3.bf16.msra.mxu1 %v12951_v16  ;;  %10852 = vmatprep.mubr.msk.f32.mxu1 %vm12816_vm8, %v12817_v11 }
 0x912   :  { %11935 = vmatprep.subr.bf16.mxu1 %v12815_v28 }
 0x915   :  { %11937 = vmatpush3.bf16.msra.mxu1 %v12959_v17 }
 0x916   :  { %11938 = vmatprep.subr.bf16.mxu1 %v12815_v28 }
 0x918   :  { %10853 = vmatmul.mubr.f32.vlgmr.msra.gmra.mrb[12].mxu1 %v2229_v3 }
 0x919   :  { %11940 = vmatpush3.bf16.msra.mxu1 %v12920_v63  ;;  %10863 = vmatprep.mubr.msk.f32.mxu1 %vm12816_vm8, %v12817_v11 }
 0x91a   :  { %11941 = vmatprep.subr.bf16.mxu1 %v12815_v28 }
 0x91d   :  { %11943 = vmatpush3.bf16.msra.mxu1 %v12925_v5 }
 0x91e   :  { %11944 = vmatprep.subr.bf16.mxu1 %v12815_v28 }
 0x920   :  { %10864 = vmatmul.mubr.f32.vlgmr.msra.gmra.mrb[12].mxu1 %v2230_v4 }
 0x921   :  { %11946 = vmatpush3.bf16.msra.mxu1 %v12967_v18  ;;  %10874 = vmatprep.mubr.msk.f32.mxu1 %vm12816_vm8, %v12817_v11 }
 0x922   :  { %11947 = vmatprep.subr.bf16.mxu1 %v12815_v28 }
 0x925   :  { %11949 = vmatpush3.bf16.msra.mxu1 %v12974_v7 }
 0x926   :  { %11950 = vmatprep.subr.bf16.mxu1 %v12815_v28 }
 0x928   :  { %10875 = vmatmul.mubr.f32.vlgmr.msra.gmra.mrb[12].mxu1 %v2228_v2 }
 0x929   :  { %11952 = vmatpush3.bf16.msra.mxu1 %v12920_v63  ;;  %10885 = vmatprep.mubr.msk.f32.mxu1 %vm12816_vm8, %v12817_v11 }
 0x92a   :  { %11953 = vmatprep.subr.bf16.mxu1 %v12815_v28 }
 0x92d   :  { %11955 = vmatpush3.bf16.msra.mxu1 %v12925_v5 }
 0x92e   :  { %11992 = vmatprep.subr.bf16.mxu1 %v12815_v28 }
 0x930   :  { %10886 = vmatmul.mubr.f32.vlgmr.msra.gmra.mrb[12].mxu1 %v2228_v2 }
 0x931   :  { %11994 = vmatpush3.bf16.msra.mxu1 %v12920_v63  ;;  %10962 = vmatprep.mubr.msk.f32.mxu1 %vm12816_vm8, %v12817_v11 }
 0x932   :  { %11995 = vmatprep.subr.bf16.mxu1 %v12815_v28 }
 0x935   :  { %11997 = vmatpush3.bf16.msra.mxu1 %v12925_v5 }
 0x936   :  { %11998 = vmatprep.subr.bf16.mxu1 %v12815_v28 }
 0xa03   :  { %v2640_v59 = vpop.f32.mrb[12].mxu1 }
 0xa04   :  { %v2645_v9 = vrot.slane %v2640_v59, 2  ;;  %v10887_v10 = vpop.f32.mrb[13].mxu1 }
 0xa06   :  { %v2647_v13 = vadd.f32 %v13012_v36, %v2645_v9 }
 0xa08   :  { %12660 = vtanh.f32 %v2647_v13  ;;  %v10010_v19 = vmul.f32 -1.442695, %v2647_v13 }
 0xa0a   :  { %12662 = vpow2.f32 %v10010_v19 }
 0xa12   :  { %v12661_v14 = vpop.eup %12660 }
 0xa13   :  { %2660 = vrot.lane.b32.xlu0 %v12661_v14, %s12818_s17 }
 0xa14   :  { %v12663_v20 = vpop.eup %12662 }
 0xa15   :  { %v2651_v21 = vadd.f32 1.0, %v12663_v20 }
 0xa17   :  { %12664 = vrcp.f32 %v2651_v21 }
 0xa21   :  { %v12665_v22 = vpop.eup %12664 }
 0xa22   :  { %v2658_v26 = vmul.f32 %v12665_v22, %v2656_v25 }
 0xa85   :  { %v2661_v23 = vpop.permute.xlu0 %2660 }
 0xa86   :  { %v2663_v24 = vmul.f32 %v12665_v22, %v2661_v23 }
 0xa88   :  { %2665 = vrot.lane.b32.xlu1 %v2663_v24, %s12819_s18 }
 0xafa   :  { %v2666_v27 = vpop.permute.xlu1 %2665 }
 0xafb   :  { %v13167_v29 = vadd.f32 %v2666_v27, %v2658_v26 }
 0xafd   :  { %12666 = vtanh.f32 %v13167_v29  ;;  %v3175_v8 = vrot.slane %v13167_v29, 6 }
 0xb07   :  { %v12667_v36 = vpop.eup %12666 }
 0xb08   :  { %2671 = vrot.lane.b32.xlu0 %v12667_v36, %s12818_s17 }
 0xb7a   :  { %v2672_v30 = vpop.permute.xlu0 %2671 }
 0xb7b   :  { %v2674_v31 = vmul.f32 %v12665_v22, %v2672_v30 }
 0xb7d   :  { %v2676_v32 = vrot.slane %v2674_v31, 6  ;;  %v13173_v34 = vsel %vm86_vm6, %v13123_v62, %v2674_v31 }
 0xb7f   :  { %2677 = vrot.lane.b32.xlu1 %v2676_v32, %s12819_s18 }
 0xbf1   :  { %v2678_v35 = vpop.permute.xlu1 %2677 }
 0xbf2   :  { %v2679_v37 = vsel %vm596_vm9, %v2678_v35, 0 }
 0xbf3   :  { %v2750_v38 = vand.u32 4294901760, %v2679_v37 }
 0xbf5   :  { %v2751_v39 = vsub.f32 %v2679_v37, %v2750_v38 }
 0xbf7   :  { %v2752_v40 = vand.u32 4294901760, %v2751_v39 }
 0xbf9   :  { %v2753_v41 = vsub.f32 %v2751_v39, %v2752_v40 }
 0xbfb   :  { %v2754_v42 = vand.u32 4294901760, %v2753_v41 }
 0xbfd   :  { %10897 = vmatmul.mubr.f32.vlgmr.msra.gmra.mrb[8].mxu0 %v2754_v42 }
 0xbfe   :  { %11964 = vmatpush3.bf16.msra.mxu0 %v12935_v12  ;;  %10907 = vmatprep.mubr.msk.f32.mxu0 %vm12816_vm8, %v12817_v11 }
 0xbff   :  { %11965 = vmatprep.subr.bf16.mxu0 %v12815_v28 }
 0xc02   :  { %11967 = vmatpush3.bf16.msra.mxu0 %v12941_v15 }
 0xc03   :  { %11968 = vmatprep.subr.bf16.mxu0 %v12815_v28 }
 0xc05   :  { %10908 = vmatmul.mubr.f32.vlgmr.msra.gmra.mrb[10].mxu0 %v2750_v38 }
 0xc06   :  { %11970 = vmatpush3.bf16.msra.mxu0 %v12951_v16  ;;  %10918 = vmatprep.mubr.msk.f32.mxu0 %vm12816_vm8, %v12817_v11 }
 0xc07   :  { %11971 = vmatprep.subr.bf16.mxu0 %v12815_v28 }
 0xc0a   :  { %11973 = vmatpush3.bf16.msra.mxu0 %v12959_v17 }
 0xc0b   :  { %11974 = vmatprep.subr.bf16.mxu0 %v12815_v28 }
 0xc0d   :  { %10919 = vmatmul.mubr.f32.vlgmr.msra.gmra.mrb[12].mxu0 %v2751_v39 }
 0xc0e   :  { %11976 = vmatpush3.bf16.msra.mxu0 %v12920_v63  ;;  %10929 = vmatprep.mubr.msk.f32.mxu0 %vm12816_vm8, %v12817_v11 }
 0xc0f   :  { %11977 = vmatprep.subr.bf16.mxu0 %v12815_v28 }
 0xc12   :  { %11979 = vmatpush3.bf16.msra.mxu0 %v12925_v5 }
 0xc13   :  { %11980 = vmatprep.subr.bf16.mxu0 %v12815_v28 }
 0xc15   :  { %10930 = vmatmul.mubr.f32.vlgmr.msra.gmra.mrb[14].mxu0 %v2752_v40 }
 0xc16   :  { %11982 = vmatpush3.bf16.msra.mxu0 %v12967_v18  ;;  %10940 = vmatprep.mubr.msk.f32.mxu0 %vm12816_vm8, %v12817_v11 }
 0xc17   :  { %11983 = vmatprep.subr.bf16.mxu0 %v12815_v28 }
 0xc1a   :  { %11985 = vmatpush3.bf16.msra.mxu0 %v12974_v7 }
 0xc1b   :  { %11986 = vmatprep.subr.bf16.mxu0 %v12815_v28 }
 0xc1d   :  { %10941 = vmatmul.mubr.f32.vlgmr.msra.gmra.mrb[16].mxu0 %v2750_v38 }
 0xc1e   :  { %11988 = vmatpush3.bf16.msra.mxu0 %v12920_v63  ;;  %10951 = vmatprep.mubr.msk.f32.mxu0 %vm12816_vm8, %v12817_v11 }
 0xc1f   :  { %11989 = vmatprep.subr.bf16.mxu0 %v12815_v28 }
 0xc22   :  { %11991 = vmatpush3.bf16.msra.mxu0 %v12925_v5 }
 0xc23   :  { %12028 = vmatprep.subr.bf16.mxu0 %v12815_v28 }
 0xc25   :  { %10952 = vmatmul.mubr.f32.vlgmr.msra.gmra.mrb[18].mxu0 %v2750_v38 }
 0xc26   :  { %12030 = vmatpush3.bf16.msra.mxu0 %v12920_v63  ;;  %11028 = vmatprep.mubr.msk.f32.mxu0 %vm12816_vm8, %v12817_v11 }
 0xc27   :  { %12031 = vmatprep.subr.bf16.mxu0 %v12815_v28 }
 0xc2a   :  { %12033 = vmatpush3.bf16.msra.mxu0 %v12925_v5 }
 0xc2b   :  { %12034 = vmatprep.subr.bf16.mxu0 %v12815_v28 }
 0xcd0   :  { %v2756_v43 = vpop.f32.mrb[8].mxu0 }
 0xcd1   :  { %v10898_v44 = vpop.f32.mrb[9].mxu0 }
 0xcd8   :  { %v2847_v45 = vpop.f32.mrb[10].mxu0 }
 0xcd9   :  { %v2848_v46 = vadd.f32 %v2847_v45, %v2756_v43  ;;  %v10909_v47 = vpop.f32.mrb[11].mxu0 }
 0xce0   :  { %v2927_v48 = vpop.f32.mrb[12].mxu0 }
 0xce1   :  { %v2928_v49 = vadd.f32 %v2927_v48, %v2848_v46  ;;  %v10920_v50 = vpop.f32.mrb[13].mxu0 }
 0xce8   :  { %v3004_v51 = vpop.f32.mrb[14].mxu0 }
 0xce9   :  { %v3005_v52 = vadd.f32 %v3004_v51, %v2928_v49  ;;  %v10931_v53 = vpop.f32.mrb[15].mxu0 }
 0xcf0   :  { %v3087_v54 = vpop.f32.mrb[16].mxu0 }
 0xcf1   :  { %v3088_v55 = vadd.f32 %v3087_v54, %v3005_v52  ;;  %v10942_v56 = vpop.f32.mrb[17].mxu0 }
 0xcf8   :  { %v3162_v57 = vpop.f32.mrb[18].mxu0 }
 0xcf9   :  { %v3163_v58 = vadd.f32 %v3162_v57, %v3088_v55  ;;  %v10953_v60 = vpop.f32.mrb[19].mxu0 }
 0xcfb   :  { %v3166_v61 = vadd.f32 %v13010_v33, %v3163_v58 }
 0xcfd   :  { %12668 = vtanh.f32 %v3166_v61  ;;  %v10011_v0 = vmul.f32 -1.442695, %v3166_v61 }
 0xcff   :  { %12670 = vpow2.f32 %v10011_v0 }
 0xd07   :  { %v12669_v62 = vpop.eup %12668 }
 0xd08   :  { %3179 = vrot.lane.b32.xlu0 %v12669_v62, %s12818_s17 }
 0xd09   :  { %v12671_v1 = vpop.eup %12670 }
 0xd0a   :  { %v3170_v2 = vadd.f32 1.0, %v12671_v1 }
 0xd0c   :  { %12672 = vrcp.f32 %v3170_v2 }
 0xd16   :  { %v12673_v3 = vpop.eup %12672 }
 0xd17   :  { %v3177_v59 = vmul.f32 %v12673_v3, %v3175_v8 }
 0xd7a   :  { %v3180_v4 = vpop.permute.xlu0 %3179 }
 0xd7b   :  { %v3182_v6 = vmul.f32 %v12673_v3, %v3180_v4 }
 0xd7d   :  { %3184 = vrot.lane.b32.xlu1 %v3182_v6, %s12819_s18 }
 0xdef   :  { %v3185_v9 = vpop.permute.xlu1 %3184 }
 0xdf0   :  { %v13217_v10 = vadd.f32 %v3185_v9, %v3177_v59 }
 0xdf2   :  { %12674 = vtanh.f32 %v13217_v10  ;;  %v3696_v41 = vrot.slane %v13217_v10, 6 }
 0xdfc   :  { %v12675_v13 = vpop.eup %12674 }
 0xdfd   :  { %3190 = vrot.lane.b32.xlu0 %v12675_v13, %s12818_s17 }
 0xe6f   :  { %v3191_v14 = vpop.permute.xlu0 %3190 }
 0xe70   :  { %v13221_v19 = vmul.f32 %v12673_v3, %v3191_v14 }
 0xe72   :  { %3195 = vrot.lane.b32.xlu1 %v13221_v19, %s12819_s18 }
 0xee4   :  { %v3196_v20 = vpop.permute.xlu1 %3195 }
 0xee5   :  { %v3197_v21 = vsel %vm596_vm9, %v3196_v20, 0 }
 0xee6   :  { %v3268_v22 = vand.u32 4294901760, %v3197_v21 }
 0xee8   :  { %v3269_v23 = vsub.f32 %v3197_v21, %v3268_v22 }
 0xeea   :  { %v3270_v24 = vand.u32 4294901760, %v3269_v23 }
 0xeec   :  { %v3271_v25 = vsub.f32 %v3269_v23, %v3270_v24 }
 0xeee   :  { %v3272_v26 = vand.u32 4294901760, %v3271_v25 }
 0xef0   :  { %10963 = vmatmul.mubr.f32.vlgmr.msra.gmra.mrb[14].mxu1 %v3272_v26 }
 0xef1   :  { %12000 = vmatpush3.bf16.msra.mxu1 %v12935_v12  ;;  %10973 = vmatprep.mubr.msk.f32.mxu1 %vm12816_vm8, %v12817_v11 }
 0xef2   :  { %12001 = vmatprep.subr.bf16.mxu1 %v12815_v28 }
 0xef5   :  { %12003 = vmatpush3.bf16.msra.mxu1 %v12941_v15 }
 0xef6   :  { %12004 = vmatprep.subr.bf16.mxu1 %v12815_v28 }
 0xef8   :  { %10974 = vmatmul.mubr.f32.vlgmr.msra.gmra.mrb[14].mxu1 %v3268_v22 }
 0xef9   :  { %12006 = vmatpush3.bf16.msra.mxu1 %v12951_v16  ;;  %10984 = vmatprep.mubr.msk.f32.mxu1 %vm12816_vm8, %v12817_v11 }
 0xefa   :  { %12007 = vmatprep.subr.bf16.mxu1 %v12815_v28 }
 0xefd   :  { %12009 = vmatpush3.bf16.msra.mxu1 %v12959_v17 }
 0xefe   :  { %12010 = vmatprep.subr.bf16.mxu1 %v12815_v28 }
 0xf00   :  { %10985 = vmatmul.mubr.f32.vlgmr.msra.gmra.mrb[14].mxu1 %v3269_v23 }
 0xf01   :  { %12012 = vmatpush3.bf16.msra.mxu1 %v12920_v63  ;;  %10995 = vmatprep.mubr.msk.f32.mxu1 %vm12816_vm8, %v12817_v11 }
 0xf02   :  { %12013 = vmatprep.subr.bf16.mxu1 %v12815_v28 }
 0xf05   :  { %12015 = vmatpush3.bf16.msra.mxu1 %v12925_v5 }
 0xf06   :  { %12016 = vmatprep.subr.bf16.mxu1 %v12815_v28 }
 0xf08   :  { %10996 = vmatmul.mubr.f32.vlgmr.msra.gmra.mrb[14].mxu1 %v3270_v24 }
 0xf09   :  { %12018 = vmatpush3.bf16.msra.mxu1 %v12967_v18  ;;  %11006 = vmatprep.mubr.msk.f32.mxu1 %vm12816_vm8, %v12817_v11 }
 0xf0a   :  { %12019 = vmatprep.subr.bf16.mxu1 %v12815_v28 }
 0xf0d   :  { %12021 = vmatpush3.bf16.msra.mxu1 %v12974_v7 }
 0xf0e   :  { %12022 = vmatprep.subr.bf16.mxu1 %v12815_v28 }
 0xf10   :  { %11007 = vmatmul.mubr.f32.vlgmr.msra.gmra.mrb[14].mxu1 %v3268_v22 }
 0xf11   :  { %12024 = vmatpush3.bf16.msra.mxu1 %v12920_v63  ;;  %11017 = vmatprep.mubr.msk.f32.mxu1 %vm12816_vm8, %v12817_v11 }
 0xf12   :  { %12025 = vmatprep.subr.bf16.mxu1 %v12815_v28 }
 0xf15   :  { %12027 = vmatpush3.bf16.msra.mxu1 %v12925_v5 }
 0xf16   :  { %12064 = vmatprep.subr.bf16.mxu1 %v12815_v28 }
 0xf18   :  { %11018 = vmatmul.mubr.f32.vlgmr.msra.gmra.mrb[14].mxu1 %v3268_v22 }
 0xf19   :  { %12066 = vmatpush3.bf16.msra.mxu1 %v12920_v63  ;;  %11094 = vmatprep.mubr.msk.f32.mxu1 %vm12816_vm8, %v12817_v11 }
 0xf1a   :  { %12067 = vmatprep.subr.bf16.mxu1 %v12815_v28 }
 0xf1d   :  { %12069 = vmatpush3.bf16.msra.mxu1 %v12925_v5 }
 0xf1e   :  { %12070 = vmatprep.subr.bf16.mxu1 %v12815_v28 }
 0xfeb   :  { %v3680_v27 = vpop.f32.mrb[14].mxu1 }
 0xfec   :  { %v3685_v29 = vrot.slane %v3680_v27, 6  ;;  %v11019_v36 = vpop.f32.mrb[15].mxu1 }
 0xfee   :  { %v3687_v30 = vadd.f32 %v13010_v33, %v3685_v29 }
 0xff0   :  { %12676 = vtanh.f32 %v3687_v30  ;;  %v10012_v32 = vmul.f32 -1.442695, %v3687_v30 }
 0xff2   :  { %12678 = vpow2.f32 %v10012_v32 }
 0xffa   :  { %v12677_v31 = vpop.eup %12676 }
 0xffb   :  { %3700 = vrot.lane.b32.xlu0 %v12677_v31, %s12818_s17 }
 0xffc   :  { %v12679_v35 = vpop.eup %12678 }
 0xffd   :  { %v3691_v37 = vadd.f32 1.0, %v12679_v35 }
 0xfff   :  { %12680 = vrcp.f32 %v3691_v37 }
0x1009   :  { %v12681_v38 = vpop.eup %12680 }
0x100a   :  { %v3698_v42 = vmul.f32 %v12681_v38, %v3696_v41 }
0x106d   :  { %v3701_v39 = vpop.permute.xlu0 %3700 }
0x106e   :  { %v3703_v40 = vmul.f32 %v12681_v38, %v3701_v39 }
0x1070   :  { %3705 = vrot.lane.b32.xlu1 %v3703_v40, %s12819_s18 }
0x10e2   :  { %v3706_v43 = vpop.permute.xlu1 %3705 }
0x10e3   :  { %v13266_v44 = vadd.f32 %v3706_v43, %v3698_v42 }
0x10e5   :  { %12682 = vtanh.f32 %v13266_v44  ;;  %v4218_v6 = vrot.slane %v13266_v44, 6 }
0x10ef   :  { %v12683_v45 = vpop.eup %12682 }
0x10f0   :  { %3711 = vrot.lane.b32.xlu0 %v12683_v45, %s12818_s17  ;;  %v10015_v45 = vld [vmem:[%s13883_s1 + $0x20] sm:$0xff] }
0x1162   :  { %v3712_v46 = vpop.permute.xlu0 %3711 }
0x1163   :  { %v13270_v47 = vmul.f32 %v12681_v38, %v3712_v46  ;;  %v10016_v46 = vld [vmem:[%s13883_s1 + $0x28] sm:$0xff] }
0x1165   :  { %v3716_v48 = vrot.slane %v13270_v47, 2  ;;  %v4774_v20 = vsel %vm82_vm5, %v13221_v19, %v13270_v47  ;;  %v4794_v47 = vand.u32 4294901760, %v10015_v45 }
0x1167   :  { %3717 = vrot.lane.b32.xlu1 %v3716_v48, %s12819_s18  ;;  %v4797_v48 = vand.u32 4294901760, %v10016_v46 }
0x11d9   :  { %v3718_v49 = vpop.permute.xlu1 %3717 }
0x11da   :  { %v3719_v50 = vsel %vm596_vm9, %v3718_v49, 0  ;;  %v13375_v49 = vpack.c.bf16 %v4797_v48, %v4794_v47 }
0x11db   :  { %v3790_v51 = vand.u32 4294901760, %v3719_v50 }
0x11dd   :  { %v3791_v52 = vsub.f32 %v3719_v50, %v3790_v51  ;;  %v4884_v50 = vsub.f32 %v10015_v45, %v4794_v47 }
0x11df   :  { %v3792_v53 = vand.u32 4294901760, %v3791_v52 }
0x11e1   :  { %v3793_v54 = vsub.f32 %v3791_v52, %v3792_v53 }
0x11e3   :  { %v3794_v55 = vand.u32 4294901760, %v3793_v54 }
0x11e5   :  { %11029 = vmatmul.mubr.f32.vlgmr.msra.gmra.mrb[20].mxu0 %v3794_v55 }
0x11e6   :  { %12036 = vmatpush3.bf16.msra.mxu0 %v12935_v12  ;;  %11039 = vmatprep.mubr.msk.f32.mxu0 %vm12816_vm8, %v12817_v11 }
0x11e7   :  { %12037 = vmatprep.subr.bf16.mxu0 %v12815_v28 }
0x11ea   :  { %12039 = vmatpush3.bf16.msra.mxu0 %v12941_v15 }
0x11eb   :  { %12040 = vmatprep.subr.bf16.mxu0 %v12815_v28 }
0x11ed   :  { %11040 = vmatmul.mubr.f32.vlgmr.msra.gmra.mrb[20].mxu0 %v3790_v51 }
0x11ee   :  { %12042 = vmatpush3.bf16.msra.mxu0 %v12951_v16  ;;  %11050 = vmatprep.mubr.msk.f32.mxu0 %vm12816_vm8, %v12817_v11 }
0x11ef   :  { %12043 = vmatprep.subr.bf16.mxu0 %v12815_v28 }
0x11f2   :  { %12045 = vmatpush3.bf16.msra.mxu0 %v12959_v17 }
0x11f3   :  { %12046 = vmatprep.subr.bf16.mxu0 %v12815_v28 }
0x11f5   :  { %11051 = vmatmul.mubr.f32.vlgmr.msra.gmra.mrb[20].mxu0 %v3791_v52  ;;  %v10017_v52 = vld [vmem:[%s13883_s1 + $0x30] sm:$0xff] }
0x11f6   :  { %12048 = vmatpush3.bf16.msra.mxu0 %v12920_v63  ;;  %11061 = vmatprep.mubr.msk.f32.mxu0 %vm12816_vm8, %v12817_v11  ;;  %v4800_v54 = vand.u32 4294901760, %v10017_v52 }
0x11f7   :  { %12049 = vmatprep.subr.bf16.mxu0 %v12815_v28 }
0x11fa   :  { %12051 = vmatpush3.bf16.msra.mxu0 %v12925_v5 }
0x11fb   :  { %12052 = vmatprep.subr.bf16.mxu0 %v12815_v28 }
0x11fd   :  { %11062 = vmatmul.mubr.f32.vlgmr.msra.gmra.mrb[20].mxu0 %v3792_v53  ;;  %v10018_v53 = vld [vmem:[%s13883_s1 + $0x38] sm:$0xff] }
0x11fe   :  { %12054 = vmatpush3.bf16.msra.mxu0 %v12967_v18  ;;  %11072 = vmatprep.mubr.msk.f32.mxu0 %vm12816_vm8, %v12817_v11  ;;  %v4803_v55 = vand.u32 4294901760, %v10018_v53 }
0x11ff   :  { %12055 = vmatprep.subr.bf16.mxu0 %v12815_v28 }
0x1202   :  { %12057 = vmatpush3.bf16.msra.mxu0 %v12974_v7 }
0x1203   :  { %12058 = vmatprep.subr.bf16.mxu0 %v12815_v28 }
0x1205   :  { %11073 = vmatmul.mubr.f32.vlgmr.msra.gmra.mrb[20].mxu0 %v3790_v51 }
0x1206   :  { %12060 = vmatpush3.bf16.msra.mxu0 %v12920_v63  ;;  %11083 = vmatprep.mubr.msk.f32.mxu0 %vm12816_vm8, %v12817_v11 }
0x1207   :  { %12061 = vmatprep.subr.bf16.mxu0 %v12815_v28 }
0x120a   :  { %12063 = vmatpush3.bf16.msra.mxu0 %v12925_v5 }
0x120b   :  { %12101 = vmatprep.subr.bf16.mxu0 %v13375_v49 }
0x120d   :  { %11084 = vmatmul.mubr.f32.vlgmr.msra.gmra.mrb[20].mxu0 %v3790_v51  ;;  %v4891_v51 = vsub.f32 %v10016_v46, %v4797_v48 }
0x120e   :  { %12103 = vmatpush3.bf16.msra.mxu0 %v13375_v49 }
0x12e0   :  { %v4202_v56 = vpop.f32.mrb[20].mxu0 }
0x12e1   :  { %v4207_v57 = vrot.slane %v4202_v56, 4  ;;  %v11085_v58 = vpop.f32.mrb[21].mxu0  ;;  %v4885_v56 = vand.u32 4294901760, %v4884_v50 }
0x12e2   :  { %v13385_v58 = vpack.c.bf16 %v4803_v55, %v4800_v54 }
0x12e3   :  { %v4209_v60 = vadd.f32 %v13010_v33, %v4207_v57  ;;  %v4892_v57 = vand.u32 4294901760, %v4891_v51 }
0x12e4   :  { %12105 = vmatprep.subr.bf16.mxu0 %v13385_v58 }
0x12e5   :  { %12684 = vtanh.f32 %v4209_v60  ;;  %v10013_v62 = vmul.f32 -1.442695, %v4209_v60  ;;  %v4886_v60 = vsub.f32 %v4884_v50, %v4885_v56  ;;  %12107 = vmatpush3.bf16.msra.mxu0 %v13385_v58 }
0x12e7   :  { %12686 = vpow2.f32 %v10013_v62  ;;  %v4898_v62 = vsub.f32 %v10017_v52, %v4800_v54 }
0x12ef   :  { %v12685_v61 = vpop.eup %12684 }
0x12f0   :  { %4222 = vrot.lane.b32.xlu0 %v12685_v61, %s12818_s17  ;;  %v4893_v61 = vsub.f32 %v4891_v51, %v4892_v57 }
0x12f1   :  { %v12687_v0 = vpop.eup %12686 }
0x12f2   :  { %v4213_v1 = vadd.f32 1.0, %v12687_v0  ;;  %v4905_v0 = vsub.f32 %v10018_v53, %v4803_v55 }
0x12f4   :  { %12688 = vrcp.f32 %v4213_v1  ;;  %v4887_v1 = vand.u32 4294901760, %v4886_v60 }
0x12fe   :  { %v12689_v2 = vpop.eup %12688 }
0x12ff   :  { %v4220_v8 = vmul.f32 %v12689_v2, %v4218_v6  ;;  %v4906_v6 = vand.u32 4294901760, %v4905_v0 }
0x1362   :  { %v4223_v3 = vpop.permute.xlu0 %4222 }
0x1363   :  { %v4225_v4 = vmul.f32 %v12689_v2, %v4223_v3  ;;  %v4899_v3 = vand.u32 4294901760, %v4898_v62 }
0x1365   :  { %4227 = vrot.lane.b32.xlu1 %v4225_v4, %s12819_s18 }
0x13d7   :  { %v4228_v59 = vpop.permute.xlu1 %4227 }
0x13d8   :  { %v13308_v9 = vadd.f32 %v4228_v59, %v4220_v8 }
0x13da   :  { %12690 = vtanh.f32 %v13308_v9  ;;  %v4740_v32 = vrot.slane %v13308_v9, 6  ;;  %v4900_v9 = vsub.f32 %v4898_v62, %v4899_v3 }
0x13e4   :  { %v12691_v10 = vpop.eup %12690 }
0x13e5   :  { %4233 = vrot.lane.b32.xlu0 %v12691_v10, %s12818_s17  ;;  %v4907_v10 = vsub.f32 %v4905_v0, %v4906_v6 }
0x1457   :  { %v4234_v13 = vpop.permute.xlu0 %4233 }
0x1458   :  { %v4236_v14 = vmul.f32 %v12689_v2, %v4234_v13  ;;  %v4894_v2 = vand.u32 4294901760, %v4893_v61 }
0x145a   :  { %v4238_v21 = vrot.slane %v4236_v14, 4  ;;  %v13316_v22 = vsel %vm84_vm0, %v4774_v20, %v4236_v14  ;;  %v13391_v59 = vpack.c.bf16 %v4894_v2, %v4887_v1  ;;  %v4901_v14 = vand.u32 4294901760, %v4900_v9  ;;  %v10020_v1 = vld [vmem:[%s13885_s3 + $0x1] ss:$0 sm:$0xff] }
0x145b   :  { %v4908_v20 = vand.u32 4294901760, %v4907_v10 }
0x145c   :  { %4239 = vrot.lane.b32.xlu1 %v4238_v21, %s12819_s18  ;;  %12109 = vmatprep.subr.bf16.mxu0 %v13391_v59 }
0x145d   :  { %v13398_v21 = vpack.c.bf16 %v4908_v20, %v4901_v14 }
0x14ce   :  { %v4240_v23 = vpop.permute.xlu1 %4239 }
0x14cf   :  { %v4241_v24 = vsel %vm596_vm9, %v4240_v23, 0  ;;  %v13400_v23 = vpack.c.bf16 %v4891_v51, %v4884_v50 }
0x14d0   :  { %v4312_v25 = vand.u32 4294901760, %v4241_v24 }
0x14d2   :  { %v4313_v26 = vsub.f32 %v4241_v24, %v4312_v25  ;;  %v13402_v24 = vpack.c.bf16 %v4905_v0, %v4898_v62 }
0x14d4   :  { %v4314_v27 = vand.u32 4294901760, %v4313_v26 }
0x14d6   :  { %v4315_v29 = vsub.f32 %v4313_v26, %v4314_v27 }
0x14d8   :  { %v4316_v36 = vand.u32 4294901760, %v4315_v29  ;;  %v4766_v29 = vld [vmem:[#allocation2 + $0x28] sm:$0xff] }
0x14da   :  { %11095 = vmatmul.mubr.f32.vlgmr.msra.gmra.mrb[16].mxu1 %v4316_v36 }
0x14db   :  { %12072 = vmatpush3.bf16.msra.mxu1 %v12935_v12  ;;  %11105 = vmatprep.mubr.msk.f32.mxu1 %vm12816_vm8, %v12817_v11 }
0x14dc   :  { %12073 = vmatprep.subr.bf16.mxu1 %v12815_v28 }
0x14df   :  { %12075 = vmatpush3.bf16.msra.mxu1 %v12941_v15 }
0x14e0   :  { %12076 = vmatprep.subr.bf16.mxu1 %v12815_v28 }
0x14e2   :  { %11106 = vmatmul.mubr.f32.vlgmr.msra.gmra.mrb[16].mxu1 %v4312_v25 }
0x14e3   :  { %12078 = vmatpush3.bf16.msra.mxu1 %v12951_v16  ;;  %11116 = vmatprep.mubr.msk.f32.mxu1 %vm12816_vm8, %v12817_v11 }
0x14e4   :  { %12079 = vmatprep.subr.bf16.mxu1 %v12815_v28 }
0x14e7   :  { %12081 = vmatpush3.bf16.msra.mxu1 %v12959_v17 }
0x14e8   :  { %12082 = vmatprep.subr.bf16.mxu1 %v12815_v28 }
0x14ea   :  { %11117 = vmatmul.mubr.f32.vlgmr.msra.gmra.mrb[16].mxu1 %v4313_v26  ;;  %v13406_v26 = vpack.c.bf16 %v4906_v6, %v4899_v3 }
0x14eb   :  { %12084 = vmatpush3.bf16.msra.mxu1 %v12920_v63  ;;  %11127 = vmatprep.mubr.msk.f32.mxu1 %vm12816_vm8, %v12817_v11 }
0x14ec   :  { %12085 = vmatprep.subr.bf16.mxu1 %v12815_v28 }
0x14ef   :  { %12087 = vmatpush3.bf16.msra.mxu1 %v12925_v5 }
0x14f0   :  { %12088 = vmatprep.subr.bf16.mxu1 %v12815_v28 }
0x14f2   :  { %11128 = vmatmul.mubr.f32.vlgmr.msra.gmra.mrb[16].mxu1 %v4314_v27  ;;  %v4765_v27 = vld [vmem:[#allocation2 + $0x20] sm:$0xff] }
0x14f3   :  { %12090 = vmatpush3.bf16.msra.mxu1 %v12967_v18  ;;  %11138 = vmatprep.mubr.msk.f32.mxu1 %vm12816_vm8, %v12817_v11  ;;  %v5322_v36 = vand.u32 4294901760, %v4765_v27 }
0x14f4   :  { %12091 = vmatprep.subr.bf16.mxu1 %v12815_v28 }
0x14f7   :  { %12093 = vmatpush3.bf16.msra.mxu1 %v12974_v7 }
0x14f8   :  { %12094 = vmatprep.subr.bf16.mxu1 %v12815_v28 }
0x14fa   :  { %11139 = vmatmul.mubr.f32.vlgmr.msra.gmra.mrb[16].mxu1 %v4312_v25 }
0x14fb   :  { %12096 = vmatpush3.bf16.msra.mxu1 %v12920_v63  ;;  %11149 = vmatprep.mubr.msk.f32.mxu1 %vm12816_vm8, %v12817_v11 }
0x14fc   :  { %12097 = vmatprep.subr.bf16.mxu1 %v12815_v28 }
0x14ff   :  { %12099 = vmatpush3.bf16.msra.mxu1 %v12925_v5 }
0x1500   :  { %12148 = vmatprep.subr.bf16.mxu1 %v12815_v28 }
0x1502   :  { %11150 = vmatmul.mubr.f32.vlgmr.msra.gmra.mrb[16].mxu1 %v4312_v25  ;;  %v13404_v25 = vpack.c.bf16 %v4892_v57, %v4885_v56 }
0x1503   :  { %11226 = vmatprep.mubr.msk.f32.mxu1 %vm12816_vm8, %v12817_v11 }
0x15d5   :  { %v4724_v12 = vpop.f32.mrb[16].mxu1 }
0x15d6   :  { %v4729_v15 = vrot.slane %v4724_v12, 2  ;;  %v11151_v16 = vpop.f32.mrb[17].mxu1  ;;  %v5402_v12 = vsub.f32 %v4765_v27, %v5322_v36 }
0x15d8   :  { %v4731_v17 = vadd.f32 %v13010_v33, %v4729_v15 }
0x15da   :  { %12692 = vtanh.f32 %v4731_v17  ;;  %v10014_v18 = vmul.f32 -1.442695, %v4731_v17  ;;  %v4767_v17 = vld [vmem:[#allocation2 + $0x30] sm:$0xff] }
0x15dc   :  { %12694 = vpow2.f32 %v10014_v18  ;;  %v5328_v18 = vand.u32 4294901760, %v4767_v17 }
0x15e4   :  { %v12693_v63 = vpop.eup %12692 }
0x15e5   :  { %4744 = vrot.lane.b32.xlu0 %v12693_v63, %s12818_s17  ;;  %v4768_v63 = vld [vmem:[#allocation2 + $0x38] sm:$0xff] }
0x15e6   :  { %v12695_v7 = vpop.eup %12694 }
0x15e7   :  { %v4735_v19 = vadd.f32 1.0, %v12695_v7  ;;  %v5331_v7 = vand.u32 4294901760, %v4768_v63 }
0x15e9   :  { %12696 = vrcp.f32 %v4735_v19  ;;  %v5403_v19 = vand.u32 4294901760, %v5402_v12 }
0x15f3   :  { %v12697_v5 = vpop.eup %12696 }
0x15f4   :  { %v4742_v33 = vmul.f32 %v12697_v5, %v4740_v32  ;;  %v5416_v32 = vsub.f32 %v4767_v17, %v5328_v18 }
0x1657   :  { %v4745_v30 = vpop.permute.xlu0 %4744 }
0x1658   :  { %v4747_v31 = vmul.f32 %v12697_v5, %v4745_v30  ;;  %v5404_v30 = vsub.f32 %v5402_v12, %v5403_v19 }
0x165a   :  { %4749 = vrot.lane.b32.xlu1 %v4747_v31, %s12819_s18 }
0x165e   :  { %4785 = vrot.lane.b32.xlu1 %v13173_v34, %s12819_s18 }
0x16cc   :  { %v4750_v35 = vpop.permute.xlu1 %4749 }
0x16cd   :  { %v4752_v37 = vadd.f32 %v4750_v35, %v4742_v33  ;;  %v5423_v33 = vsub.f32 %v4768_v63, %v5331_v7  ;;  %v13412_v35 = vpack.c.bf16 %v5331_v7, %v5328_v18 }
0x16cf   :  { %12698 = vtanh.f32 %v4752_v37  ;;  %v5405_v37 = vand.u32 4294901760, %v5404_v30  ;;  %v13427_v51 = vpack.c.bf16 %v5423_v33, %v5416_v32 }
0x16d0   :  { %v4786_v38 = vpop.permute.xlu1 %4785 }
0x16d1   :  { %v4789_v39 = vsel %vm596_vm9, %v4786_v38, 0 }
0x16d2   :  { %v13359_v40 = vand.u32 4294901760, %v4789_v39 }
0x16d4   :  { %v13362_v41 = vsub.f32 %v4789_v39, %v13359_v40  ;;  %v5417_v39 = vand.u32 4294901760, %v5416_v32 }
0x16d6   :  { %v4864_v42 = vand.u32 4294901760, %v13362_v41 }
0x16d8   :  { %v4865_v34 = vsub.f32 %v13362_v41, %v4864_v42 }
0x16d9   :  { %v12699_v43 = vpop.eup %12698 }
0x16da   :  { %4755 = vrot.lane.b32.xlu0 %v12699_v43, %s12818_s17  ;;  %v4866_v44 = vand.u32 4294901760, %v4865_v34  ;;  %v5424_v34 = vand.u32 4294901760, %v5423_v33 }
0x16dc   :  { %11160 = vmatprep.mubr.f32.mxu0 %v4866_v44  ;;  %v5418_v44 = vsub.f32 %v5416_v32, %v5417_v39  ;;  %v5425_v45 = vsub.f32 %v5423_v33, %v5424_v34  ;;  %v13438_v53 = vpack.c.bf16 %v5424_v34, %v5417_v39 }
0x16de   :  { %v5419_v47 = vand.u32 4294901760, %v5418_v44  ;;  %v5426_v48 = vand.u32 4294901760, %v5425_v45 }
0x16e0   :  { %v13424_v50 = vpack.c.bf16 %v5426_v48, %v5419_v47 }
0x174c   :  { %v4756_v4 = vpop.permute.xlu0 %4755 }
0x174d   :  { %v13389_v8 = vmul.f32 %v12697_v5, %v4756_v4 }
0x174f   :  { %v4776_v13 = vsel %vm86_vm6, %v13316_v22, %v13389_v8  ;;  %v5325_v22 = vand.u32 4294901760, %v4766_v29 }
0x1750   :  { %4787 = vrot.lane.b32.xlu0 %v4776_v13, %s12819_s18 }
0x1751   :  { %v5409_v15 = vsub.f32 %v4766_v29, %v5325_v22  ;;  %v13408_v16 = vpack.c.bf16 %v5325_v22, %v5322_v36 }
0x1753   :  { %v5410_v5 = vand.u32 4294901760, %v5409_v15  ;;  %12150 = vmatpush3.bf16.msra.mxu1 %v13408_v16  ;;  %v13418_v46 = vpack.c.bf16 %v5409_v15, %v5402_v12 }
0x1754   :  { %12151 = vmatprep.subr.bf16.mxu1 %v12815_v28 }
0x1755   :  { %v5411_v31 = vsub.f32 %v5409_v15, %v5410_v5  ;;  %v13431_v52 = vpack.c.bf16 %v5410_v5, %v5403_v19 }
0x1757   :  { %v5412_v38 = vand.u32 4294901760, %v5411_v31  ;;  %12153 = vmatpush3.bf16.msra.mxu1 %v13412_v35 }
0x1758   :  { %12160 = vmatprep.subr.bf16.mxu1 %v12815_v28 }
0x1759   :  { %v13415_v43 = vpack.c.bf16 %v5412_v38, %v5405_v37 }
0x175a   :  { %11227 = vmatmul.mubr.f32.vlgmr.msra.gmra.mrb[18].mxu1 %v12817_v11 }
0x175b   :  { %12162 = vmatpush3.bf16.msra.mxu1 %v13418_v46  ;;  %11248 = vmatprep.mubr.msk.f32.mxu1 %vm12816_vm8, %v12817_v11 }
0x175c   :  { %12163 = vmatprep.subr.bf16.mxu1 %v12815_v28 }
0x175f   :  { %12165 = vmatpush3.bf16.msra.mxu1 %v13427_v51 }
0x1760   :  { %12172 = vmatprep.subr.bf16.mxu1 %v12815_v28 }
0x1762   :  { %11249 = vmatmul.mubr.f32.vlgmr.msra.gmra.mrb[20].mxu1 %v12817_v11 }
0x1763   :  { %12174 = vmatpush3.bf16.msra.mxu1 %v13431_v52  ;;  %11270 = vmatprep.mubr.msk.f32.mxu1 %vm12816_vm8, %v12817_v11 }
0x1764   :  { %12175 = vmatprep.subr.bf16.mxu1 %v12815_v28 }
0x1767   :  { %12177 = vmatpush3.bf16.msra.mxu1 %v13438_v53 }
0x1768   :  { %12184 = vmatprep.subr.bf16.mxu1 %v12815_v28 }
0x176a   :  { %11271 = vmatmul.mubr.f32.vlgmr.msra.gmra.mrb[22].mxu1 %v12817_v11 }
0x176b   :  { %12186 = vmatpush3.bf16.msra.mxu1 %v13408_v16  ;;  %11292 = vmatprep.mubr.msk.f32.mxu1 %vm12816_vm8, %v12817_v11 }
0x176c   :  { %12187 = vmatprep.subr.bf16.mxu1 %v12815_v28 }
0x176f   :  { %12189 = vmatpush3.bf16.msra.mxu1 %v13412_v35 }
0x1770   :  { %12190 = vmatprep.subr.bf16.mxu1 %v12815_v28 }
0x17c2   :  { %v4788_v54 = vpop.permute.xlu0 %4787 }
0x17c3   :  { %v4791_v55 = vsel %vm596_vm9, %v4788_v54, 0 }
0x17c4   :  { %v4872_v56 = vand.u32 4294901760, %v4791_v55 }
0x17c6   :  { %v4873_v57 = vsub.f32 %v4791_v55, %v4872_v56 }
0x17c8   :  { %v4874_v60 = vand.u32 4294901760, %v4873_v57 }
0x17ca   :  { %v4875_v61 = vsub.f32 %v4873_v57, %v4874_v60 }
0x17cc   :  { %v4876_v62 = vand.u32 4294901760, %v4875_v61 }
0x17ce   :  { %11161 = vmatmul.mubr.f32.vlgmr.msra.gmra.mrb[22].mxu0 %v4876_v62 }
0x17cf   :  { %12111 = vmatpush3.bf16.msra.mxu0 %v13391_v59  ;;  %11171 = vmatprep.mubr.f32.mxu0 %v13359_v40 }
0x17d0   :  { %12113 = vmatprep.subr.bf16.mxu0 %v13398_v21 }
0x17d3   :  { %12115 = vmatpush3.bf16.msra.mxu0 %v13398_v21 }
0x17d4   :  { %12117 = vmatprep.subr.bf16.mxu0 %v13400_v23 }
0x17d6   :  { %11172 = vmatmul.mubr.f32.vlgmr.msra.gmra.mrb[22].mxu0 %v4872_v56 }
0x17d7   :  { %12119 = vmatpush3.bf16.msra.mxu0 %v13400_v23  ;;  %11182 = vmatprep.mubr.f32.mxu0 %v13362_v41 }
0x17d8   :  { %12121 = vmatprep.subr.bf16.mxu0 %v13402_v24 }
0x17db   :  { %12123 = vmatpush3.bf16.msra.mxu0 %v13402_v24 }
0x17dc   :  { %12125 = vmatprep.subr.bf16.mxu0 %v13375_v49 }
0x17de   :  { %11183 = vmatmul.mubr.f32.vlgmr.msra.gmra.mrb[22].mxu0 %v4873_v57 }
0x17df   :  { %12127 = vmatpush3.bf16.msra.mxu0 %v13375_v49  ;;  %11193 = vmatprep.mubr.f32.mxu0 %v4864_v42 }
0x17e0   :  { %12129 = vmatprep.subr.bf16.mxu0 %v13385_v58 }
0x17e3   :  { %12131 = vmatpush3.bf16.msra.mxu0 %v13385_v58 }
0x17e4   :  { %12133 = vmatprep.subr.bf16.mxu0 %v13404_v25 }
0x17e6   :  { %11194 = vmatmul.mubr.f32.vlgmr.msra.gmra.mrb[22].mxu0 %v4874_v60 }
0x17e7   :  { %12135 = vmatpush3.bf16.msra.mxu0 %v13404_v25  ;;  %11204 = vmatprep.mubr.f32.mxu0 %v13359_v40 }
0x17e8   :  { %12137 = vmatprep.subr.bf16.mxu0 %v13406_v26 }
0x17eb   :  { %12139 = vmatpush3.bf16.msra.mxu0 %v13406_v26 }
0x17ec   :  { %12141 = vmatprep.subr.bf16.mxu0 %v13375_v49 }
0x17ee   :  { %11205 = vmatmul.mubr.f32.vlgmr.msra.gmra.mrb[22].mxu0 %v4872_v56 }
0x17ef   :  { %12143 = vmatpush3.bf16.msra.mxu0 %v13375_v49  ;;  %11215 = vmatprep.mubr.f32.mxu0 %v13359_v40 }
0x17f0   :  { %12145 = vmatprep.subr.bf16.mxu0 %v13385_v58 }
0x17f3   :  { %12147 = vmatpush3.bf16.msra.mxu0 %v13385_v58 }
0x17f4   :  { %12154 = vmatprep.subr.bf16.mxu0 %v12815_v28 }
0x17f6   :  { %11216 = vmatmul.mubr.f32.vlgmr.msra.gmra.mrb[22].mxu0 %v4872_v56 }
0x17f7   :  { %12156 = vmatpush3.bf16.msra.mxu0 %v13415_v43  ;;  %11237 = vmatprep.mubr.msk.f32.mxu0 %vm12816_vm8, %v12817_v11 }
0x17f8   :  { %12157 = vmatprep.subr.bf16.mxu0 %v12815_v28 }
0x17fb   :  { %12159 = vmatpush3.bf16.msra.mxu0 %v13424_v50 }
0x17fc   :  { %12166 = vmatprep.subr.bf16.mxu0 %v12815_v28 }
0x17fe   :  { %11238 = vmatmul.mubr.f32.vlgmr.msra.gmra.mrb[24].mxu0 %v12817_v11 }
0x17ff   :  { %12168 = vmatpush3.bf16.msra.mxu0 %v13408_v16  ;;  %11259 = vmatprep.mubr.msk.f32.mxu0 %vm12816_vm8, %v12817_v11 }
0x1800   :  { %12169 = vmatprep.subr.bf16.mxu0 %v12815_v28 }
0x1803   :  { %12171 = vmatpush3.bf16.msra.mxu0 %v13412_v35 }
0x1804   :  { %12178 = vmatprep.subr.bf16.mxu0 %v12815_v28 }
0x1806   :  { %11260 = vmatmul.mubr.f32.vlgmr.msra.gmra.mrb[26].mxu0 %v12817_v11 }
0x1807   :  { %12180 = vmatpush3.bf16.msra.mxu0 %v13408_v16  ;;  %11281 = vmatprep.mubr.msk.f32.mxu0 %vm12816_vm8, %v12817_v11 }
0x1808   :  { %12181 = vmatprep.subr.bf16.mxu0 %v12815_v28 }
0x180b   :  { %12183 = vmatpush3.bf16.msra.mxu0 %v13412_v35 }
0x180c   :  { %12220 = vmatprep.subr.bf16.mxu0 %v12815_v28 }
0x180e   :  { %11282 = vmatmul.mubr.f32.vlgmr.msra.gmra.mrb[28].mxu0 %v12817_v11 }
0x180f   :  { %12222 = vmatpush3.bf16.msra.mxu0 %v13408_v16  ;;  %11358 = vmatprep.mubr.msk.f32.mxu0 %vm12816_vm8, %v12817_v11 }
0x1810   :  { %12223 = vmatprep.subr.bf16.mxu0 %v12815_v28 }
0x1813   :  { %12225 = vmatpush3.bf16.msra.mxu0 %v13412_v35 }
0x1814   :  { %12226 = vmatprep.subr.bf16.mxu0 %v12815_v28 }
0x182d   :  { %v5396_v40 = vpop.f32.mrb[18].mxu1 }
0x182e   :  { %v11228_v41 = vpop.f32.mrb[19].mxu1 }
0x1835   :  { %v5567_v42 = vpop.f32.mrb[20].mxu1 }
0x1836   :  { %v11250_v49 = vpop.f32.mrb[21].mxu1 }
0x183d   :  { %v5727_v58 = vpop.f32.mrb[22].mxu1 }
0x183e   :  { %v11272_v0 = vpop.f32.mrb[23].mxu1 }
0x18c9   :  { %v11217_v2 = vpop.f32.mrb[22].mxu0 }
0x18ca   :  { %v13506_v3 = vadd.f32 %v11217_v2, %v10020_v1  ;;  %v5311_v4 = vpop.f32.mrb[23].mxu0 }
0x18cb   :  { %v13508_v24 = vadd.f32 %v10020_v1, %v5311_v4 }
0x18d1   :  { %v5487_v6 = vpop.f32.mrb[24].mxu0 }
0x18d2   :  { %v5488_v59 = vadd.f32 %v5487_v6, %v5396_v40  ;;  %v11239_v9 = vpop.f32.mrb[25].mxu0 }
0x18d4   :  { %v5568_v10 = vadd.f32 %v5567_v42, %v5488_v59 }
0x18d9   :  { %v5644_v13 = vpop.f32.mrb[26].mxu0 }
0x18da   :  { %v5645_v14 = vadd.f32 %v5644_v13, %v5568_v10  ;;  %v11261_v20 = vpop.f32.mrb[27].mxu0 }
0x18dc   :  { %v5728_v21 = vadd.f32 %v5727_v58, %v5645_v14 }
0x18e1   :  { %v5802_v23 = vpop.f32.mrb[28].mxu0 }
0x18e2   :  { %v5803_v25 = vadd.f32 %v5802_v23, %v5728_v21  ;;  %v11283_v26 = vpop.f32.mrb[29].mxu0 }
0x18e4   :  { %v5806_v27 = vadd.f32 %v13508_v24, %v5803_v25 }
0x18e6   :  { %12700 = vtanh.f32 %v5806_v27  ;;  %v10021_v36 = vmul.f32 -1.442695, %v5806_v27 }
0x18e8   :  { %12702 = vpow2.f32 %v10021_v36 }
0x18f0   :  { %v12701_v29 = vpop.eup %12700 }
0x18f1   :  { %5816 = vrot.lane.b32.xlu1 %v12701_v29, %s12818_s17 }
0x18f2   :  { %v12703_v22 = vpop.eup %12702 }
0x18f3   :  { %v5810_v12 = vadd.f32 1.0, %v12703_v22 }
0x18f5   :  { %12704 = vrcp.f32 %v5810_v12 }
0x18ff   :  { %v12705_v15 = vpop.eup %12704 }
0x1900   :  { %v5814_v18 = vmul.f32 0.0, %v12705_v15 }
0x1963   :  { %v5817_v17 = vpop.permute.xlu1 %5816 }
0x1964   :  { %v5819_v63 = vmul.f32 %v12705_v15, %v5817_v17 }
0x1966   :  { %5821 = vrot.lane.b32.xlu0 %v5819_v63, %s12819_s18 }
0x19d8   :  { %v5822_v7 = vpop.permute.xlu0 %5821 }
0x19d9   :  { %v13513_v19 = vadd.f32 %v5822_v7, %v5814_v18 }
0x19db   :  { %12706 = vtanh.f32 %v13513_v19  ;;  %v6333_v41 = vrot.slane %v13513_v19, 6 }
0x19e5   :  { %v12707_v5 = vpop.eup %12706 }
0x19e6   :  { %5827 = vrot.lane.b32.xlu1 %v12707_v5, %s12818_s17 }
0x1a58   :  { %v5828_v30 = vpop.permute.xlu1 %5827 }
0x1a59   :  { %v5830_v31 = vmul.f32 %v12705_v15, %v5828_v30 }
0x1a5b   :  { %5832 = vrot.lane.b32.xlu0 %v5830_v31, %s12819_s18 }
0x1acd   :  { %v5833_v32 = vpop.permute.xlu0 %5832 }
0x1ace   :  { %v5834_v33 = vsel %vm596_vm9, %v5833_v32, 0 }
0x1acf   :  { %v5905_v37 = vand.u32 4294901760, %v5834_v33 }
0x1ad1   :  { %v5906_v38 = vsub.f32 %v5834_v33, %v5905_v37 }
0x1ad3   :  { %v5907_v39 = vand.u32 4294901760, %v5906_v38 }
0x1ad5   :  { %v5908_v34 = vsub.f32 %v5906_v38, %v5907_v39 }
0x1ad7   :  { %v5909_v44 = vand.u32 4294901760, %v5908_v34 }
0x1ad9   :  { %11293 = vmatmul.mubr.f32.vlgmr.msra.gmra.mrb[24].mxu1 %v5909_v44 }
0x1ada   :  { %12192 = vmatpush3.bf16.msra.mxu1 %v13415_v43  ;;  %11303 = vmatprep.mubr.msk.f32.mxu1 %vm12816_vm8, %v12817_v11 }
0x1adb   :  { %12193 = vmatprep.subr.bf16.mxu1 %v12815_v28 }
0x1ade   :  { %12195 = vmatpush3.bf16.msra.mxu1 %v13424_v50 }
0x1adf   :  { %12196 = vmatprep.subr.bf16.mxu1 %v12815_v28 }
0x1ae1   :  { %11304 = vmatmul.mubr.f32.vlgmr.msra.gmra.mrb[24].mxu1 %v5905_v37 }
0x1ae2   :  { %12198 = vmatpush3.bf16.msra.mxu1 %v13418_v46  ;;  %11314 = vmatprep.mubr.msk.f32.mxu1 %vm12816_vm8, %v12817_v11 }
0x1ae3   :  { %12199 = vmatprep.subr.bf16.mxu1 %v12815_v28 }
0x1ae6   :  { %12201 = vmatpush3.bf16.msra.mxu1 %v13427_v51 }
0x1ae7   :  { %12202 = vmatprep.subr.bf16.mxu1 %v12815_v28 }
0x1ae9   :  { %11315 = vmatmul.mubr.f32.vlgmr.msra.gmra.mrb[24].mxu1 %v5906_v38 }
0x1aea   :  { %12204 = vmatpush3.bf16.msra.mxu1 %v13408_v16  ;;  %11325 = vmatprep.mubr.msk.f32.mxu1 %vm12816_vm8, %v12817_v11 }
0x1aeb   :  { %12205 = vmatprep.subr.bf16.mxu1 %v12815_v28 }
0x1aee   :  { %12207 = vmatpush3.bf16.msra.mxu1 %v13412_v35 }
0x1aef   :  { %12208 = vmatprep.subr.bf16.mxu1 %v12815_v28 }
0x1af1   :  { %11326 = vmatmul.mubr.f32.vlgmr.msra.gmra.mrb[24].mxu1 %v5907_v39 }
0x1af2   :  { %12210 = vmatpush3.bf16.msra.mxu1 %v13431_v52  ;;  %11336 = vmatprep.mubr.msk.f32.mxu1 %vm12816_vm8, %v12817_v11 }
0x1af3   :  { %12211 = vmatprep.subr.bf16.mxu1 %v12815_v28 }
0x1af6   :  { %12213 = vmatpush3.bf16.msra.mxu1 %v13438_v53 }
0x1af7   :  { %12214 = vmatprep.subr.bf16.mxu1 %v12815_v28 }
0x1af9   :  { %11337 = vmatmul.mubr.f32.vlgmr.msra.gmra.mrb[24].mxu1 %v5905_v37 }
0x1afa   :  { %12216 = vmatpush3.bf16.msra.mxu1 %v13408_v16  ;;  %11347 = vmatprep.mubr.msk.f32.mxu1 %vm12816_vm8, %v12817_v11 }
0x1afb   :  { %12217 = vmatprep.subr.bf16.mxu1 %v12815_v28 }
0x1afe   :  { %12219 = vmatpush3.bf16.msra.mxu1 %v13412_v35 }
0x1aff   :  { %12256 = vmatprep.subr.bf16.mxu1 %v12815_v28 }
0x1b01   :  { %11348 = vmatmul.mubr.f32.vlgmr.msra.gmra.mrb[24].mxu1 %v5905_v37 }
0x1b02   :  { %12258 = vmatpush3.bf16.msra.mxu1 %v13408_v16  ;;  %11424 = vmatprep.mubr.msk.f32.mxu1 %vm12816_vm8, %v12817_v11 }
0x1b03   :  { %12259 = vmatprep.subr.bf16.mxu1 %v12815_v28 }
0x1b06   :  { %12261 = vmatpush3.bf16.msra.mxu1 %v13412_v35 }
0x1b07   :  { %12262 = vmatprep.subr.bf16.mxu1 %v12815_v28 }
0x1bd4   :  { %v6317_v45 = vpop.f32.mrb[24].mxu1 }
0x1bd5   :  { %v6322_v47 = vrot.slane %v6317_v45, 6  ;;  %v11349_v48 = vpop.f32.mrb[25].mxu1 }
0x1bd7   :  { %v6324_v54 = vadd.f32 %v13508_v24, %v6322_v47 }
0x1bd9   :  { %12708 = vtanh.f32 %v6324_v54  ;;  %v10022_v56 = vmul.f32 -1.442695, %v6324_v54 }
0x1bdb   :  { %12710 = vpow2.f32 %v10022_v56 }
0x1be3   :  { %v12709_v55 = vpop.eup %12708 }
0x1be4   :  { %6337 = vrot.lane.b32.xlu1 %v12709_v55, %s12818_s17 }
0x1be5   :  { %v12711_v57 = vpop.eup %12710 }
0x1be6   :  { %v6328_v60 = vadd.f32 1.0, %v12711_v57 }
0x1be8   :  { %12712 = vrcp.f32 %v6328_v60 }
0x1bf2   :  { %v12713_v61 = vpop.eup %12712 }
0x1bf3   :  { %v6335_v42 = vmul.f32 %v12713_v61, %v6333_v41 }
0x1c56   :  { %v6338_v62 = vpop.permute.xlu1 %6337 }
0x1c57   :  { %v6340_v40 = vmul.f32 %v12713_v61, %v6338_v62 }
0x1c59   :  { %6342 = vrot.lane.b32.xlu0 %v6340_v40, %s12819_s18 }
0x1ccb   :  { %v6343_v49 = vpop.permute.xlu0 %6342 }
0x1ccc   :  { %v13559_v58 = vadd.f32 %v6343_v49, %v6335_v42 }
0x1cce   :  { %12714 = vtanh.f32 %v13559_v58  ;;  %v6855_v63 = vrot.slane %v13559_v58, 6 }
0x1cd8   :  { %v12715_v0 = vpop.eup %12714 }
0x1cd9   :  { %6348 = vrot.lane.b32.xlu1 %v12715_v0, %s12818_s17 }
0x1d4b   :  { %v6349_v1 = vpop.permute.xlu1 %6348 }
0x1d4c   :  { %v6351_v2 = vmul.f32 %v12713_v61, %v6349_v1 }
0x1d4e   :  { %v6353_v4 = vrot.slane %v6351_v2, 2 }
0x1d50   :  { %6354 = vrot.lane.b32.xlu0 %v6353_v4, %s12819_s18 }
0x1dc2   :  { %v6355_v6 = vpop.permute.xlu0 %6354 }
0x1dc3   :  { %v6356_v59 = vsel %vm596_vm9, %v6355_v6, 0 }
0x1dc4   :  { %v6427_v9 = vand.u32 4294901760, %v6356_v59 }
0x1dc6   :  { %v6428_v10 = vsub.f32 %v6356_v59, %v6427_v9 }
0x1dc8   :  { %v6429_v13 = vand.u32 4294901760, %v6428_v10 }
0x1dca   :  { %v6430_v14 = vsub.f32 %v6428_v10, %v6429_v13 }
0x1dcc   :  { %v6431_v20 = vand.u32 4294901760, %v6430_v14 }
0x1dce   :  { %11359 = vmatmul.mubr.f32.vlgmr.msra.gmra.mrb[30].mxu0 %v6431_v20 }
0x1dcf   :  { %12228 = vmatpush3.bf16.msra.mxu0 %v13415_v43  ;;  %11369 = vmatprep.mubr.msk.f32.mxu0 %vm12816_vm8, %v12817_v11 }
0x1dd0   :  { %12229 = vmatprep.subr.bf16.mxu0 %v12815_v28 }
0x1dd3   :  { %12231 = vmatpush3.bf16.msra.mxu0 %v13424_v50 }
0x1dd4   :  { %12232 = vmatprep.subr.bf16.mxu0 %v12815_v28 }
0x1dd6   :  { %11370 = vmatmul.mubr.f32.vlgmr.msra.gmra.mrb[30].mxu0 %v6427_v9 }
0x1dd7   :  { %12234 = vmatpush3.bf16.msra.mxu0 %v13418_v46  ;;  %11380 = vmatprep.mubr.msk.f32.mxu0 %vm12816_vm8, %v12817_v11 }
0x1dd8   :  { %12235 = vmatprep.subr.bf16.mxu0 %v12815_v28 }
0x1ddb   :  { %12237 = vmatpush3.bf16.msra.mxu0 %v13427_v51 }
0x1ddc   :  { %12238 = vmatprep.subr.bf16.mxu0 %v12815_v28 }
0x1dde   :  { %11381 = vmatmul.mubr.f32.vlgmr.msra.gmra.mrb[30].mxu0 %v6428_v10 }
0x1ddf   :  { %12240 = vmatpush3.bf16.msra.mxu0 %v13408_v16  ;;  %11391 = vmatprep.mubr.msk.f32.mxu0 %vm12816_vm8, %v12817_v11 }
0x1de0   :  { %12241 = vmatprep.subr.bf16.mxu0 %v12815_v28 }
0x1de3   :  { %12243 = vmatpush3.bf16.msra.mxu0 %v13412_v35 }
0x1de4   :  { %12244 = vmatprep.subr.bf16.mxu0 %v12815_v28 }
0x1de6   :  { %11392 = vmatmul.mubr.f32.vlgmr.msra.gmra.mrb[30].mxu0 %v6429_v13 }
0x1de7   :  { %12246 = vmatpush3.bf16.msra.mxu0 %v13431_v52  ;;  %11402 = vmatprep.mubr.msk.f32.mxu0 %vm12816_vm8, %v12817_v11 }
0x1de8   :  { %12247 = vmatprep.subr.bf16.mxu0 %v12815_v28 }
0x1deb   :  { %12249 = vmatpush3.bf16.msra.mxu0 %v13438_v53 }
0x1dec   :  { %12250 = vmatprep.subr.bf16.mxu0 %v12815_v28 }
0x1dee   :  { %11403 = vmatmul.mubr.f32.vlgmr.msra.gmra.mrb[30].mxu0 %v6427_v9 }
0x1def   :  { %12252 = vmatpush3.bf16.msra.mxu0 %v13408_v16  ;;  %11413 = vmatprep.mubr.msk.f32.mxu0 %vm12816_vm8, %v12817_v11 }
0x1df0   :  { %12253 = vmatprep.subr.bf16.mxu0 %v12815_v28 }
0x1df3   :  { %12255 = vmatpush3.bf16.msra.mxu0 %v13412_v35 }
0x1df4   :  { %12292 = vmatprep.subr.bf16.mxu0 %v12815_v28 }
0x1df6   :  { %11414 = vmatmul.mubr.f32.vlgmr.msra.gmra.mrb[30].mxu0 %v6427_v9 }
0x1df7   :  { %12294 = vmatpush3.bf16.msra.mxu0 %v13408_v16  ;;  %11490 = vmatprep.mubr.msk.f32.mxu0 %vm12816_vm8, %v12817_v11 }
0x1df8   :  { %12295 = vmatprep.subr.bf16.mxu0 %v12815_v28 }
0x1dfb   :  { %12297 = vmatpush3.bf16.msra.mxu0 %v13412_v35 }
0x1dfc   :  { %12298 = vmatprep.subr.bf16.mxu0 %v12815_v28 }
0x1ec9   :  { %v6839_v21 = vpop.f32.mrb[30].mxu0 }
0x1eca   :  { %v6844_v23 = vrot.slane %v6839_v21, 4  ;;  %v11415_v25 = vpop.f32.mrb[31].mxu0 }
0x1ecc   :  { %v6846_v26 = vadd.f32 %v13508_v24, %v6844_v23 }
0x1ece   :  { %12716 = vtanh.f32 %v6846_v26  ;;  %v10023_v29 = vmul.f32 -1.442695, %v6846_v26 }
0x1ed0   :  { %12718 = vpow2.f32 %v10023_v29 }
0x1ed8   :  { %v12717_v27 = vpop.eup %12716 }
0x1ed9   :  { %6859 = vrot.lane.b32.xlu1 %v12717_v27, %s12818_s17 }
0x1eda   :  { %v12719_v36 = vpop.eup %12718 }
0x1edb   :  { %v6850_v22 = vadd.f32 1.0, %v12719_v36 }
0x1edd   :  { %12720 = vrcp.f32 %v6850_v22 }
0x1ee7   :  { %v12721_v12 = vpop.eup %12720 }
0x1ee8   :  { %v6857_v18 = vmul.f32 %v12721_v12, %v6855_v63 }
0x1f4b   :  { %v6860_v15 = vpop.permute.xlu1 %6859 }
0x1f4c   :  { %v6862_v17 = vmul.f32 %v12721_v12, %v6860_v15 }
0x1f4e   :  { %6864 = vrot.lane.b32.xlu0 %v6862_v17, %s12819_s18 }
0x1fc0   :  { %v6865_v7 = vpop.permute.xlu0 %6864 }
0x1fc1   :  { %v13605_v19 = vadd.f32 %v6865_v7, %v6857_v18 }
0x1fc3   :  { %12722 = vtanh.f32 %v13605_v19  ;;  %v7377_v42 = vrot.slane %v13605_v19, 6 }
0x1fcd   :  { %v12723_v5 = vpop.eup %12722 }
0x1fce   :  { %6870 = vrot.lane.b32.xlu1 %v12723_v5, %s12818_s17 }
0x2040   :  { %v6871_v30 = vpop.permute.xlu1 %6870 }
0x2041   :  { %v6873_v31 = vmul.f32 %v12721_v12, %v6871_v30 }
0x2043   :  { %v6875_v32 = vrot.slane %v6873_v31, 4 }
0x2045   :  { %6876 = vrot.lane.b32.xlu0 %v6875_v32, %s12819_s18 }
0x20b7   :  { %v6877_v33 = vpop.permute.xlu0 %6876 }
0x20b8   :  { %v6878_v37 = vsel %vm596_vm9, %v6877_v33, 0 }
0x20b9   :  { %v6949_v38 = vand.u32 4294901760, %v6878_v37 }
0x20bb   :  { %v6950_v39 = vsub.f32 %v6878_v37, %v6949_v38 }
0x20bd   :  { %v6951_v34 = vand.u32 4294901760, %v6950_v39 }
0x20bf   :  { %v6952_v44 = vsub.f32 %v6950_v39, %v6951_v34 }
0x20c1   :  { %v6953_v45 = vand.u32 4294901760, %v6952_v44 }
0x20c3   :  { %11425 = vmatmul.mubr.f32.vlgmr.msra.gmra.mrb[26].mxu1 %v6953_v45 }
0x20c4   :  { %12264 = vmatpush3.bf16.msra.mxu1 %v13415_v43  ;;  %11435 = vmatprep.mubr.msk.f32.mxu1 %vm12816_vm8, %v12817_v11 }
0x20c5   :  { %12265 = vmatprep.subr.bf16.mxu1 %v12815_v28 }
0x20c8   :  { %12267 = vmatpush3.bf16.msra.mxu1 %v13424_v50 }
0x20c9   :  { %12268 = vmatprep.subr.bf16.mxu1 %v12815_v28 }
0x20cb   :  { %11436 = vmatmul.mubr.f32.vlgmr.msra.gmra.mrb[26].mxu1 %v6949_v38 }
0x20cc   :  { %12270 = vmatpush3.bf16.msra.mxu1 %v13418_v46  ;;  %11446 = vmatprep.mubr.msk.f32.mxu1 %vm12816_vm8, %v12817_v11 }
0x20cd   :  { %12271 = vmatprep.subr.bf16.mxu1 %v12815_v28 }
0x20d0   :  { %12273 = vmatpush3.bf16.msra.mxu1 %v13427_v51 }
0x20d1   :  { %12274 = vmatprep.subr.bf16.mxu1 %v12815_v28 }
0x20d3   :  { %11447 = vmatmul.mubr.f32.vlgmr.msra.gmra.mrb[26].mxu1 %v6950_v39 }
0x20d4   :  { %12276 = vmatpush3.bf16.msra.mxu1 %v13408_v16  ;;  %11457 = vmatprep.mubr.msk.f32.mxu1 %vm12816_vm8, %v12817_v11 }
0x20d5   :  { %12277 = vmatprep.subr.bf16.mxu1 %v12815_v28 }
0x20d8   :  { %12279 = vmatpush3.bf16.msra.mxu1 %v13412_v35 }
0x20d9   :  { %12280 = vmatprep.subr.bf16.mxu1 %v12815_v28 }
0x20db   :  { %11458 = vmatmul.mubr.f32.vlgmr.msra.gmra.mrb[26].mxu1 %v6951_v34 }
0x20dc   :  { %12282 = vmatpush3.bf16.msra.mxu1 %v13431_v52  ;;  %11468 = vmatprep.mubr.msk.f32.mxu1 %vm12816_vm8, %v12817_v11 }
0x20dd   :  { %12283 = vmatprep.subr.bf16.mxu1 %v12815_v28 }
0x20e0   :  { %12285 = vmatpush3.bf16.msra.mxu1 %v13438_v53 }
0x20e1   :  { %12286 = vmatprep.subr.bf16.mxu1 %v12815_v28 }
0x20e3   :  { %11469 = vmatmul.mubr.f32.vlgmr.msra.gmra.mrb[26].mxu1 %v6949_v38 }
0x20e4   :  { %12288 = vmatpush3.bf16.msra.mxu1 %v13408_v16  ;;  %11479 = vmatprep.mubr.msk.f32.mxu1 %vm12816_vm8, %v12817_v11 }
0x20e5   :  { %12289 = vmatprep.subr.bf16.mxu1 %v12815_v28 }
0x20e8   :  { %12291 = vmatpush3.bf16.msra.mxu1 %v13412_v35 }
0x20e9   :  { %12328 = vmatprep.subr.bf16.mxu1 %v12815_v28 }
0x20eb   :  { %11480 = vmatmul.mubr.f32.vlgmr.msra.gmra.mrb[26].mxu1 %v6949_v38 }
0x20ec   :  { %12330 = vmatpush3.bf16.msra.mxu1 %v13408_v16  ;;  %11556 = vmatprep.mubr.msk.f32.mxu1 %vm12816_vm8, %v12817_v11 }
0x20ed   :  { %12331 = vmatprep.subr.bf16.mxu1 %v12815_v28 }
0x20f0   :  { %12333 = vmatpush3.bf16.msra.mxu1 %v13412_v35 }
0x20f1   :  { %12334 = vmatprep.subr.bf16.mxu1 %v12815_v28 }
0x21be   :  { %v7361_v47 = vpop.f32.mrb[26].mxu1 }
0x21bf   :  { %v7366_v48 = vrot.slane %v7361_v47, 2  ;;  %v11481_v54 = vpop.f32.mrb[27].mxu1 }
0x21c1   :  { %v7368_v55 = vadd.f32 %v13508_v24, %v7366_v48 }
0x21c3   :  { %12724 = vtanh.f32 %v7368_v55  ;;  %v10024_v57 = vmul.f32 -1.442695, %v7368_v55 }
0x21c5   :  { %12726 = vpow2.f32 %v10024_v57 }
0x21cd   :  { %v12725_v56 = vpop.eup %12724 }
0x21ce   :  { %7381 = vrot.lane.b32.xlu1 %v12725_v56, %s12818_s17 }
0x21cf   :  { %v12727_v60 = vpop.eup %12726 }
0x21d0   :  { %v7372_v61 = vadd.f32 1.0, %v12727_v60 }
0x21d2   :  { %12728 = vrcp.f32 %v7372_v61 }
0x21dc   :  { %v12729_v62 = vpop.eup %12728 }
0x21dd   :  { %v7379_v49 = vmul.f32 %v12729_v62, %v7377_v42 }
0x2240   :  { %v7382_v40 = vpop.permute.xlu1 %7381 }
0x2241   :  { %v7384_v41 = vmul.f32 %v12729_v62, %v7382_v40 }
0x2243   :  { %7386 = vrot.lane.b32.xlu0 %v7384_v41, %s12819_s18 }
0x22b5   :  { %v7387_v58 = vpop.permute.xlu0 %7386 }
0x22b6   :  { %v13651_v0 = vadd.f32 %v7387_v58, %v7379_v49 }
0x22b8   :  { %12730 = vtanh.f32 %v13651_v0  ;;  %v7896_v45 = vrot.slane %v13651_v0, 6 }
0x22c2   :  { %v12731_v24 = vpop.eup %12730 }
0x22c3   :  { %7392 = vrot.lane.b32.xlu1 %v12731_v24, %s12818_s17 }
0x2335   :  { %v7393_v1 = vpop.permute.xlu1 %7392 }
0x2336   :  { %v7395_v2 = vmul.f32 %v12729_v62, %v7393_v1 }
0x2338   :  { %v7397_v4 = vrot.slane %v7395_v2, 6 }
0x233a   :  { %7398 = vrot.lane.b32.xlu0 %v7397_v4, %s12819_s18 }
0x23ac   :  { %v7399_v6 = vpop.permute.xlu0 %7398 }
0x23ad   :  { %v7400_v59 = vsel %vm596_vm9, %v7399_v6, 0 }
0x23ae   :  { %v7471_v9 = vand.u32 4294901760, %v7400_v59 }
0x23b0   :  { %v7472_v10 = vsub.f32 %v7400_v59, %v7471_v9 }
0x23b2   :  { %v7473_v13 = vand.u32 4294901760, %v7472_v10 }
0x23b4   :  { %v7474_v14 = vsub.f32 %v7472_v10, %v7473_v13 }
0x23b6   :  { %v7475_v20 = vand.u32 4294901760, %v7474_v14 }
0x23b8   :  { %11491 = vmatmul.mubr.f32.vlgmr.msra.gmra.mrb[32].mxu0 %v7475_v20 }
0x23b9   :  { %12300 = vmatpush3.bf16.msra.mxu0 %v13415_v43  ;;  %11501 = vmatprep.mubr.msk.f32.mxu0 %vm12816_vm8, %v12817_v11 }
0x23ba   :  { %12301 = vmatprep.subr.bf16.mxu0 %v12815_v28 }
0x23bd   :  { %12303 = vmatpush3.bf16.msra.mxu0 %v13424_v50 }
0x23be   :  { %12304 = vmatprep.subr.bf16.mxu0 %v12815_v28 }
0x23c0   :  { %11502 = vmatmul.mubr.f32.vlgmr.msra.gmra.mrb[34].mxu0 %v7471_v9 }
0x23c1   :  { %12306 = vmatpush3.bf16.msra.mxu0 %v13418_v46  ;;  %11512 = vmatprep.mubr.msk.f32.mxu0 %vm12816_vm8, %v12817_v11 }
0x23c2   :  { %12307 = vmatprep.subr.bf16.mxu0 %v12815_v28 }
0x23c5   :  { %12309 = vmatpush3.bf16.msra.mxu0 %v13427_v51 }
0x23c6   :  { %12310 = vmatprep.subr.bf16.mxu0 %v12815_v28 }
0x23c8   :  { %11513 = vmatmul.mubr.f32.vlgmr.msra.gmra.mrb[36].mxu0 %v7472_v10 }
0x23c9   :  { %12312 = vmatpush3.bf16.msra.mxu0 %v13408_v16  ;;  %11523 = vmatprep.mubr.msk.f32.mxu0 %vm12816_vm8, %v12817_v11 }
0x23ca   :  { %12313 = vmatprep.subr.bf16.mxu0 %v12815_v28 }
0x23cd   :  { %12315 = vmatpush3.bf16.msra.mxu0 %v13412_v35 }
0x23ce   :  { %12316 = vmatprep.subr.bf16.mxu0 %v12815_v28 }
0x23d0   :  { %11524 = vmatmul.mubr.f32.vlgmr.msra.gmra.mrb[38].mxu0 %v7473_v13 }
0x23d1   :  { %12318 = vmatpush3.bf16.msra.mxu0 %v13431_v52  ;;  %11534 = vmatprep.mubr.msk.f32.mxu0 %vm12816_vm8, %v12817_v11 }
0x23d2   :  { %12319 = vmatprep.subr.bf16.mxu0 %v12815_v28 }
0x23d5   :  { %12321 = vmatpush3.bf16.msra.mxu0 %v13438_v53 }
0x23d6   :  { %12322 = vmatprep.subr.bf16.mxu0 %v12815_v28 }
0x23d8   :  { %11535 = vmatmul.mubr.f32.vlgmr.msra.gmra.mrb[40].mxu0 %v7471_v9 }
0x23d9   :  { %12324 = vmatpush3.bf16.msra.mxu0 %v13408_v16  ;;  %11545 = vmatprep.mubr.msk.f32.mxu0 %vm12816_vm8, %v12817_v11 }
0x23da   :  { %12325 = vmatprep.subr.bf16.mxu0 %v12815_v28 }
0x23dd   :  { %12327 = vmatpush3.bf16.msra.mxu0 %v13412_v35 }
0x23de   :  { %12364 = vmatprep.subr.bf16.mxu0 %v12815_v28 }
0x23e0   :  { %11546 = vmatmul.mubr.f32.vlgmr.msra.gmra.mrb[42].mxu0 %v7471_v9 }
0x23e1   :  { %12366 = vmatpush3.bf16.msra.mxu0 %v13408_v16  ;;  %11622 = vmatprep.mubr.msk.f32.mxu0 %vm12816_vm8, %v12817_v11 }
0x23e2   :  { %12367 = vmatprep.subr.bf16.mxu0 %v12815_v28 }
0x23e5   :  { %12369 = vmatpush3.bf16.msra.mxu0 %v13412_v35 }
0x23e6   :  { %12370 = vmatprep.subr.bf16.mxu0 %v12815_v28 }
0x248b   :  { %v7477_v21 = vpop.f32.mrb[32].mxu0 }
0x248c   :  { %v11492_v23 = vpop.f32.mrb[33].mxu0 }
0x2493   :  { %v7568_v25 = vpop.f32.mrb[34].mxu0 }
0x2494   :  { %v7569_v26 = vadd.f32 %v7568_v25, %v7477_v21  ;;  %v11503_v27 = vpop.f32.mrb[35].mxu0 }
0x249b   :  { %v7648_v29 = vpop.f32.mrb[36].mxu0 }
0x249c   :  { %v7649_v36 = vadd.f32 %v7648_v29, %v7569_v26  ;;  %v11514_v22 = vpop.f32.mrb[37].mxu0 }
0x24a3   :  { %v7725_v12 = vpop.f32.mrb[38].mxu0 }
0x24a4   :  { %v7726_v15 = vadd.f32 %v7725_v12, %v7649_v36  ;;  %v11525_v17 = vpop.f32.mrb[39].mxu0 }
0x24ab   :  { %v7808_v63 = vpop.f32.mrb[40].mxu0 }
0x24ac   :  { %v7809_v18 = vadd.f32 %v7808_v63, %v7726_v15  ;;  %v11536_v7 = vpop.f32.mrb[41].mxu0 }
0x24b3   :  { %v7883_v19 = vpop.f32.mrb[42].mxu0 }
0x24b4   :  { %v7884_v5 = vadd.f32 %v7883_v19, %v7809_v18  ;;  %v11547_v30 = vpop.f32.mrb[43].mxu0 }
0x24b6   :  { %v7887_v31 = vadd.f32 %v13506_v3, %v7884_v5 }
0x24b8   :  { %12732 = vtanh.f32 %v7887_v31  ;;  %v10025_v33 = vmul.f32 -1.442695, %v7887_v31 }
0x24ba   :  { %12734 = vpow2.f32 %v10025_v33 }
0x24c2   :  { %v12733_v32 = vpop.eup %12732 }
0x24c3   :  { %7900 = vrot.lane.b32.xlu1 %v12733_v32, %s12818_s17 }
0x24c4   :  { %v12735_v37 = vpop.eup %12734 }
0x24c5   :  { %v7891_v38 = vadd.f32 1.0, %v12735_v37 }
0x24c7   :  { %12736 = vrcp.f32 %v7891_v38 }
0x24d1   :  { %v12737_v39 = vpop.eup %12736 }
0x24d2   :  { %v7898_v47 = vmul.f32 %v12737_v39, %v7896_v45 }
0x2535   :  { %v7901_v34 = vpop.permute.xlu1 %7900 }
0x2536   :  { %v7903_v44 = vmul.f32 %v12737_v39, %v7901_v34 }
0x2538   :  { %7905 = vrot.lane.b32.xlu0 %v7903_v44, %s12819_s18 }
0x25aa   :  { %v7906_v48 = vpop.permute.xlu0 %7905 }
0x25ab   :  { %v13697_v54 = vadd.f32 %v7906_v48, %v7898_v47 }
0x25ad   :  { %12738 = vtanh.f32 %v13697_v54  ;;  %v8417_v14 = vrot.slane %v13697_v54, 6 }
0x25b7   :  { %v12739_v55 = vpop.eup %12738 }
0x25b8   :  { %7911 = vrot.lane.b32.xlu1 %v12739_v55, %s12818_s17 }
0x262a   :  { %v7912_v56 = vpop.permute.xlu1 %7911 }
0x262b   :  { %v7914_v57 = vmul.f32 %v12737_v39, %v7912_v56 }
0x262d   :  { %7916 = vrot.lane.b32.xlu0 %v7914_v57, %s12819_s18 }
0x269f   :  { %v7917_v60 = vpop.permute.xlu0 %7916 }
0x26a0   :  { %v7918_v61 = vsel %vm596_vm9, %v7917_v60, 0 }
0x26a1   :  { %v7989_v62 = vand.u32 4294901760, %v7918_v61 }
0x26a3   :  { %v7990_v40 = vsub.f32 %v7918_v61, %v7989_v62 }
0x26a5   :  { %v7991_v41 = vand.u32 4294901760, %v7990_v40 }
0x26a7   :  { %v7992_v42 = vsub.f32 %v7990_v40, %v7991_v41 }
0x26a9   :  { %v7993_v49 = vand.u32 4294901760, %v7992_v42 }
0x26ab   :  { %11557 = vmatmul.mubr.f32.vlgmr.msra.gmra.mrb[28].mxu1 %v7993_v49 }
0x26ac   :  { %12336 = vmatpush3.bf16.msra.mxu1 %v13415_v43  ;;  %11567 = vmatprep.mubr.msk.f32.mxu1 %vm12816_vm8, %v12817_v11 }
0x26ad   :  { %12337 = vmatprep.subr.bf16.mxu1 %v12815_v28 }
0x26b0   :  { %12339 = vmatpush3.bf16.msra.mxu1 %v13424_v50 }
0x26b1   :  { %12340 = vmatprep.subr.bf16.mxu1 %v12815_v28 }
0x26b3   :  { %11568 = vmatmul.mubr.f32.vlgmr.msra.gmra.mrb[28].mxu1 %v7989_v62 }
0x26b4   :  { %12342 = vmatpush3.bf16.msra.mxu1 %v13418_v46  ;;  %11578 = vmatprep.mubr.msk.f32.mxu1 %vm12816_vm8, %v12817_v11 }
0x26b5   :  { %12343 = vmatprep.subr.bf16.mxu1 %v12815_v28 }
0x26b8   :  { %12345 = vmatpush3.bf16.msra.mxu1 %v13427_v51 }
0x26b9   :  { %12346 = vmatprep.subr.bf16.mxu1 %v12815_v28 }
0x26bb   :  { %11579 = vmatmul.mubr.f32.vlgmr.msra.gmra.mrb[28].mxu1 %v7990_v40 }
0x26bc   :  { %12348 = vmatpush3.bf16.msra.mxu1 %v13408_v16  ;;  %11589 = vmatprep.mubr.msk.f32.mxu1 %vm12816_vm8, %v12817_v11 }
0x26bd   :  { %12349 = vmatprep.subr.bf16.mxu1 %v12815_v28 }
0x26c0   :  { %12351 = vmatpush3.bf16.msra.mxu1 %v13412_v35 }
0x26c1   :  { %12352 = vmatprep.subr.bf16.mxu1 %v12815_v28 }
0x26c3   :  { %11590 = vmatmul.mubr.f32.vlgmr.msra.gmra.mrb[28].mxu1 %v7991_v41 }
0x26c4   :  { %12354 = vmatpush3.bf16.msra.mxu1 %v13431_v52  ;;  %11600 = vmatprep.mubr.msk.f32.mxu1 %vm12816_vm8, %v12817_v11 }
0x26c5   :  { %12355 = vmatprep.subr.bf16.mxu1 %v12815_v28 }
0x26c8   :  { %12357 = vmatpush3.bf16.msra.mxu1 %v13438_v53 }
0x26c9   :  { %12358 = vmatprep.subr.bf16.mxu1 %v12815_v28 }
0x26cb   :  { %11601 = vmatmul.mubr.f32.vlgmr.msra.gmra.mrb[28].mxu1 %v7989_v62 }
0x26cc   :  { %12360 = vmatpush3.bf16.msra.mxu1 %v13408_v16  ;;  %11611 = vmatprep.mubr.msk.f32.mxu1 %vm12816_vm8, %v12817_v11 }
0x26cd   :  { %12361 = vmatprep.subr.bf16.mxu1 %v12815_v28 }
0x26d0   :  { %12363 = vmatpush3.bf16.msra.mxu1 %v13412_v35 }
0x26d1   :  { %12400 = vmatprep.subr.bf16.mxu1 %v12815_v28 }
0x26d3   :  { %11612 = vmatmul.mubr.f32.vlgmr.msra.gmra.mrb[28].mxu1 %v7989_v62 }
0x26d4   :  { %12402 = vmatpush3.bf16.msra.mxu1 %v13408_v16  ;;  %11688 = vmatprep.mubr.msk.f32.mxu1 %vm12816_vm8, %v12817_v11 }
0x26d5   :  { %12403 = vmatprep.subr.bf16.mxu1 %v12815_v28 }
0x26d8   :  { %12405 = vmatpush3.bf16.msra.mxu1 %v13412_v35 }
0x26d9   :  { %12406 = vmatprep.subr.bf16.mxu1 %v12815_v28 }
0x27a6   :  { %v8401_v58 = vpop.f32.mrb[28].mxu1 }
0x27a7   :  { %v8406_v0 = vrot.slane %v8401_v58, 6  ;;  %v11613_v24 = vpop.f32.mrb[29].mxu1 }
0x27a9   :  { %v8408_v1 = vadd.f32 %v13506_v3, %v8406_v0 }
0x27ab   :  { %12740 = vtanh.f32 %v8408_v1  ;;  %v10026_v4 = vmul.f32 -1.442695, %v8408_v1 }
0x27ad   :  { %12742 = vpow2.f32 %v10026_v4 }
0x27b5   :  { %v12741_v2 = vpop.eup %12740 }
0x27b6   :  { %8421 = vrot.lane.b32.xlu1 %v12741_v2, %s12818_s17 }
0x27b7   :  { %v12743_v6 = vpop.eup %12742 }
0x27b8   :  { %v8412_v59 = vadd.f32 1.0, %v12743_v6 }
0x27ba   :  { %12744 = vrcp.f32 %v8412_v59  ;;  %v9487_v59 = vld [vmem:[%s13886_s4] sm:$0xff] }
0x27c4   :  { %v12745_v9 = vpop.eup %12744 }
0x27c5   :  { %v8419_v20 = vmul.f32 %v12745_v9, %v8417_v14 }
0x2828   :  { %v8422_v10 = vpop.permute.xlu1 %8421 }
0x2829   :  { %v8424_v13 = vmul.f32 %v12745_v9, %v8422_v10  ;;  %v9504_v10 = vand.u32 4294901760, %v9487_v59 }
0x282b   :  { %8426 = vrot.lane.b32.xlu0 %v8424_v13, %s12819_s18 }
0x289d   :  { %v8427_v21 = vpop.permute.xlu0 %8426 }
0x289e   :  { %v13743_v23 = vadd.f32 %v8427_v21, %v8419_v20  ;;  %v9584_v20 = vsub.f32 %v9487_v59, %v9504_v10 }
0x28a0   :  { %12746 = vtanh.f32 %v13743_v23  ;;  %v8939_v44 = vrot.slane %v13743_v23, 6  ;;  %v9489_v23 = vld [vmem:[%s13886_s4 + $0x10] sm:$0xff] }
0x28aa   :  { %v12747_v25 = vpop.eup %12746 }
0x28ab   :  { %8432 = vrot.lane.b32.xlu1 %v12747_v25, %s12818_s17  ;;  %v9490_v25 = vld [vmem:[%s13886_s4 + $0x18] sm:$0xff] }
0x291d   :  { %v8433_v26 = vpop.permute.xlu1 %8432 }
0x291e   :  { %v8435_v27 = vmul.f32 %v12745_v9, %v8433_v26  ;;  %v9488_v9 = vld [vmem:[%s13886_s4 + $0x8] sm:$0xff]  ;;  %v9510_v26 = vand.u32 4294901760, %v9489_v23 }
0x291f   :  { %v9507_v13 = vand.u32 4294901760, %v9488_v9 }
0x2920   :  { %v8437_v29 = vrot.slane %v8435_v27, 2  ;;  %v9513_v27 = vand.u32 4294901760, %v9490_v25 }
0x2921   :  { %v13831_v14 = vpack.c.bf16 %v9507_v13, %v9504_v10  ;;  %v9591_v21 = vsub.f32 %v9488_v9, %v9507_v13 }
0x2922   :  { %8438 = vrot.lane.b32.xlu0 %v8437_v29, %s12819_s18  ;;  %v9585_v29 = vand.u32 4294901760, %v9584_v20 }
0x2994   :  { %v8439_v36 = vpop.permute.xlu0 %8438 }
0x2995   :  { %v8440_v22 = vsel %vm596_vm9, %v8439_v36, 0  ;;  %v9592_v36 = vand.u32 4294901760, %v9591_v21 }
0x2996   :  { %v8511_v12 = vand.u32 4294901760, %v8440_v22 }
0x2998   :  { %v8512_v15 = vsub.f32 %v8440_v22, %v8511_v12  ;;  %v12440_v22 = vpack.c.bf16 %v9513_v27, %v9510_v26 }
0x299a   :  { %v8513_v17 = vand.u32 4294901760, %v8512_v15 }
0x299c   :  { %v8514_v63 = vsub.f32 %v8512_v15, %v8513_v17 }
0x299e   :  { %v8515_v18 = vand.u32 4294901760, %v8514_v63 }
0x29a0   :  { %11623 = vmatmul.mubr.f32.vlgmr.msra.gmra.mrb[44].mxu0 %v8515_v18  ;;  %v9593_v18 = vsub.f32 %v9591_v21, %v9592_v36 }
0x29a1   :  { %12372 = vmatpush3.bf16.msra.mxu0 %v13415_v43  ;;  %11633 = vmatprep.mubr.msk.f32.mxu0 %vm12816_vm8, %v12817_v11 }
0x29a2   :  { %12373 = vmatprep.subr.bf16.mxu0 %v12815_v28 }
0x29a5   :  { %12375 = vmatpush3.bf16.msra.mxu0 %v13424_v50 }
0x29a6   :  { %12376 = vmatprep.subr.bf16.mxu0 %v12815_v28 }
0x29a8   :  { %11634 = vmatmul.mubr.f32.vlgmr.msra.gmra.mrb[44].mxu0 %v8511_v12 }
0x29a9   :  { %12378 = vmatpush3.bf16.msra.mxu0 %v13418_v46  ;;  %11644 = vmatprep.mubr.msk.f32.mxu0 %vm12816_vm8, %v12817_v11 }
0x29aa   :  { %12379 = vmatprep.subr.bf16.mxu0 %v12815_v28 }
0x29ad   :  { %12381 = vmatpush3.bf16.msra.mxu0 %v13427_v51 }
0x29ae   :  { %12382 = vmatprep.subr.bf16.mxu0 %v12815_v28 }
0x29b0   :  { %11645 = vmatmul.mubr.f32.vlgmr.msra.gmra.mrb[44].mxu0 %v8512_v15  ;;  %v9605_v15 = vsub.f32 %v9490_v25, %v9513_v27 }
0x29b1   :  { %12384 = vmatpush3.bf16.msra.mxu0 %v13408_v16  ;;  %11655 = vmatprep.mubr.msk.f32.mxu0 %vm12816_vm8, %v12817_v11 }
0x29b2   :  { %12385 = vmatprep.subr.bf16.mxu0 %v12815_v28 }
0x29b5   :  { %12387 = vmatpush3.bf16.msra.mxu0 %v13412_v35 }
0x29b6   :  { %12388 = vmatprep.subr.bf16.mxu0 %v12815_v28 }
0x29b8   :  { %11656 = vmatmul.mubr.f32.vlgmr.msra.gmra.mrb[44].mxu0 %v8513_v17  ;;  %v9586_v17 = vsub.f32 %v9584_v20, %v9585_v29 }
0x29b9   :  { %12390 = vmatpush3.bf16.msra.mxu0 %v13431_v52  ;;  %11666 = vmatprep.mubr.msk.f32.mxu0 %vm12816_vm8, %v12817_v11 }
0x29ba   :  { %12391 = vmatprep.subr.bf16.mxu0 %v12815_v28 }
0x29bd   :  { %12393 = vmatpush3.bf16.msra.mxu0 %v13438_v53 }
0x29be   :  { %12394 = vmatprep.subr.bf16.mxu0 %v12815_v28 }
0x29c0   :  { %11667 = vmatmul.mubr.f32.vlgmr.msra.gmra.mrb[44].mxu0 %v8511_v12 }
0x29c1   :  { %12396 = vmatpush3.bf16.msra.mxu0 %v13408_v16  ;;  %11677 = vmatprep.mubr.msk.f32.mxu0 %vm12816_vm8, %v12817_v11 }
0x29c2   :  { %12397 = vmatprep.subr.bf16.mxu0 %v12815_v28 }
0x29c5   :  { %12399 = vmatpush3.bf16.msra.mxu0 %v13412_v35 }
0x29c6   :  { %12436 = vmatprep.subr.bf16.mxu0 %v12815_v28 }
0x29c8   :  { %11678 = vmatmul.mubr.f32.vlgmr.msra.gmra.mrb[44].mxu0 %v8511_v12  ;;  %v9598_v12 = vsub.f32 %v9489_v23, %v9510_v26 }
0x29c9   :  { %11754 = vmatprep.mubr.msk.f32.mxu0 %vm12816_vm8, %v12817_v11  ;;  %12438 = vmatpush3.bf16.msra.mxu0 %v13831_v14 }
0x29ca   :  { %12439 = vmatprep.subr.bf16.mxu0 %v12815_v28 }
0x29cd   :  { %12441 = vmatpush3.bf16.msra.mxu0 %v12440_v22 }
0x29ce   :  { %12442 = vmatprep.subr.bf16.mxu0 %v12815_v28 }
0x2a9b   :  { %v8923_v7 = vpop.f32.mrb[44].mxu0 }
0x2a9c   :  { %v8928_v19 = vrot.slane %v8923_v7, 4  ;;  %v11679_v5 = vpop.f32.mrb[45].mxu0 }
0x2a9d   :  { %v9599_v5 = vand.u32 4294901760, %v9598_v12 }
0x2a9e   :  { %v8930_v30 = vadd.f32 %v13506_v3, %v8928_v19  ;;  %v9587_v19 = vand.u32 4294901760, %v9586_v17 }
0x2aa0   :  { %12748 = vtanh.f32 %v8930_v30  ;;  %v10027_v32 = vmul.f32 -1.442695, %v8930_v30  ;;  %v9606_v30 = vand.u32 4294901760, %v9605_v15 }
0x2aa2   :  { %12750 = vpow2.f32 %v10027_v32  ;;  %v9481_v32 = vrot.slane %v13389_v8, 6 }
0x2aaa   :  { %v12749_v31 = vpop.eup %12748 }
0x2aab   :  { %8943 = vrot.lane.b32.xlu1 %v12749_v31, %s12818_s17  ;;  %v9594_v31 = vand.u32 4294901760, %v9593_v18 }
0x2aac   :  { %v12751_v33 = vpop.eup %12750 }
0x2aad   :  { %v8934_v37 = vadd.f32 1.0, %v12751_v33 }
0x2aaf   :  { %12752 = vrcp.f32 %v8934_v37  ;;  %v9600_v37 = vsub.f32 %v9598_v12, %v9599_v5 }
0x2ab9   :  { %v12753_v38 = vpop.eup %12752 }
0x2aba   :  { %v8941_v45 = vmul.f32 %v12753_v38, %v8939_v44  ;;  %v9601_v44 = vand.u32 4294901760, %v9600_v37 }
0x2b1d   :  { %v8944_v39 = vpop.permute.xlu1 %8943 }
0x2b1e   :  { %v8946_v34 = vmul.f32 %v12753_v38, %v8944_v39  ;;  %v12443_v39 = vpack.c.bf16 %v9594_v31, %v9587_v19 }
0x2b20   :  { %8948 = vrot.lane.b32.xlu0 %v8946_v34, %s12819_s18 }
0x2b92   :  { %v8949_v47 = vpop.permute.xlu0 %8948 }
0x2b93   :  { %v13785_v48 = vadd.f32 %v8949_v47, %v8941_v45 }
0x2b95   :  { %12754 = vtanh.f32 %v13785_v48 }
0x2b9f   :  { %v12755_v54 = vpop.eup %12754 }
0x2ba0   :  { %8954 = vrot.lane.b32.xlu1 %v12755_v54, %s12818_s17  ;;  %v12452_v54 = vpack.c.bf16 %v9605_v15, %v9598_v12 }
0x2c12   :  { %v8955_v55 = vpop.permute.xlu1 %8954 }
0x2c13   :  { %v8957_v56 = vmul.f32 %v12753_v38, %v8955_v55  ;;  %v9607_v38 = vsub.f32 %v9605_v15, %v9606_v30  ;;  %v12461_v55 = vpack.c.bf16 %v9592_v36, %v9585_v29 }
0x2c15   :  { %v8959_v57 = vrot.slane %v8957_v56, 4  ;;  %v9608_v45 = vand.u32 4294901760, %v9607_v38  ;;  %v12464_v56 = vpack.c.bf16 %v9606_v30, %v9599_v5 }
0x2c17   :  { %8960 = vrot.lane.b32.xlu0 %v8959_v57, %s12819_s18  ;;  %v12446_v47 = vpack.c.bf16 %v9608_v45, %v9601_v44 }
0x2c89   :  { %v8961_v60 = vpop.permute.xlu0 %8960 }
0x2c8a   :  { %v8962_v61 = vsel %vm596_vm9, %v8961_v60, 0 }
0x2c8b   :  { %v9033_v62 = vand.u32 4294901760, %v8962_v61 }
0x2c8d   :  { %v9034_v40 = vsub.f32 %v8962_v61, %v9033_v62 }
0x2c8f   :  { %v9035_v41 = vand.u32 4294901760, %v9034_v40 }
0x2c91   :  { %v9036_v42 = vsub.f32 %v9034_v40, %v9035_v41 }
0x2c93   :  { %v9037_v49 = vand.u32 4294901760, %v9036_v42  ;;  %v10029_v42 = vld [vmem:[%s13887_s5] ss:$0 sm:$0xff] }
0x2c95   :  { %11689 = vmatmul.mubr.f32.vlgmr.msra.gmra.mrb[30].mxu1 %v9037_v49 }
0x2c96   :  { %12408 = vmatpush3.bf16.msra.mxu1 %v13415_v43  ;;  %11699 = vmatprep.mubr.msk.f32.mxu1 %vm12816_vm8, %v12817_v11 }
0x2c97   :  { %12409 = vmatprep.subr.bf16.mxu1 %v12815_v28 }
0x2c9a   :  { %12411 = vmatpush3.bf16.msra.mxu1 %v13424_v50 }
0x2c9b   :  { %12412 = vmatprep.subr.bf16.mxu1 %v12815_v28 }
0x2c9d   :  { %11700 = vmatmul.mubr.f32.vlgmr.msra.gmra.mrb[30].mxu1 %v9033_v62 }
0x2c9e   :  { %12414 = vmatpush3.bf16.msra.mxu1 %v13418_v46  ;;  %11710 = vmatprep.mubr.msk.f32.mxu1 %vm12816_vm8, %v12817_v11 }
0x2c9f   :  { %12415 = vmatprep.subr.bf16.mxu1 %v12815_v28 }
0x2ca2   :  { %12417 = vmatpush3.bf16.msra.mxu1 %v13427_v51 }
0x2ca3   :  { %12418 = vmatprep.subr.bf16.mxu1 %v12815_v28 }
0x2ca5   :  { %11711 = vmatmul.mubr.f32.vlgmr.msra.gmra.mrb[30].mxu1 %v9034_v40 }
0x2ca6   :  { %12420 = vmatpush3.bf16.msra.mxu1 %v13408_v16  ;;  %11721 = vmatprep.mubr.msk.f32.mxu1 %vm12816_vm8, %v12817_v11 }
0x2ca7   :  { %12421 = vmatprep.subr.bf16.mxu1 %v12815_v28 }
0x2caa   :  { %12423 = vmatpush3.bf16.msra.mxu1 %v13412_v35 }
0x2cab   :  { %12424 = vmatprep.subr.bf16.mxu1 %v12815_v28 }
0x2cad   :  { %11722 = vmatmul.mubr.f32.vlgmr.msra.gmra.mrb[30].mxu1 %v9035_v41 }
0x2cae   :  { %12426 = vmatpush3.bf16.msra.mxu1 %v13431_v52  ;;  %11732 = vmatprep.mubr.msk.f32.mxu1 %vm12816_vm8, %v12817_v11 }
0x2caf   :  { %12427 = vmatprep.subr.bf16.mxu1 %v12815_v28 }
0x2cb2   :  { %12429 = vmatpush3.bf16.msra.mxu1 %v13438_v53 }
0x2cb3   :  { %12430 = vmatprep.subr.bf16.mxu1 %v12815_v28 }
0x2cb5   :  { %11733 = vmatmul.mubr.f32.vlgmr.msra.gmra.mrb[30].mxu1 %v9033_v62 }
0x2cb6   :  { %12432 = vmatpush3.bf16.msra.mxu1 %v13408_v16  ;;  %11743 = vmatprep.mubr.msk.f32.mxu1 %vm12816_vm8, %v12817_v11 }
0x2cb7   :  { %12433 = vmatprep.subr.bf16.mxu1 %v12815_v28 }
0x2cba   :  { %12435 = vmatpush3.bf16.msra.mxu1 %v13412_v35  ;;  %v9461_v35 = vrot.slane %v13785_v48, 6  ;;  %v12449_v48 = vpack.c.bf16 %v9591_v21, %v9584_v20 }
0x2cbd   :  { %11744 = vmatmul.mubr.f32.vlgmr.msra.gmra.mrb[30].mxu1 %v9033_v62 }
0x2d90   :  { %v9445_v43 = vpop.f32.mrb[30].mxu1 }
0x2d91   :  { %v9450_v46 = vrot.slane %v9445_v43, 2  ;;  %v11745_v50 = vpop.f32.mrb[31].mxu1 }
0x2d93   :  { %v9452_v51 = vadd.f32 %v13506_v3, %v9450_v46 }
0x2d95   :  { %12756 = vtanh.f32 %v9452_v51  ;;  %v10028_v53 = vmul.f32 -1.442695, %v9452_v51 }
0x2d97   :  { %12758 = vpow2.f32 %v10028_v53 }
0x2d9f   :  { %v12757_v52 = vpop.eup %12756 }
0x2da0   :  { %9465 = vrot.lane.b32.xlu1 %v12757_v52, %s12818_s17 }
0x2da1   :  { %v12759_v16 = vpop.eup %12758 }
0x2da2   :  { %v9456_v58 = vadd.f32 1.0, %v12759_v16 }
0x2da4   :  { %12760 = vrcp.f32 %v9456_v58 }
0x2dae   :  { %v12761_v0 = vpop.eup %12760 }
0x2daf   :  { %v9463_v2 = vmul.f32 %v12761_v0, %v9461_v35 }
0x2e12   :  { %v9466_v24 = vpop.permute.xlu1 %9465 }
0x2e13   :  { %v9468_v1 = vmul.f32 %v12761_v0, %v9466_v24 }
0x2e15   :  { %9470 = vrot.lane.b32.xlu0 %v9468_v1, %s12819_s18 }
0x2e87   :  { %v9471_v4 = vpop.permute.xlu0 %9470 }
0x2e88   :  { %v9473_v6 = vadd.f32 %v9471_v4, %v9463_v2 }
0x2e8a   :  { %12762 = vtanh.f32 %v9473_v6 }
0x2e94   :  { %v12763_v3 = vpop.eup %12762 }
0x2e95   :  { %9476 = vrot.lane.b32.xlu1 %v12763_v3, %s12818_s17 }
0x2f07   :  { %v9477_v63 = vpop.permute.xlu1 %9476 }
0x2f08   :  { %v9479_v7 = vmul.f32 %v12761_v0, %v9477_v63 }
0x2f0a   :  { %v9484_v33 = vrot.slane %v9479_v7, 4 }
0x2f0c   :  { %v9486_v34 = vsel %vm82_vm5, %v9481_v32, %v9484_v33 }
0x2f0d   :  { %9499 = vrot.lane.b32.xlu0 %v9486_v34, %s12819_s18 }
0x2f7f   :  { %v9500_v57 = vpop.permute.xlu0 %9499 }
0x2f80   :  { %v9501_v60 = vsel %vm596_vm9, %v9500_v57, 0 }
0x2f81   :  { %v9572_v61 = vand.u32 4294901760, %v9501_v60 }
0x2f83   :  { %v9573_v8 = vsub.f32 %v9501_v60, %v9572_v61 }
0x2f85   :  { %v9574_v62 = vand.u32 4294901760, %v9573_v8 }
0x2f87   :  { %v9575_v40 = vsub.f32 %v9573_v8, %v9574_v62 }
0x2f89   :  { %v9576_v41 = vand.u32 4294901760, %v9575_v40 }
0x2f8b   :  { %11755 = vmatmul.mubr.f32.vlgmr.msra.gmra.mrb[46].mxu0 %v9576_v41 }
0x2f8c   :  { %12444 = vmatpush3.bf16.msra.mxu0 %v12443_v39  ;;  %11765 = vmatprep.mubr.msk.f32.mxu0 %vm12816_vm8, %v12817_v11 }
0x2f8d   :  { %12445 = vmatprep.subr.bf16.mxu0 %v12815_v28 }
0x2f90   :  { %12447 = vmatpush3.bf16.msra.mxu0 %v12446_v47 }
0x2f91   :  { %12448 = vmatprep.subr.bf16.mxu0 %v12815_v28 }
0x2f93   :  { %11766 = vmatmul.mubr.f32.vlgmr.msra.gmra.mrb[46].mxu0 %v9572_v61 }
0x2f94   :  { %12450 = vmatpush3.bf16.msra.mxu0 %v12449_v48  ;;  %11776 = vmatprep.mubr.msk.f32.mxu0 %vm12816_vm8, %v12817_v11 }
0x2f95   :  { %12451 = vmatprep.subr.bf16.mxu0 %v12815_v28 }
0x2f98   :  { %12453 = vmatpush3.bf16.msra.mxu0 %v12452_v54 }
0x2f99   :  { %12454 = vmatprep.subr.bf16.mxu0 %v12815_v28 }
0x2f9b   :  { %11777 = vmatmul.mubr.f32.vlgmr.msra.gmra.mrb[46].mxu0 %v9573_v8 }
0x2f9c   :  { %12456 = vmatpush3.bf16.msra.mxu0 %v13831_v14  ;;  %11787 = vmatprep.mubr.msk.f32.mxu0 %vm12816_vm8, %v12817_v11 }
0x2f9d   :  { %12457 = vmatprep.subr.bf16.mxu0 %v12815_v28 }
0x2fa0   :  { %12459 = vmatpush3.bf16.msra.mxu0 %v12440_v22 }
0x2fa1   :  { %12460 = vmatprep.subr.bf16.mxu0 %v12815_v28 }
0x2fa3   :  { %11788 = vmatmul.mubr.f32.vlgmr.msra.gmra.mrb[46].mxu0 %v9574_v62 }
0x2fa4   :  { %12462 = vmatpush3.bf16.msra.mxu0 %v12461_v55  ;;  %11798 = vmatprep.mubr.msk.f32.mxu0 %vm12816_vm8, %v12817_v11 }
0x2fa5   :  { %12463 = vmatprep.subr.bf16.mxu0 %v12815_v28 }
0x2fa8   :  { %12465 = vmatpush3.bf16.msra.mxu0 %v12464_v56 }
0x2fa9   :  { %12466 = vmatprep.subr.bf16.mxu0 %v12815_v28 }
0x2fab   :  { %11799 = vmatmul.mubr.f32.vlgmr.msra.gmra.mrb[46].mxu0 %v9572_v61 }
0x2fac   :  { %12468 = vmatpush3.bf16.msra.mxu0 %v13831_v14  ;;  %11809 = vmatprep.mubr.msk.f32.mxu0 %vm12816_vm8, %v12817_v11 }
0x2fad   :  { %12469 = vmatprep.subr.bf16.mxu0 %v12815_v28 }
0x2fb0   :  { %12471 = vmatpush3.bf16.msra.mxu0 %v12440_v22 }
0x2fb3   :  { %11810 = vmatmul.mubr.f32.vlgmr.msra.gmra.mrb[46].mxu0 %v9572_v61 }
0x3086   :  { %v9984_v49 = vpop.f32.mrb[46].mxu0 }
0x3087   :  { %v12478_v43 = vadd.f32 %v10029_v42, %v9984_v49  ;;  %v11811_v46 = vpop.f32.mrb[47].mxu0 }
0x3089   :  { %v9988_v50 = vmax.f32 %v12478_v43, 0.0 }
0x308b   :  { %9990 = vst.msk [vmem:[#allocation5] sm:$0xf] %vm9989_vm10, %v9988_v50 }
0x308c   :  { %12797 = shalt.err (!%p12794_p12)
}
0x308d   :  { %s12798_s5 = scalar_lea.hbm %s13888_s6, 64 }
0x308e   :  { %p12799_p13 = scmp.ne.s32.totalorder %s13888_s6, %s12798_s5  ;;  %p12802_p0 = scmp.lt.u32.totalorder %s12798_s5, %s13888_s6 }
0x3090   :  { %p12804_p1 = pnand %p12802_p0, %p12799_p13 }
0x3092   :  { %12807 = shalt.err (!%p12804_p1)
}
0x3093   :  { %10000 = dma.vmem_to_hbm [thread:$0]  %s9998_s13, 64, %s13888_s6, [#allocation4]  }
0x3094   :  { %12810 = dma.done.wait [#allocation4], 64  }
0x3095   :  { %12811 = vsyncadd [#allocation4], 4294967232 }
0x3096   :  { %10004 = vsyncpa [#allocation3], 1 }
0x3097   :  { %10005 = vsyncpa [#allocation4], 1 }

</bundles_post_ra>
